<compile_context>
chip_gen: v7x
topology: tpu7x:2x2x1
jax: 0.10.0
libtpu: 0.0.40
codegen_flags: <defaults>
</compile_context>

<pallas_src>
import math

import jax
import jax.numpy as jnp
from jax.experimental import pallas as pl
from jax.experimental.pallas import tpu as pltpu

KERNEL_SIZE = 7
PAD = KERNEL_SIZE // 2


def _make_conv_matrices(weight, h_dim, w_dim):
    """Fold the full 7x7 conv (taps + zero padding) into two (HW, HW) matrices.

    Acting on flat row-major spatial vectors:
        logits_flat = avg_flat @ G[0] + max_flat @ G[1]
    with G[c, j, p] = weight[0, c, ys - yo + PAD, xs - xo + PAD]
    for j = ys*W + xs (input position), p = yo*W + xo (output position),
    zero when the tap falls outside the 7x7 window (this encodes the conv's
    zero padding exactly, because out-of-image input positions simply do not
    exist in j's range).
    """
    hw = h_dim * w_dim
    w = weight.reshape(2, KERNEL_SIZE, KERNEL_SIZE).astype(jnp.float32)
    idx = jnp.arange(hw)
    ys, xs = (idx // w_dim)[:, None], (idx % w_dim)[:, None]   # input position
    yo, xo = (idx // w_dim)[None, :], (idx % w_dim)[None, :]   # output position
    ky = ys - yo + PAD
    kx = xs - xo + PAD
    valid = ((ky >= 0) & (ky < KERNEL_SIZE) &
             (kx >= 0) & (kx < KERNEL_SIZE)).astype(jnp.float32)
    kyc = jnp.clip(ky, 0, KERNEL_SIZE - 1)
    kxc = jnp.clip(kx, 0, KERNEL_SIZE - 1)
    return w[:, kyc, kxc] * valid[None]                         # (2, HW, HW)


def spatial_attention_kernel(g_ref, x_ref, o_ref):
    # g_ref: (2, HW, HW) f32 VMEM  conv-as-matrix (avg channel, max channel)
    # x_ref: (tb, C, HW)  f32 VMEM lane-dense per-batch-tile feature slab
    # o_ref: (tb, C, HW)
    C = x_ref.shape[1]

    x = x_ref[...].astype(jnp.float32)                    # (tb, C, HW)

    # Channel-wise pooling at full lane width (f32 accumulate).
    avg = jnp.sum(x, axis=1) * (1.0 / C)                  # (tb, HW)
    mx = jnp.max(x, axis=1)                               # (tb, HW)

    # 7x7 conv as two flat MXU matmuls (all tb batches at once, no relayout).
    logits = (jnp.dot(avg, g_ref[0], preferred_element_type=jnp.float32,
                      precision=jax.lax.Precision.HIGHEST)
              + jnp.dot(mx, g_ref[1], preferred_element_type=jnp.float32,
                        precision=jax.lax.Precision.HIGHEST))   # (tb, HW)

    # Numerically-stable sigmoid on the EUP.
    attn = 0.5 * (jnp.tanh(0.5 * logits) + 1.0)           # (tb, HW)

    # Dominant lane-dense rescale + store (broadcast over channels).
    o_ref[...] = (x * attn[:, None, :]).astype(o_ref.dtype)


def _vmem_capacity_bytes():
    try:
        return int(pltpu.get_tpu_info().vmem_capacity_bytes)
    except Exception:
        return 64 * 1024 * 1024   # conservative default (v7x per-TC VMEM)


def spatial_attention(x, weight, *, target_block_bytes=1 << 20):
    """x: (B, C, H, W) f32, weight: (1, 2, 7, 7) f32  ->  (B, C, H, W) f32."""
    B, C, H, W = x.shape
    HW = H * W
    x_flat = x.reshape(B, C, HW)                      # lane-dense layout
    g = _make_conv_matrices(weight, H, W)             # (2, HW, HW)

    per_batch_bytes = 4 * C * HW
    g_bytes = 4 * 2 * HW * HW
    budget = max(_vmem_capacity_bytes() - (8 << 20), 32 << 20)

    # Batch tile tb: divisor of B, >= ~1 MiB of input per grid step when
    # possible, small enough that double-buffered in+out blocks plus the
    # (grid-resident) conv matrices fit the VMEM budget.
    tb = 1
    for d in range(1, B + 1):
        if B % d:
            continue
        if 4 * d * per_batch_bytes + 2 * g_bytes + (2 << 20) <= budget:
            tb = d
            if d * per_batch_bytes >= target_block_bytes:
                break

    needed = 4 * tb * per_batch_bytes + 2 * g_bytes + (4 << 20)
    vmem_limit = int(min(max(needed, 32 << 20), budget))

    out_flat = pl.pallas_call(
        spatial_attention_kernel,
        out_shape=jax.ShapeDtypeStruct((B, C, HW), x.dtype),
        grid=(B // tb,),
        in_specs=[
            pl.BlockSpec((2, HW, HW), lambda b: (0, 0, 0)),   # conv matrices (constant)
            pl.BlockSpec((tb, C, HW), lambda b: (b, 0, 0)),   # batch-tile slab
        ],
        out_specs=pl.BlockSpec((tb, C, HW), lambda b: (b, 0, 0)),
        compiler_params=pltpu.CompilerParams(
            dimension_semantics=("parallel",),                # megacore batch split
            vmem_limit_bytes=vmem_limit,
        ),
    )(g, x_flat)
    return out_flat.reshape(B, C, H, W)


def init_conv_weight(key):
    """Deterministic init mimicking PyTorch Conv2d default (kaiming-uniform bound)."""
    fan_in = 2 * KERNEL_SIZE * KERNEL_SIZE
    bound = 1.0 / math.sqrt(fan_in)
    return jax.random.uniform(
        key, (1, 2, KERNEL_SIZE, KERNEL_SIZE), jnp.float32, -bound, bound
    )


def reference_spatial_attention(x, weight):
    """Pure-JAX reference matching the PyTorch forward (full-precision conv)."""
    avg_pool = jnp.mean(x, axis=1, keepdims=True)
    max_pool = jnp.max(x, axis=1, keepdims=True)
    pooled = jnp.concatenate([avg_pool, max_pool], axis=1)
    conv = jax.lax.conv_general_dilated(
        pooled, weight, window_strides=(1, 1),
        padding=[(PAD, PAD), (PAD, PAD)],
        dimension_numbers=("NCHW", "OIHW", "NCHW"),
        precision=jax.lax.Precision.HIGHEST,
    )
    return x * jax.nn.sigmoid(conv)


def reference_matrix_formulation(x, g):
    """Pure-JAX check of the conv-as-matrix reformulation used by the kernel."""
    B, C, H, W = x.shape
    HW = H * W
    avg = jnp.mean(x, axis=1).reshape(B, HW)
    mx = jnp.max(x, axis=1).reshape(B, HW)
    logits = (avg @ g[0] + mx @ g[1]).reshape(B, 1, H, W)
    return x * jax.nn.sigmoid(logits)


if __name__ == "__main__":
    key = jax.random.PRNGKey(0)
    k_x, k_w = jax.random.split(key)

    B, C, H, W = 2, 4, 16, 16
    x = jax.random.normal(k_x, (B, C, H, W), jnp.float32)
    weight = init_conv_weight(k_w)

    # (a) Validate the conv-as-matrix reformulation against the true 7x7 conv
    #     in pure JAX at full precision (tight tolerance).
    ref = jax.block_until_ready(reference_spatial_attention(x, weight))
    ref_mat = jax.block_until_ready(
        reference_matrix_formulation(x, _make_conv_matrices(weight, H, W)))
    assert jnp.allclose(ref_mat, ref, atol=1e-5, rtol=1e-5), "matrix formulation mismatch"

    # (b) Pallas kernel vs reference (HIGHEST-precision MXU matmul -> tight).
    out = jax.block_until_ready(spatial_attention(x, weight))
    assert out.shape == (B, C, H, W)
    assert jnp.allclose(out, ref, atol=1e-3, rtol=1e-3), "kernel mismatch vs reference"

    print("KERNEL_OK")
</pallas_src>

<mosaic_0001>
module attributes {stable_mosaic.version = 11 : i64} {
  func.func @spatial_attention_kernel(%arg0: i32, %arg1: memref<2x256x256xf32, #tpu.memory_space<vmem>>, %arg2: memref<2x4x256xf32, #tpu.memory_space<vmem>>, %arg3: memref<2x4x256xf32, #tpu.memory_space<vmem>>) attributes {dimension_semantics = [#tpu.dimension_semantics<parallel>], iteration_bounds = array<i64: 1>, scalar_prefetch = 0 : i64, scratch_operands = 0 : i64, tpu.core_type = #tpu.core_type<tc>, window_params = [{pipeline_mode = #tpu.pipeline_mode<synchronous>, transform_indices = @transform_0, window_bounds = array<i64: 2, 256, 256>}, {transform_indices = @transform_1, window_bounds = array<i64: 2, 4, 256>}, {transform_indices = @transform_2, window_bounds = array<i64: 2, 4, 256>}]} {
    %c0 = arith.constant 0 : index
    %c0_0 = arith.constant 0 : index
    %c0_1 = arith.constant 0 : index
    %0 = vector.load %arg2[%c0, %c0_0, %c0_1] : memref<2x4x256xf32, #tpu.memory_space<vmem>>, vector<2x4x256xf32>
    %cst = arith.constant dense<0.000000e+00> : vector<2x256xf32>
    %1 = vector.multi_reduction <add>, %0, %cst [1] : vector<2x4x256xf32> to vector<2x256xf32>
    %cst_2 = arith.constant 2.500000e-01 : f32
    %2 = vector.broadcast %cst_2 : f32 to vector<2x256xf32>
    %3 = arith.mulf %1, %2 : vector<2x256xf32>
    %cst_3 = arith.constant dense<0xFF800000> : vector<2x256xf32>
    %4 = vector.multi_reduction <maximumf>, %0, %cst_3 [1] : vector<2x4x256xf32> to vector<2x256xf32>
    %c0_4 = arith.constant 0 : index
    %c0_5 = arith.constant 0 : index
    %c0_6 = arith.constant 0 : index
    %5 = vector.load %arg1[%c0_4, %c0_5, %c0_6] : memref<2x256x256xf32, #tpu.memory_space<vmem>>, vector<1x256x256xf32>
    %6 = vector.shape_cast %5 : vector<1x256x256xf32> to vector<256x256xf32>
    %cst_7 = arith.constant dense<0.000000e+00> : vector<2x256xf32>
    %7 = tpu.matmul %3, %6, %cst_7 {dimension_numbers = #tpu.dot_dimension_numbers<[1], [0], [0], [1], [0, 0, 1, 1], [], []>, precision = #tpu.contract_precision<fp32>} : vector<2x256xf32>, vector<256x256xf32>, vector<2x256xf32> -> vector<2x256xf32>
    %c1 = arith.constant 1 : index
    %c0_8 = arith.constant 0 : index
    %c0_9 = arith.constant 0 : index
    %8 = vector.load %arg1[%c1, %c0_8, %c0_9] : memref<2x256x256xf32, #tpu.memory_space<vmem>>, vector<1x256x256xf32>
    %9 = vector.shape_cast %8 : vector<1x256x256xf32> to vector<256x256xf32>
    %cst_10 = arith.constant dense<0.000000e+00> : vector<2x256xf32>
    %10 = tpu.matmul %4, %9, %cst_10 {dimension_numbers = #tpu.dot_dimension_numbers<[1], [0], [0], [1], [0, 0, 1, 1], [], []>, precision = #tpu.contract_precision<fp32>} : vector<2x256xf32>, vector<256x256xf32>, vector<2x256xf32> -> vector<2x256xf32>
    %11 = arith.addf %7, %10 : vector<2x256xf32>
    %cst_11 = arith.constant 5.000000e-01 : f32
    %12 = vector.broadcast %cst_11 : f32 to vector<2x256xf32>
    %13 = arith.mulf %12, %11 : vector<2x256xf32>
    %14 = math.tanh %13 : vector<2x256xf32>
    %cst_12 = arith.constant 1.000000e+00 : f32
    %15 = vector.broadcast %cst_12 : f32 to vector<2x256xf32>
    %16 = arith.addf %14, %15 : vector<2x256xf32>
    %cst_13 = arith.constant 5.000000e-01 : f32
    %17 = vector.broadcast %cst_13 : f32 to vector<2x256xf32>
    %18 = arith.mulf %17, %16 : vector<2x256xf32>
    %19 = vector.shape_cast %18 : vector<2x256xf32> to vector<2x1x256xf32>
    %20 = vector.broadcast %19 : vector<2x1x256xf32> to vector<2x4x256xf32>
    %21 = arith.mulf %0, %20 : vector<2x4x256xf32>
    %c0_14 = arith.constant 0 : index
    %c0_15 = arith.constant 0 : index
    %c0_16 = arith.constant 0 : index
    %22 = vector.load %arg3[%c0_14, %c0_15, %c0_16] : memref<2x4x256xf32, #tpu.memory_space<vmem>>, vector<2x4x256xf32>
    tpu.vector_store %arg3[%c0_14, %c0_15, %c0_16], %21 {strides = array<i32>} : memref<2x4x256xf32, #tpu.memory_space<vmem>>, vector<2x4x256xf32>,
    return
  }
  func.func @transform_0(%arg0: i32) -> (i32, i32, i32) {
    %c0_i32 = arith.constant 0 : i32
    %c0_i32_0 = arith.constant 0 : i32
    %c0_i32_1 = arith.constant 0 : i32
    %c0_i32_2 = arith.constant 0 : i32
    return %c0_i32, %c0_i32_0, %c0_i32_1 : i32, i32, i32
  }
  func.func @transform_1(%arg0: i32) -> (i32, i32, i32) {
    %c0_i32 = arith.constant 0 : i32
    %c0_i32_0 = arith.constant 0 : i32
    %c0_i32_1 = arith.constant 0 : i32
    return %arg0, %c0_i32, %c0_i32_0 : i32, i32, i32
  }
  func.func @transform_2(%arg0: i32) -> (i32, i32, i32) {
    %c0_i32 = arith.constant 0 : i32
    %c0_i32_0 = arith.constant 0 : i32
    %c0_i32_1 = arith.constant 0 : i32
    return %arg0, %c0_i32, %c0_i32_0 : i32, i32, i32
  }
}

</mosaic_0001>

<bundles_post_ra>
// kernel: tpu_custom_call.1
= control target key start
LH: loop header
LB: loop body
LE: loop exit
PB: predicated region body
PF: predicated region fallthrough
CT: control target
= control target key end

     0   :  { %7 = vsyncpa [#allocation3], 0  ;;  %s5493_s0 = inlined_call_operand.hbm [shape: f32[2,256,256], index: 0, kind: input, shape index: {}]   ;;  %s5494_s1 = inlined_call_operand.hbm [shape: f32[2,4,256], index: 1, kind: input, shape index: {}]   ;;  %s5495_s2 = inlined_call_operand.hbm [shape: f32[2,4,256], index: 2, kind: output, shape index: {}]  }
   0x1   :  { %8 = vsyncpa [#allocation6], 0 }
   0x2   :  { %9 = vsyncpa [#allocation4], 0  ;;  %s3776_s9 = smov [#allocation2]   ;;  %s3704_s13 = scalar_lea.hbm %s5493_s0, 16384 }
   0x3   :  { %s15_s10 = sshll.u32 %s3776_s9, 4  ;;  %p3705_p0 = scmp.ne.s32.totalorder %s5493_s0, %s3704_s13  ;;  %s16_s10 = int_to_ptr.vmem [resolvable:$true] %s15_s10 }
   0x4   :  { %p3708_p1 = scmp.lt.u32.totalorder %s3704_s13, %s5493_s0 }
   0x6   :  { %p3710_p2 = pnand %p3708_p1, %p3705_p0 }
   0x8   :  { %3713 = shalt.err (!%p3710_p2)
}
   0x9   :  { %s3714_s18 = scalar_lea.vmem %s16_s10, 16384  ;;  %p3719_p4 = scmp.lt.s32.totalorder %s16_s10, %s16_s10 }
   0xa   :  { %p3715_p3 = scmp.ne.s32.totalorder %s16_s10, %s3714_s18  ;;  %p3720_p5 = scmp.lt.s32.totalorder %s3714_s18, %s3714_s18 }
   0xc   :  { %p3721_p6 = por %p3720_p5, %p3719_p4 }
   0xe   :  { %p3722_p7 = pnand %p3721_p6, %p3715_p3 }
  0x10   :  { %3725 = shalt.err (!%p3722_p7)
}
  0x11   :  { %s3777_s19 = smov 256   ;;  %s3778_s20 = smov 16  }
  0x12   :  { %21 = dma.hbm_to_vmem [thread:$0]  %s5493_s0, 16384, %s16_s10, [#allocation3], %s3777_s19, %s3777_s19, %s3778_s20  }
  0x13   :  { %s3779_s23 = smov [#allocation5]   ;;  %s3726_s27 = scalar_lea.hbm %s5494_s1, 256 }
  0x14   :  { %s27_s24 = sshll.u32 %s3779_s23, 4  ;;  %p3727_p8 = scmp.ne.s32.totalorder %s5494_s1, %s3726_s27  ;;  %s28_s24 = int_to_ptr.vmem [resolvable:$true] %s27_s24 }
  0x15   :  { %p3730_p9 = scmp.lt.u32.totalorder %s3726_s27, %s5494_s1 }
  0x17   :  { %p3732_p10 = pnand %p3730_p9, %p3727_p8 }
  0x19   :  { %3735 = shalt.err (!%p3732_p10)
}
  0x1a   :  { %s3736_s4 = scalar_lea.vmem %s28_s24, 256  ;;  %p3741_p12 = scmp.lt.s32.totalorder %s28_s24, %s28_s24 }
  0x1b   :  { %p3737_p11 = scmp.ne.s32.totalorder %s28_s24, %s3736_s4  ;;  %p3742_p13 = scmp.lt.s32.totalorder %s3736_s4, %s3736_s4 }
  0x1d   :  { %p3743_p0 = por %p3742_p13, %p3741_p12 }
  0x1f   :  { %p3744_p1 = pnand %p3743_p0, %p3737_p11 }
  0x21   :  { %3747 = shalt.err (!%p3744_p1)
}
  0x22   :  { %s3780_s0 = smov 128   ;;  %s3781_s5 = smov 8  }
  0x23   :  { %33 = dma.hbm_to_vmem [thread:$0]  %s5494_s1, 256, %s28_s24, [#allocation6], %s3780_s0, %s3780_s0, %s3781_s5  }
  0x24   :  { %3770 = dma.done.wait [#allocation3], 16384  }
  0x25   :  { %3771 = vsyncadd [#allocation3], 4294950912 }
  0x26   :  { %3772 = dma.done.wait [#allocation6], 256  }
  0x27   :  { %3773 = vsyncadd [#allocation6], 4294967040  ;;  %v175_v0 = vld [vmem:[#allocation2 + $0x208] sm:$0xff]  ;;  %v177_v1 = vld [vmem:[#allocation2 + $0x218] sm:$0xff]  ;;  %vm48_vm0 = vcmask 1043456   ;;  %vm242_vm1 = vcmask 1041409  }
  0x28   :  { %v110_v2 = vld [vmem:[#allocation2 + $0x8] sm:$0xff]  ;;  %v247_v3 = vand.u32 4294901760, %v175_v0  ;;  %v251_v4 = vand.u32 4294901760, %v177_v1  ;;  %v112_v5 = vld [vmem:[#allocation2 + $0x18] sm:$0xff]  ;;  %v174_v7 = vld [vmem:[#allocation2 + $0x200] sm:$0xff]  ;;  %s3783_s1 = smov [#allocation7]  }
  0x29   :  { %v1539_v6 = vand.u32 4294901760, %v110_v2  ;;  %v176_v8 = vld [vmem:[#allocation2 + $0x210] sm:$0xff]  ;;  %v1543_v9 = vand.u32 4294901760, %v112_v5  ;;  %v249_v10 = vand.u32 4294901760, %v174_v7  ;;  %v109_v12 = vld [vmem:[#allocation2] sm:$0xff]  ;;  %v179_v14 = vld [vmem:[#allocation2 + $0x228] sm:$0xff] }
  0x2a   :  { %v253_v11 = vand.u32 4294901760, %v176_v8  ;;  %v111_v13 = vld [vmem:[#allocation2 + $0x10] sm:$0xff]  ;;  %v3826_v15 = vpack.c.bf16 %v251_v4, %v247_v3  ;;  %v3828_v16 = vsub.f32 %v175_v0, %v247_v3  ;;  %v3830_v17 = vsub.f32 %v177_v1, %v251_v4  ;;  %v181_v19 = vld [vmem:[#allocation2 + $0x238] sm:$0xff]  ;;  %v114_v20 = vld [vmem:[#allocation2 + $0x28] sm:$0xff]  ;;  %s2885_s8 = sshll.u32 %s3783_s1, 4  ;;  %s2886_s8 = int_to_ptr.vmem [resolvable:$true] %s2885_s8 }
  0x2b   :  { %v3832_v18 = vsub.f32 %v110_v2, %v1539_v6  ;;  %v116_v21 = vld [vmem:[#allocation2 + $0x38] sm:$0xff]  ;;  %v3834_v22 = vpack.c.bf16 %v1543_v9, %v1539_v6  ;;  %v3836_v23 = vsub.f32 %v112_v5, %v1543_v9  ;;  %v3840_v25 = vsub.f32 %v174_v7, %v249_v10  ;;  %v178_v26 = vld [vmem:[#allocation2 + $0x220] sm:$0xff]  ;;  %v180_v31 = vld [vmem:[#allocation2 + $0x230] sm:$0xff]  ;;  %s3748_s9 = scalar_lea.vmem %s2886_s8, 256  ;;  %p3753_p3 = scmp.lt.s32.totalorder %s2886_s8, %s2886_s8 }
  0x2c   :  { %6007 = vst [vmem:[#allocation11_spill] sm:$0xff] %v3826_v15  ;;  %6008 = vst [vmem:[#allocation12_spill] sm:$0xff] %v3828_v16  ;;  %v3838_v24 = vpack.c.bf16 %v253_v11, %v249_v10  ;;  %2899 = vmatprep.subr.bf16.mxu1 %v3826_v15  ;;  %v3843_v27 = vsub.f32 %v176_v8, %v253_v11  ;;  %v1541_v28 = vand.u32 4294901760, %v109_v12  ;;  %v1545_v29 = vand.u32 4294901760, %v111_v13  ;;  %v113_v36 = vld [vmem:[#allocation2 + $0x20] sm:$0xff]  ;;  %v115_v37 = vld [vmem:[#allocation2 + $0x30] sm:$0xff]  ;;  %p3749_p2 = scmp.ne.s32.totalorder %s2886_s8, %s3748_s9  ;;  %p3754_p4 = scmp.lt.s32.totalorder %s3748_s9, %s3748_s9 }
  0x2d   :  { %6009 = vst [vmem:[#allocation13_spill] sm:$0xff] %v3830_v17  ;;  %6010 = vst [vmem:[#allocation14_spill] sm:$0xff] %v3832_v18  ;;  %v255_v30 = vand.u32 4294901760, %v179_v14  ;;  %3283 = vmatprep.subr.bf16.mxu0 %v3834_v22  ;;  %v259_v32 = vand.u32 4294901760, %v181_v19  ;;  %v1547_v33 = vand.u32 4294901760, %v114_v20  ;;  %v1551_v34 = vand.u32 4294901760, %v116_v21 }
  0x2e   :  { %6011 = vst [vmem:[#allocation15_spill] sm:$0xff] %v3834_v22  ;;  %6012 = vst [vmem:[#allocation16_spill] sm:$0xff] %v3836_v23  ;;  %2901 = vmatpush1.bf16.msra.mxu1 %v3838_v24  ;;  %v257_v35 = vand.u32 4294901760, %v178_v26  ;;  %v3847_v38 = vpack.c.bf16 %v1545_v29, %v1541_v28  ;;  %v3849_v39 = vsub.f32 %v109_v12, %v1541_v28  ;;  %v183_v42 = vld [vmem:[#allocation2 + $0x248] sm:$0xff]  ;;  %v185_v43 = vld [vmem:[#allocation2 + $0x258] sm:$0xff]  ;;  %v261_v51 = vand.u32 4294901760, %v180_v31  ;;  %p3755_p5 = por %p3754_p4, %p3753_p3 }
  0x2f   :  { %6013 = vst [vmem:[#allocation17_spill] sm:$0xff] %v3838_v24  ;;  %6014 = vst [vmem:[#allocation18_spill] sm:$0xff] %v3840_v25  ;;  %v3851_v40 = vsub.f32 %v111_v13, %v1545_v29  ;;  %v3853_v41 = vsub.f32 %v179_v14, %v255_v30  ;;  %v118_v44 = vld [vmem:[#allocation2 + $0x48] sm:$0xff]  ;;  %v3855_v45 = vpack.c.bf16 %v259_v32, %v255_v30  ;;  %v120_v49 = vld [vmem:[#allocation2 + $0x58] sm:$0xff]  ;;  %v1549_v53 = vand.u32 4294901760, %v113_v36 }
  0x30   :  { %6015 = vst [vmem:[#allocation19_spill] sm:$0xff] %v3843_v27  ;;  %6016 = vst [vmem:[#allocation20_spill] sm:$0xff] %v3847_v38  ;;  %v3857_v46 = vsub.f32 %v181_v19, %v259_v32  ;;  %v3859_v47 = vpack.c.bf16 %v1551_v34, %v1547_v33  ;;  %v3861_v48 = vsub.f32 %v114_v20, %v1547_v33  ;;  %3285 = vmatpush1.bf16.msra.mxu0 %v3847_v38  ;;  %v182_v58 = vld [vmem:[#allocation2 + $0x240] sm:$0xff]  ;;  %v184_v59 = vld [vmem:[#allocation2 + $0x250] sm:$0xff]  ;;  %p3756_p6 = pnand %p3755_p5, %p3749_p2 }
  0x31   :  { %6017 = vst [vmem:[#allocation21_spill] sm:$0xff] %v3849_v39  ;;  %6018 = vst [vmem:[#allocation22_spill] sm:$0xff] %v3851_v40  ;;  %v3864_v50 = vsub.f32 %v116_v21, %v1551_v34  ;;  %v3866_v52 = vsub.f32 %v178_v26, %v257_v35  ;;  %2903 = vmatprep.subr.bf16.mxu1 %v3855_v45  ;;  %v1553_v54 = vand.u32 4294901760, %v115_v37  ;;  %v263_v55 = vand.u32 4294901760, %v183_v42  ;;  %v117_v0 = vld [vmem:[#allocation2 + $0x40] sm:$0xff]  ;;  %v119_v1 = vld [vmem:[#allocation2 + $0x50] sm:$0xff] }
  0x32   :  { %6019 = vst [vmem:[#allocation23_spill] sm:$0xff] %v3853_v41  ;;  %6020 = vst [vmem:[#allocation24_spill] sm:$0xff] %v3855_v45  ;;  %3287 = vmatprep.subr.bf16.mxu0 %v3859_v47  ;;  %v267_v56 = vand.u32 4294901760, %v185_v43  ;;  %v1555_v57 = vand.u32 4294901760, %v118_v44  ;;  %v3870_v60 = vpack.c.bf16 %v261_v51, %v257_v35  ;;  %v3872_v61 = vsub.f32 %v180_v31, %v261_v51  ;;  %v187_v2 = vld [vmem:[#allocation2 + $0x268] sm:$0xff]  ;;  %v189_v7 = vld [vmem:[#allocation2 + $0x278] sm:$0xff] }
  0x33   :  { %6021 = vst [vmem:[#allocation25_spill] sm:$0xff] %v3857_v46  ;;  %6022 = vst [vmem:[#allocation26_spill] sm:$0xff] %v3859_v47  ;;  %v3874_v62 = vsub.f32 %v113_v36, %v1549_v53  ;;  %v1559_v63 = vand.u32 4294901760, %v120_v49  ;;  %v3876_v3 = vpack.c.bf16 %v1553_v54, %v1549_v53  ;;  %v3878_v4 = vsub.f32 %v115_v37, %v1553_v54  ;;  %v122_v8 = vld [vmem:[#allocation2 + $0x68] sm:$0xff]  ;;  %v124_v9 = vld [vmem:[#allocation2 + $0x78] sm:$0xff] }
  0x34   :  { %6023 = vst [vmem:[#allocation27_spill] sm:$0xff] %v3861_v48  ;;  %6024 = vst [vmem:[#allocation28_spill] sm:$0xff] %v3864_v50  ;;  %v3880_v5 = vpack.c.bf16 %v267_v56, %v263_v55  ;;  %v3882_v6 = vsub.f32 %v183_v42, %v263_v55  ;;  %2905 = vmatpush1.bf16.msra.mxu1 %v3870_v60  ;;  %v3885_v10 = vsub.f32 %v185_v43, %v267_v56  ;;  %v186_v31 = vld [vmem:[#allocation2 + $0x260] sm:$0xff]  ;;  %v188_v36 = vld [vmem:[#allocation2 + $0x270] sm:$0xff] }
  0x35   :  { %6025 = vst [vmem:[#allocation29_spill] sm:$0xff] %v3866_v52  ;;  %6026 = vst [vmem:[#allocation30_spill] sm:$0xff] %v3870_v60  ;;  %v3887_v11 = vpack.c.bf16 %v1559_v63, %v1555_v57  ;;  %v3889_v12 = vsub.f32 %v118_v44, %v1555_v57  ;;  %v3891_v13 = vsub.f32 %v120_v49, %v1559_v63  ;;  %3289 = vmatpush1.bf16.msra.mxu0 %v3876_v3  ;;  %v121_v37 = vld [vmem:[#allocation2 + $0x60] sm:$0xff]  ;;  %v123_v42 = vld [vmem:[#allocation2 + $0x70] sm:$0xff] }
  0x36   :  { %6027 = vst [vmem:[#allocation31_spill] sm:$0xff] %v3872_v61  ;;  %6028 = vst [vmem:[#allocation32_spill] sm:$0xff] %v3874_v62  ;;  %2907 = vmatprep.subr.bf16.mxu1 %v3880_v5  ;;  %v265_v14 = vand.u32 4294901760, %v182_v58  ;;  %v269_v19 = vand.u32 4294901760, %v184_v59  ;;  %v1557_v20 = vand.u32 4294901760, %v117_v0  ;;  %v1561_v21 = vand.u32 4294901760, %v119_v1 }
  0x37   :  { %6029 = vst [vmem:[#allocation33_spill] sm:$0xff] %v3876_v3  ;;  %6030 = vst [vmem:[#allocation34_spill] sm:$0xff] %v3878_v4  ;;  %3291 = vmatprep.subr.bf16.mxu0 %v3887_v11  ;;  %v271_v26 = vand.u32 4294901760, %v187_v2  ;;  %v275_v28 = vand.u32 4294901760, %v189_v7  ;;  %v1563_v29 = vand.u32 4294901760, %v122_v8  ;;  %v1567_v30 = vand.u32 4294901760, %v124_v9 }
  0x38   :  { %6031 = vst [vmem:[#allocation35_spill] sm:$0xff] %v3880_v5  ;;  %6032 = vst [vmem:[#allocation36_spill] sm:$0xff] %v3882_v6  ;;  %v3896_v32 = vpack.c.bf16 %v269_v19, %v265_v14  ;;  %v3898_v33 = vsub.f32 %v182_v58, %v265_v14  ;;  %v3900_v34 = vsub.f32 %v184_v59, %v269_v19  ;;  %v191_v53 = vld [vmem:[#allocation2 + $0x288] sm:$0xff]  ;;  %v193_v54 = vld [vmem:[#allocation2 + $0x298] sm:$0xff]  ;;  %v273_v59 = vand.u32 4294901760, %v186_v31 }
  0x39   :  { %6033 = vst [vmem:[#allocation37_spill] sm:$0xff] %v3885_v10  ;;  %6034 = vst [vmem:[#allocation38_spill] sm:$0xff] %v3887_v11  ;;  %v3902_v35 = vpack.c.bf16 %v1561_v21, %v1557_v20  ;;  %v3904_v43 = vsub.f32 %v117_v0, %v1557_v20  ;;  %v3906_v44 = vsub.f32 %v119_v1, %v1561_v21  ;;  %v126_v55 = vld [vmem:[#allocation2 + $0x88] sm:$0xff]  ;;  %v277_v0 = vand.u32 4294901760, %v188_v36  ;;  %v128_v14 = vld [vmem:[#allocation2 + $0x98] sm:$0xff] }
  0x3a   :  { %6035 = vst [vmem:[#allocation39_spill] sm:$0xff] %v3889_v12  ;;  %6036 = vst [vmem:[#allocation40_spill] sm:$0xff] %v3891_v13  ;;  %v3908_v49 = vpack.c.bf16 %v275_v28, %v271_v26  ;;  %v3910_v51 = vsub.f32 %v187_v2, %v271_v26  ;;  %2909 = vmatpush1.bf16.msra.mxu1 %v3896_v32  ;;  %v3914_v56 = vsub.f32 %v189_v7, %v275_v28  ;;  %v190_v26 = vld [vmem:[#allocation2 + $0x280] sm:$0xff]  ;;  %v192_v28 = vld [vmem:[#allocation2 + $0x290] sm:$0xff] }
  0x3b   :  { %6037 = vst [vmem:[#allocation41_spill] sm:$0xff] %v3896_v32  ;;  %6038 = vst [vmem:[#allocation42_spill] sm:$0xff] %v3898_v33  ;;  %3293 = vmatpush1.bf16.msra.mxu0 %v3902_v35  ;;  %v3916_v57 = vpack.c.bf16 %v1567_v30, %v1563_v29  ;;  %v3918_v58 = vsub.f32 %v122_v8, %v1563_v29  ;;  %v3921_v63 = vsub.f32 %v124_v9, %v1567_v30  ;;  %v125_v8 = vld [vmem:[#allocation2 + $0x80] sm:$0xff]  ;;  %v195_v32 = vld [vmem:[#allocation2 + $0x2a8] sm:$0xff] }
  0x3c   :  { %6039 = vst [vmem:[#allocation43_spill] sm:$0xff] %v3900_v34  ;;  %6040 = vst [vmem:[#allocation44_spill] sm:$0xff] %v3902_v35  ;;  %2911 = vmatprep.subr.bf16.mxu1 %v3908_v49  ;;  %v1565_v1 = vand.u32 4294901760, %v121_v37  ;;  %v1569_v2 = vand.u32 4294901760, %v123_v42  ;;  %v3924_v19 = vsub.f32 %v186_v31, %v273_v59  ;;  %v279_v20 = vand.u32 4294901760, %v191_v53  ;;  %v197_v11 = vld [vmem:[#allocation2 + $0x2b8] sm:$0xff] }
  0x3d   :  { %6041 = vst [vmem:[#allocation45_spill] sm:$0xff] %v3904_v43  ;;  %6042 = vst [vmem:[#allocation46_spill] sm:$0xff] %v3906_v44  ;;  %3295 = vmatprep.subr.bf16.mxu0 %v3916_v57  ;;  %v283_v7 = vand.u32 4294901760, %v193_v54  ;;  %v1571_v21 = vand.u32 4294901760, %v126_v55  ;;  %v3926_v29 = vpack.c.bf16 %v277_v0, %v273_v59  ;;  %v3928_v35 = vsub.f32 %v188_v36, %v277_v0  ;;  %v130_v47 = vld [vmem:[#allocation2 + $0xa8] sm:$0xff]  ;;  %v129_v38 = vld [vmem:[#allocation2 + $0xa0] sm:$0xff] }
  0x3e   :  { %6043 = vst [vmem:[#allocation47_spill] sm:$0xff] %v3908_v49  ;;  %6044 = vst [vmem:[#allocation48_spill] sm:$0xff] %v3910_v51  ;;  %v3930_v9 = vpack.c.bf16 %v1569_v2, %v1565_v1  ;;  %v3932_v30 = vsub.f32 %v121_v37, %v1565_v1  ;;  %v127_v49 = vld [vmem:[#allocation2 + $0x90] sm:$0xff]  ;;  %v3938_v3 = vsub.f32 %v191_v53, %v279_v20  ;;  %v1575_v36 = vand.u32 4294901760, %v128_v14  ;;  %v132_v53 = vld [vmem:[#allocation2 + $0xb8] sm:$0xff] }
  0x3f   :  { %6045 = vst [vmem:[#allocation49_spill] sm:$0xff] %v3914_v56  ;;  %6046 = vst [vmem:[#allocation50_spill] sm:$0xff] %v3916_v57  ;;  %v3934_v57 = vsub.f32 %v123_v42, %v1569_v2  ;;  %v3936_v31 = vpack.c.bf16 %v283_v7, %v279_v20  ;;  %v3940_v5 = vsub.f32 %v193_v54, %v283_v7  ;;  %2913 = vmatpush1.bf16.msra.mxu1 %v3926_v29  ;;  %v131_v15 = vld [vmem:[#allocation2 + $0xb0] sm:$0xff] }
  0x40   :  { %6047 = vst [vmem:[#allocation51_spill] sm:$0xff] %v3918_v58  ;;  %6048 = vst [vmem:[#allocation52_spill] sm:$0xff] %v3921_v63  ;;  %3297 = vmatpush1.bf16.msra.mxu0 %v3930_v9  ;;  %v3944_v59 = vsub.f32 %v126_v55, %v1571_v21  ;;  %v281_v37 = vand.u32 4294901760, %v190_v26  ;;  %v285_v0 = vand.u32 4294901760, %v192_v28  ;;  %v1573_v1 = vand.u32 4294901760, %v125_v8  ;;  %v194_v55 = vld [vmem:[#allocation2 + $0x2a0] sm:$0xff] }
  0x41   :  { %6049 = vst [vmem:[#allocation53_spill] sm:$0xff] %v3924_v19  ;;  %6050 = vst [vmem:[#allocation54_spill] sm:$0xff] %v3926_v29  ;;  %2915 = vmatprep.subr.bf16.mxu1 %v3936_v31  ;;  %v1577_v42 = vand.u32 4294901760, %v127_v49  ;;  %v287_v2 = vand.u32 4294901760, %v195_v32  ;;  %v291_v60 = vand.u32 4294901760, %v197_v11  ;;  %v3947_v20 = vpack.c.bf16 %v1575_v36, %v1571_v21  ;;  %v196_v29 = vld [vmem:[#allocation2 + $0x2b0] sm:$0xff] }
  0x42   :  { %6051 = vst [vmem:[#allocation55_spill] sm:$0xff] %v3928_v35  ;;  %6052 = vst [vmem:[#allocation56_spill] sm:$0xff] %v3930_v9  ;;  %v3949_v54 = vsub.f32 %v128_v14, %v1575_v36  ;;  %v3951_v7 = vpack.c.bf16 %v285_v0, %v281_v37  ;;  %v3953_v9 = vsub.f32 %v190_v26, %v281_v37  ;;  %v199_v21 = vld [vmem:[#allocation2 + $0x2c8] sm:$0xff]  ;;  %v289_v37 = vand.u32 4294901760, %v194_v55 }
  0x43   :  { %6053 = vst [vmem:[#allocation57_spill] sm:$0xff] %v3932_v30  ;;  %6054 = vst [vmem:[#allocation58_spill] sm:$0xff] %v3934_v57  ;;  %v3955_v45 = vsub.f32 %v192_v28, %v285_v0  ;;  %v3959_v24 = vsub.f32 %v125_v8, %v1573_v1  ;;  %v3961_v22 = vsub.f32 %v127_v49, %v1577_v42  ;;  %3299 = vmatprep.subr.bf16.mxu0 %v3947_v20 }
  0x44   :  { %6055 = vst [vmem:[#allocation59_spill] sm:$0xff] %v3936_v31  ;;  %6056 = vst [vmem:[#allocation60_spill] sm:$0xff] %v3938_v3  ;;  %v3957_v31 = vpack.c.bf16 %v1577_v42, %v1573_v1  ;;  %2917 = vmatpush1.bf16.msra.mxu1 %v3951_v7  ;;  %v3965_v14 = vpack.c.bf16 %v291_v60, %v287_v2  ;;  %v3967_v26 = vsub.f32 %v195_v32, %v287_v2 }
  0x45   :  { %6057 = vst [vmem:[#allocation61_spill] sm:$0xff] %v3940_v5  ;;  %6058 = vst [vmem:[#allocation62_spill] sm:$0xff] %v3944_v59  ;;  %v201_v59 = vld [vmem:[#allocation2 + $0x2d8] sm:$0xff]  ;;  %v3969_v36 = vsub.f32 %v197_v11, %v291_v60  ;;  %v1579_v28 = vand.u32 4294901760, %v130_v47  ;;  %v1583_v8 = vand.u32 4294901760, %v132_v53  ;;  %v293_v49 = vand.u32 4294901760, %v196_v29 }
  0x46   :  { %6059 = vst [vmem:[#allocation63_spill] sm:$0xff] %v3947_v20  ;;  %6060 = vst [vmem:[#allocation64_spill] sm:$0xff] %v3949_v54  ;;  %3301 = vmatpush1.bf16.msra.mxu0 %v3957_v31  ;;  %v1581_v0 = vand.u32 4294901760, %v129_v38  ;;  %2919 = vmatprep.subr.bf16.mxu1 %v3965_v14  ;;  %v1585_v42 = vand.u32 4294901760, %v131_v15  ;;  %v295_v20 = vand.u32 4294901760, %v199_v21  ;;  %v3981_v2 = vsub.f32 %v194_v55, %v289_v37  ;;  %v205_v54 = vld [vmem:[#allocation2 + $0x2f8] sm:$0xff] }
  0x47   :  { %6061 = vst [vmem:[#allocation65_spill] sm:$0xff] %v3951_v7  ;;  %6062 = vst [vmem:[#allocation66_spill] sm:$0xff] %v3953_v9  ;;  %v3973_v1 = vsub.f32 %v130_v47, %v1579_v28  ;;  %v299_v7 = vand.u32 4294901760, %v201_v59  ;;  %v3975_v32 = vpack.c.bf16 %v1583_v8, %v1579_v28  ;;  %v3977_v60 = vsub.f32 %v132_v53, %v1583_v8  ;;  %v135_v9 = vld [vmem:[#allocation2 + $0xd0] sm:$0xff]  ;;  %v203_v28 = vld [vmem:[#allocation2 + $0x2e8] sm:$0xff] }
  0x48   :  { %6063 = vst [vmem:[#allocation67_spill] sm:$0xff] %v3955_v45  ;;  %6064 = vst [vmem:[#allocation68_spill] sm:$0xff] %v3957_v31  ;;  %v3979_v11 = vpack.c.bf16 %v293_v49, %v289_v37  ;;  %v198_v31 = vld [vmem:[#allocation2 + $0x2c0] sm:$0xff]  ;;  %v3983_v45 = vsub.f32 %v196_v29, %v293_v49  ;;  %v3985_v47 = vpack.c.bf16 %v1585_v42, %v1581_v0 }
  0x49   :  { %6065 = vst [vmem:[#allocation69_spill] sm:$0xff] %v3959_v24  ;;  %6066 = vst [vmem:[#allocation70_spill] sm:$0xff] %v3961_v22  ;;  %v134_v22 = vld [vmem:[#allocation2 + $0xc8] sm:$0xff]  ;;  %v136_v24 = vld [vmem:[#allocation2 + $0xd8] sm:$0xff]  ;;  %3303 = vmatprep.subr.bf16.mxu0 %v3975_v32  ;;  %v3993_v53 = vpack.c.bf16 %v299_v7, %v295_v20  ;;  %v3995_v55 = vsub.f32 %v199_v21, %v295_v20  ;;  %v3997_v8 = vsub.f32 %v201_v59, %v299_v7 }
  0x4a   :  { %6067 = vst [vmem:[#allocation71_spill] sm:$0xff] %v3965_v14  ;;  %6068 = vst [vmem:[#allocation72_spill] sm:$0xff] %v3967_v26  ;;  %v133_v26 = vld [vmem:[#allocation2 + $0xc0] sm:$0xff]  ;;  %v3987_v14 = vsub.f32 %v129_v38, %v1581_v0  ;;  %2921 = vmatpush1.bf16.msra.mxu1 %v3979_v11  ;;  %v1587_v29 = vand.u32 4294901760, %v134_v22  ;;  %3305 = vmatpush1.bf16.msra.mxu0 %v3985_v47  ;;  %v1591_v38 = vand.u32 4294901760, %v136_v24  ;;  %v297_v37 = vand.u32 4294901760, %v198_v31 }
  0x4b   :  { %6069 = vst [vmem:[#allocation73_spill] sm:$0xff] %v3969_v36  ;;  %6070 = vst [vmem:[#allocation74_spill] sm:$0xff] %v3973_v1  ;;  %v200_v36 = vld [vmem:[#allocation2 + $0x2d0] sm:$0xff]  ;;  %v3989_v1 = vsub.f32 %v131_v15, %v1585_v42  ;;  %v1589_v49 = vand.u32 4294901760, %v133_v26  ;;  %2923 = vmatprep.subr.bf16.mxu1 %v3993_v53  ;;  %v1593_v42 = vand.u32 4294901760, %v135_v9 }
  0x4c   :  { %6071 = vst [vmem:[#allocation75_spill] sm:$0xff] %v3975_v32  ;;  %6072 = vst [vmem:[#allocation76_spill] sm:$0xff] %v3977_v60  ;;  %v301_v15 = vand.u32 4294901760, %v200_v36  ;;  %v4001_v0 = vsub.f32 %v134_v22, %v1587_v29  ;;  %v303_v32 = vand.u32 4294901760, %v203_v28  ;;  %v4003_v20 = vpack.c.bf16 %v1591_v38, %v1587_v29  ;;  %v207_v29 = vld [vmem:[#allocation2 + $0x308] sm:$0xff]  ;;  %v209_v60 = vld [vmem:[#allocation2 + $0x318] sm:$0xff] }
  0x4d   :  { %6073 = vst [vmem:[#allocation77_spill] sm:$0xff] %v3979_v11  ;;  %6074 = vst [vmem:[#allocation78_spill] sm:$0xff] %v3981_v2  ;;  %v307_v11 = vand.u32 4294901760, %v205_v54  ;;  %v4005_v59 = vsub.f32 %v136_v24, %v1591_v38  ;;  %v4009_v21 = vsub.f32 %v198_v31, %v297_v37  ;;  %v4013_v22 = vpack.c.bf16 %v1593_v42, %v1589_v49  ;;  %v139_v2 = vld [vmem:[#allocation2 + $0xf0] sm:$0xff] }
  0x4e   :  { %6075 = vst [vmem:[#allocation79_spill] sm:$0xff] %v3983_v45  ;;  %6076 = vst [vmem:[#allocation80_spill] sm:$0xff] %v3985_v47  ;;  %v4007_v7 = vpack.c.bf16 %v301_v15, %v297_v37  ;;  %v202_v47 = vld [vmem:[#allocation2 + $0x2e0] sm:$0xff]  ;;  %v4011_v45 = vsub.f32 %v200_v36, %v301_v15  ;;  %3307 = vmatprep.subr.bf16.mxu0 %v4003_v20  ;;  %v4023_v31 = vsub.f32 %v203_v28, %v303_v32 }
  0x4f   :  { %6077 = vst [vmem:[#allocation81_spill] sm:$0xff] %v3987_v14  ;;  %6078 = vst [vmem:[#allocation82_spill] sm:$0xff] %v3989_v1  ;;  %v138_v1 = vld [vmem:[#allocation2 + $0xe8] sm:$0xff]  ;;  %v140_v14 = vld [vmem:[#allocation2 + $0xf8] sm:$0xff]  ;;  %v4021_v24 = vpack.c.bf16 %v307_v11, %v303_v32  ;;  %v4025_v38 = vsub.f32 %v205_v54, %v307_v11  ;;  %3309 = vmatpush1.bf16.msra.mxu0 %v4013_v22  ;;  %v305_v37 = vand.u32 4294901760, %v202_v47 }
  0x50   :  { %6079 = vst [vmem:[#allocation83_spill] sm:$0xff] %v3993_v53  ;;  %6080 = vst [vmem:[#allocation84_spill] sm:$0xff] %v3995_v55  ;;  %v137_v55 = vld [vmem:[#allocation2 + $0xe0] sm:$0xff]  ;;  %v4015_v53 = vsub.f32 %v133_v26, %v1589_v49  ;;  %2925 = vmatpush1.bf16.msra.mxu1 %v4007_v7  ;;  %v1595_v36 = vand.u32 4294901760, %v138_v1  ;;  %v1599_v26 = vand.u32 4294901760, %v140_v14 }
  0x51   :  { %6081 = vst [vmem:[#allocation85_spill] sm:$0xff] %v3997_v8  ;;  %6082 = vst [vmem:[#allocation86_spill] sm:$0xff] %v4001_v0  ;;  %v204_v8 = vld [vmem:[#allocation2 + $0x2f0] sm:$0xff]  ;;  %v4017_v0 = vsub.f32 %v135_v9, %v1593_v42  ;;  %v1597_v15 = vand.u32 4294901760, %v137_v55  ;;  %2927 = vmatprep.subr.bf16.mxu1 %v4021_v24  ;;  %v1601_v42 = vand.u32 4294901760, %v139_v2  ;;  %v4037_v28 = vsub.f32 %v202_v47, %v305_v37 }
  0x52   :  { %6083 = vst [vmem:[#allocation87_spill] sm:$0xff] %v4003_v20  ;;  %6084 = vst [vmem:[#allocation88_spill] sm:$0xff] %v4005_v59  ;;  %v309_v9 = vand.u32 4294901760, %v204_v8  ;;  %v4029_v49 = vsub.f32 %v138_v1, %v1595_v36  ;;  %v311_v20 = vand.u32 4294901760, %v207_v29  ;;  %v4031_v32 = vpack.c.bf16 %v1599_v26, %v1595_v36  ;;  %v211_v36 = vld [vmem:[#allocation2 + $0x328] sm:$0xff]  ;;  %v213_v59 = vld [vmem:[#allocation2 + $0x338] sm:$0xff] }
  0x53   :  { %6085 = vst [vmem:[#allocation89_spill] sm:$0xff] %v4007_v7  ;;  %6086 = vst [vmem:[#allocation90_spill] sm:$0xff] %v4009_v21  ;;  %v315_v7 = vand.u32 4294901760, %v209_v60  ;;  %v4033_v54 = vsub.f32 %v140_v14, %v1599_v26  ;;  %v4041_v1 = vpack.c.bf16 %v1601_v42, %v1597_v15  ;;  %v143_v21 = vld [vmem:[#allocation2 + $0x110] sm:$0xff] }
  0x54   :  { %6087 = vst [vmem:[#allocation91_spill] sm:$0xff] %v4011_v45  ;;  %6088 = vst [vmem:[#allocation92_spill] sm:$0xff] %v4013_v22  ;;  %v4035_v11 = vpack.c.bf16 %v309_v9, %v305_v37  ;;  %v206_v22 = vld [vmem:[#allocation2 + $0x300] sm:$0xff]  ;;  %v4039_v45 = vsub.f32 %v204_v8, %v309_v9  ;;  %3311 = vmatprep.subr.bf16.mxu0 %v4031_v32  ;;  %v4051_v47 = vsub.f32 %v207_v29, %v311_v20 }
  0x55   :  { %6089 = vst [vmem:[#allocation93_spill] sm:$0xff] %v4015_v53  ;;  %6090 = vst [vmem:[#allocation94_spill] sm:$0xff] %v4017_v0  ;;  %v142_v0 = vld [vmem:[#allocation2 + $0x108] sm:$0xff]  ;;  %v144_v53 = vld [vmem:[#allocation2 + $0x118] sm:$0xff]  ;;  %v4049_v14 = vpack.c.bf16 %v315_v7, %v311_v20  ;;  %v4053_v26 = vsub.f32 %v209_v60, %v315_v7  ;;  %3313 = vmatpush1.bf16.msra.mxu0 %v4041_v1  ;;  %v313_v37 = vand.u32 4294901760, %v206_v22 }
  0x56   :  { %6091 = vst [vmem:[#allocation95_spill] sm:$0xff] %v4021_v24  ;;  %6092 = vst [vmem:[#allocation96_spill] sm:$0xff] %v4023_v31  ;;  %v141_v31 = vld [vmem:[#allocation2 + $0x100] sm:$0xff]  ;;  %v4043_v24 = vsub.f32 %v137_v55, %v1597_v15  ;;  %2929 = vmatpush1.bf16.msra.mxu1 %v4035_v11  ;;  %v1603_v8 = vand.u32 4294901760, %v142_v0  ;;  %v1607_v55 = vand.u32 4294901760, %v144_v53 }
  0x57   :  { %6093 = vst [vmem:[#allocation97_spill] sm:$0xff] %v4025_v38  ;;  %6094 = vst [vmem:[#allocation98_spill] sm:$0xff] %v4029_v49  ;;  %v208_v38 = vld [vmem:[#allocation2 + $0x310] sm:$0xff]  ;;  %v4045_v49 = vsub.f32 %v139_v2, %v1601_v42  ;;  %v1605_v9 = vand.u32 4294901760, %v141_v31  ;;  %2931 = vmatprep.subr.bf16.mxu1 %v4049_v14  ;;  %v1609_v42 = vand.u32 4294901760, %v143_v21  ;;  %v4065_v29 = vsub.f32 %v206_v22, %v313_v37 }
  0x58   :  { %6095 = vst [vmem:[#allocation99_spill] sm:$0xff] %v4031_v32  ;;  %6096 = vst [vmem:[#allocation100_spill] sm:$0xff] %v4033_v54  ;;  %v317_v2 = vand.u32 4294901760, %v208_v38  ;;  %v4057_v15 = vsub.f32 %v142_v0, %v1603_v8  ;;  %v319_v32 = vand.u32 4294901760, %v211_v36  ;;  %v4059_v20 = vpack.c.bf16 %v1607_v55, %v1603_v8  ;;  %v215_v8 = vld [vmem:[#allocation2 + $0x348] sm:$0xff]  ;;  %v217_v54 = vld [vmem:[#allocation2 + $0x358] sm:$0xff] }
  0x59   :  { %6097 = vst [vmem:[#allocation101_spill] sm:$0xff] %v4035_v11  ;;  %6098 = vst [vmem:[#allocation102_spill] sm:$0xff] %v4037_v28  ;;  %v323_v11 = vand.u32 4294901760, %v213_v59  ;;  %v4061_v60 = vsub.f32 %v144_v53, %v1607_v55  ;;  %v4069_v0 = vpack.c.bf16 %v1609_v42, %v1605_v9  ;;  %v147_v28 = vld [vmem:[#allocation2 + $0x130] sm:$0xff] }
  0x5a   :  { %6099 = vst [vmem:[#allocation103_spill] sm:$0xff] %v4039_v45  ;;  %6100 = vst [vmem:[#allocation104_spill] sm:$0xff] %v4041_v1  ;;  %v4063_v7 = vpack.c.bf16 %v317_v2, %v313_v37  ;;  %v210_v1 = vld [vmem:[#allocation2 + $0x320] sm:$0xff]  ;;  %v4067_v45 = vsub.f32 %v208_v38, %v317_v2  ;;  %3315 = vmatprep.subr.bf16.mxu0 %v4059_v20  ;;  %v4079_v22 = vsub.f32 %v211_v36, %v319_v32 }
  0x5b   :  { %6101 = vst [vmem:[#allocation105_spill] sm:$0xff] %v4043_v24  ;;  %6102 = vst [vmem:[#allocation106_spill] sm:$0xff] %v4045_v49  ;;  %v146_v49 = vld [vmem:[#allocation2 + $0x128] sm:$0xff]  ;;  %v148_v24 = vld [vmem:[#allocation2 + $0x138] sm:$0xff]  ;;  %v4077_v53 = vpack.c.bf16 %v323_v11, %v319_v32  ;;  %v4081_v55 = vsub.f32 %v213_v59, %v323_v11  ;;  %3317 = vmatpush1.bf16.msra.mxu0 %v4069_v0  ;;  %v321_v37 = vand.u32 4294901760, %v210_v1 }
  0x5c   :  { %6103 = vst [vmem:[#allocation107_spill] sm:$0xff] %v4049_v14  ;;  %6104 = vst [vmem:[#allocation108_spill] sm:$0xff] %v4051_v47  ;;  %v145_v47 = vld [vmem:[#allocation2 + $0x120] sm:$0xff]  ;;  %v4071_v14 = vsub.f32 %v141_v31, %v1605_v9  ;;  %2933 = vmatpush1.bf16.msra.mxu1 %v4063_v7  ;;  %v1611_v38 = vand.u32 4294901760, %v146_v49  ;;  %v1615_v31 = vand.u32 4294901760, %v148_v24 }
  0x5d   :  { %6105 = vst [vmem:[#allocation109_spill] sm:$0xff] %v4053_v26  ;;  %6106 = vst [vmem:[#allocation110_spill] sm:$0xff] %v4057_v15  ;;  %v212_v26 = vld [vmem:[#allocation2 + $0x330] sm:$0xff]  ;;  %v4073_v15 = vsub.f32 %v143_v21, %v1609_v42  ;;  %v1613_v2 = vand.u32 4294901760, %v145_v47  ;;  %2935 = vmatprep.subr.bf16.mxu1 %v4077_v53  ;;  %v1617_v42 = vand.u32 4294901760, %v147_v28  ;;  %v4093_v36 = vsub.f32 %v210_v1, %v321_v37 }
  0x5e   :  { %6107 = vst [vmem:[#allocation111_spill] sm:$0xff] %v4059_v20  ;;  %6108 = vst [vmem:[#allocation112_spill] sm:$0xff] %v4061_v60  ;;  %v325_v21 = vand.u32 4294901760, %v212_v26  ;;  %v4085_v9 = vsub.f32 %v146_v49, %v1611_v38  ;;  %v327_v20 = vand.u32 4294901760, %v215_v8  ;;  %v4087_v32 = vpack.c.bf16 %v1615_v31, %v1611_v38  ;;  %v219_v38 = vld [vmem:[#allocation2 + $0x368] sm:$0xff]  ;;  %v221_v60 = vld [vmem:[#allocation2 + $0x378] sm:$0xff] }
  0x5f   :  { %6109 = vst [vmem:[#allocation113_spill] sm:$0xff] %v4063_v7  ;;  %6110 = vst [vmem:[#allocation114_spill] sm:$0xff] %v4065_v29  ;;  %v331_v7 = vand.u32 4294901760, %v217_v54  ;;  %v4089_v59 = vsub.f32 %v148_v24, %v1615_v31  ;;  %v4097_v49 = vpack.c.bf16 %v1617_v42, %v1613_v2  ;;  %v151_v29 = vld [vmem:[#allocation2 + $0x150] sm:$0xff] }
  0x60   :  { %6111 = vst [vmem:[#allocation115_spill] sm:$0xff] %v4067_v45  ;;  %6112 = vst [vmem:[#allocation116_spill] sm:$0xff] %v4069_v0  ;;  %v4091_v11 = vpack.c.bf16 %v325_v21, %v321_v37  ;;  %v214_v0 = vld [vmem:[#allocation2 + $0x340] sm:$0xff]  ;;  %v4095_v45 = vsub.f32 %v212_v26, %v325_v21  ;;  %3319 = vmatprep.subr.bf16.mxu0 %v4087_v32  ;;  %v4107_v1 = vsub.f32 %v215_v8, %v327_v20 }
  0x61   :  { %6113 = vst [vmem:[#allocation117_spill] sm:$0xff] %v4071_v14  ;;  %6114 = vst [vmem:[#allocation118_spill] sm:$0xff] %v4073_v15  ;;  %v150_v15 = vld [vmem:[#allocation2 + $0x148] sm:$0xff]  ;;  %v152_v14 = vld [vmem:[#allocation2 + $0x158] sm:$0xff]  ;;  %v4105_v24 = vpack.c.bf16 %v331_v7, %v327_v20  ;;  %v4109_v31 = vsub.f32 %v217_v54, %v331_v7  ;;  %3321 = vmatpush1.bf16.msra.mxu0 %v4097_v49  ;;  %v329_v37 = vand.u32 4294901760, %v214_v0 }
  0x62   :  { %6115 = vst [vmem:[#allocation119_spill] sm:$0xff] %v4077_v53  ;;  %6116 = vst [vmem:[#allocation120_spill] sm:$0xff] %v4079_v22  ;;  %v149_v22 = vld [vmem:[#allocation2 + $0x140] sm:$0xff]  ;;  %v4099_v53 = vsub.f32 %v145_v47, %v1613_v2  ;;  %2937 = vmatpush1.bf16.msra.mxu1 %v4091_v11  ;;  %v1619_v26 = vand.u32 4294901760, %v150_v15  ;;  %v1623_v47 = vand.u32 4294901760, %v152_v14 }
  0x63   :  { %6117 = vst [vmem:[#allocation121_spill] sm:$0xff] %v4081_v55  ;;  %6118 = vst [vmem:[#allocation122_spill] sm:$0xff] %v4085_v9  ;;  %v216_v55 = vld [vmem:[#allocation2 + $0x350] sm:$0xff]  ;;  %v4101_v9 = vsub.f32 %v147_v28, %v1617_v42  ;;  %v1621_v21 = vand.u32 4294901760, %v149_v22  ;;  %2939 = vmatprep.subr.bf16.mxu1 %v4105_v24  ;;  %v1625_v42 = vand.u32 4294901760, %v151_v29  ;;  %v4121_v8 = vsub.f32 %v214_v0, %v329_v37 }
  0x64   :  { %6119 = vst [vmem:[#allocation123_spill] sm:$0xff] %v4087_v32  ;;  %6120 = vst [vmem:[#allocation124_spill] sm:$0xff] %v4089_v59  ;;  %v333_v28 = vand.u32 4294901760, %v216_v55  ;;  %v4113_v2 = vsub.f32 %v150_v15, %v1619_v26  ;;  %v335_v32 = vand.u32 4294901760, %v219_v38  ;;  %v4115_v20 = vpack.c.bf16 %v1623_v47, %v1619_v26  ;;  %v223_v26 = vld [vmem:[#allocation2 + $0x388] sm:$0xff]  ;;  %v225_v59 = vld [vmem:[#allocation2 + $0x398] sm:$0xff] }
  0x65   :  { %6121 = vst [vmem:[#allocation125_spill] sm:$0xff] %v4091_v11  ;;  %6122 = vst [vmem:[#allocation126_spill] sm:$0xff] %v4093_v36  ;;  %v339_v11 = vand.u32 4294901760, %v221_v60  ;;  %v4117_v54 = vsub.f32 %v152_v14, %v1623_v47  ;;  %v4125_v15 = vpack.c.bf16 %v1625_v42, %v1621_v21  ;;  %v155_v36 = vld [vmem:[#allocation2 + $0x170] sm:$0xff] }
  0x66   :  { %6123 = vst [vmem:[#allocation127_spill] sm:$0xff] %v4095_v45  ;;  %6124 = vst [vmem:[#allocation128_spill] sm:$0xff] %v4097_v49  ;;  %v4119_v7 = vpack.c.bf16 %v333_v28, %v329_v37  ;;  %v218_v49 = vld [vmem:[#allocation2 + $0x360] sm:$0xff]  ;;  %v4123_v45 = vsub.f32 %v216_v55, %v333_v28  ;;  %3323 = vmatprep.subr.bf16.mxu0 %v4115_v20  ;;  %v4135_v0 = vsub.f32 %v219_v38, %v335_v32 }
  0x67   :  { %6125 = vst [vmem:[#allocation129_spill] sm:$0xff] %v4099_v53  ;;  %6126 = vst [vmem:[#allocation130_spill] sm:$0xff] %v4101_v9  ;;  %v154_v9 = vld [vmem:[#allocation2 + $0x168] sm:$0xff]  ;;  %v156_v53 = vld [vmem:[#allocation2 + $0x178] sm:$0xff]  ;;  %v4133_v14 = vpack.c.bf16 %v339_v11, %v335_v32  ;;  %v4137_v47 = vsub.f32 %v221_v60, %v339_v11  ;;  %3325 = vmatpush1.bf16.msra.mxu0 %v4125_v15  ;;  %v337_v37 = vand.u32 4294901760, %v218_v49 }
  0x68   :  { %6127 = vst [vmem:[#allocation131_spill] sm:$0xff] %v4105_v24  ;;  %6128 = vst [vmem:[#allocation132_spill] sm:$0xff] %v4107_v1  ;;  %v153_v1 = vld [vmem:[#allocation2 + $0x160] sm:$0xff]  ;;  %v4127_v24 = vsub.f32 %v149_v22, %v1621_v21  ;;  %2941 = vmatpush1.bf16.msra.mxu1 %v4119_v7  ;;  %v1627_v55 = vand.u32 4294901760, %v154_v9  ;;  %v1631_v22 = vand.u32 4294901760, %v156_v53 }
  0x69   :  { %6129 = vst [vmem:[#allocation133_spill] sm:$0xff] %v4109_v31  ;;  %6130 = vst [vmem:[#allocation134_spill] sm:$0xff] %v4113_v2  ;;  %v220_v31 = vld [vmem:[#allocation2 + $0x370] sm:$0xff]  ;;  %v4129_v2 = vsub.f32 %v151_v29, %v1625_v42  ;;  %v1629_v28 = vand.u32 4294901760, %v153_v1  ;;  %2943 = vmatprep.subr.bf16.mxu1 %v4133_v14  ;;  %v1633_v42 = vand.u32 4294901760, %v155_v36  ;;  %v4149_v38 = vsub.f32 %v218_v49, %v337_v37 }
  0x6a   :  { %6131 = vst [vmem:[#allocation135_spill] sm:$0xff] %v4115_v20  ;;  %6132 = vst [vmem:[#allocation136_spill] sm:$0xff] %v4117_v54  ;;  %v341_v29 = vand.u32 4294901760, %v220_v31  ;;  %v4141_v21 = vsub.f32 %v154_v9, %v1627_v55  ;;  %v343_v20 = vand.u32 4294901760, %v223_v26  ;;  %v4143_v32 = vpack.c.bf16 %v1631_v22, %v1627_v55  ;;  %v227_v55 = vld [vmem:[#allocation2 + $0x3a8] sm:$0xff]  ;;  %v229_v54 = vld [vmem:[#allocation2 + $0x3b8] sm:$0xff] }
  0x6b   :  { %6133 = vst [vmem:[#allocation137_spill] sm:$0xff] %v4119_v7  ;;  %6134 = vst [vmem:[#allocation138_spill] sm:$0xff] %v4121_v8  ;;  %v347_v7 = vand.u32 4294901760, %v225_v59  ;;  %v4145_v60 = vsub.f32 %v156_v53, %v1631_v22  ;;  %v4153_v9 = vpack.c.bf16 %v1633_v42, %v1629_v28  ;;  %v159_v8 = vld [vmem:[#allocation2 + $0x190] sm:$0xff] }
  0x6c   :  { %6135 = vst [vmem:[#allocation139_spill] sm:$0xff] %v4123_v45  ;;  %6136 = vst [vmem:[#allocation140_spill] sm:$0xff] %v4125_v15  ;;  %v4147_v11 = vpack.c.bf16 %v341_v29, %v337_v37  ;;  %v222_v15 = vld [vmem:[#allocation2 + $0x380] sm:$0xff]  ;;  %v4151_v45 = vsub.f32 %v220_v31, %v341_v29  ;;  %3327 = vmatprep.subr.bf16.mxu0 %v4143_v32  ;;  %v4163_v49 = vsub.f32 %v223_v26, %v343_v20 }
  0x6d   :  { %6137 = vst [vmem:[#allocation141_spill] sm:$0xff] %v4127_v24  ;;  %6138 = vst [vmem:[#allocation142_spill] sm:$0xff] %v4129_v2  ;;  %v158_v2 = vld [vmem:[#allocation2 + $0x188] sm:$0xff]  ;;  %v160_v24 = vld [vmem:[#allocation2 + $0x198] sm:$0xff]  ;;  %v4161_v53 = vpack.c.bf16 %v347_v7, %v343_v20  ;;  %v4165_v22 = vsub.f32 %v225_v59, %v347_v7  ;;  %3329 = vmatpush1.bf16.msra.mxu0 %v4153_v9  ;;  %v345_v37 = vand.u32 4294901760, %v222_v15 }
  0x6e   :  { %6139 = vst [vmem:[#allocation143_spill] sm:$0xff] %v4133_v14  ;;  %6140 = vst [vmem:[#allocation144_spill] sm:$0xff] %v4135_v0  ;;  %v157_v0 = vld [vmem:[#allocation2 + $0x180] sm:$0xff]  ;;  %v4155_v14 = vsub.f32 %v153_v1, %v1629_v28  ;;  %2945 = vmatpush1.bf16.msra.mxu1 %v4147_v11  ;;  %v1635_v31 = vand.u32 4294901760, %v158_v2  ;;  %v1639_v1 = vand.u32 4294901760, %v160_v24 }
  0x6f   :  { %6141 = vst [vmem:[#allocation145_spill] sm:$0xff] %v4137_v47  ;;  %6142 = vst [vmem:[#allocation146_spill] sm:$0xff] %v4141_v21  ;;  %v224_v47 = vld [vmem:[#allocation2 + $0x390] sm:$0xff]  ;;  %v4157_v21 = vsub.f32 %v155_v36, %v1633_v42  ;;  %v1637_v29 = vand.u32 4294901760, %v157_v0  ;;  %2947 = vmatprep.subr.bf16.mxu1 %v4161_v53  ;;  %v1641_v42 = vand.u32 4294901760, %v159_v8  ;;  %v4177_v26 = vsub.f32 %v222_v15, %v345_v37 }
  0x70   :  { %6143 = vst [vmem:[#allocation147_spill] sm:$0xff] %v4143_v32  ;;  %6144 = vst [vmem:[#allocation148_spill] sm:$0xff] %v4145_v60  ;;  %v349_v36 = vand.u32 4294901760, %v224_v47  ;;  %v4169_v28 = vsub.f32 %v158_v2, %v1635_v31  ;;  %v351_v32 = vand.u32 4294901760, %v227_v55  ;;  %v4171_v20 = vpack.c.bf16 %v1639_v1, %v1635_v31  ;;  %v231_v31 = vld [vmem:[#allocation2 + $0x3c8] sm:$0xff]  ;;  %v233_v60 = vld [vmem:[#allocation2 + $0x3d8] sm:$0xff] }
  0x71   :  { %6145 = vst [vmem:[#allocation149_spill] sm:$0xff] %v4147_v11  ;;  %6146 = vst [vmem:[#allocation150_spill] sm:$0xff] %v4149_v38  ;;  %v355_v11 = vand.u32 4294901760, %v229_v54  ;;  %v4173_v59 = vsub.f32 %v160_v24, %v1639_v1  ;;  %v4181_v2 = vpack.c.bf16 %v1641_v42, %v1637_v29  ;;  %v163_v38 = vld [vmem:[#allocation2 + $0x1b0] sm:$0xff] }
  0x72   :  { %6147 = vst [vmem:[#allocation151_spill] sm:$0xff] %v4151_v45  ;;  %6148 = vst [vmem:[#allocation152_spill] sm:$0xff] %v4153_v9  ;;  %v4175_v7 = vpack.c.bf16 %v349_v36, %v345_v37  ;;  %v226_v9 = vld [vmem:[#allocation2 + $0x3a0] sm:$0xff]  ;;  %v4179_v45 = vsub.f32 %v224_v47, %v349_v36  ;;  %3331 = vmatprep.subr.bf16.mxu0 %v4171_v20  ;;  %v4191_v15 = vsub.f32 %v227_v55, %v351_v32 }
  0x73   :  { %6149 = vst [vmem:[#allocation153_spill] sm:$0xff] %v4155_v14  ;;  %6150 = vst [vmem:[#allocation154_spill] sm:$0xff] %v4157_v21  ;;  %v162_v21 = vld [vmem:[#allocation2 + $0x1a8] sm:$0xff]  ;;  %v164_v14 = vld [vmem:[#allocation2 + $0x1b8] sm:$0xff]  ;;  %v4189_v24 = vpack.c.bf16 %v355_v11, %v351_v32  ;;  %v4193_v1 = vsub.f32 %v229_v54, %v355_v11  ;;  %3333 = vmatpush1.bf16.msra.mxu0 %v4181_v2  ;;  %v353_v37 = vand.u32 4294901760, %v226_v9 }
  0x74   :  { %6151 = vst [vmem:[#allocation155_spill] sm:$0xff] %v4161_v53  ;;  %6152 = vst [vmem:[#allocation156_spill] sm:$0xff] %v4163_v49  ;;  %v161_v49 = vld [vmem:[#allocation2 + $0x1a0] sm:$0xff]  ;;  %v4183_v53 = vsub.f32 %v157_v0, %v1637_v29  ;;  %2949 = vmatpush1.bf16.msra.mxu1 %v4175_v7  ;;  %v1643_v47 = vand.u32 4294901760, %v162_v21  ;;  %v1647_v0 = vand.u32 4294901760, %v164_v14 }
  0x75   :  { %6153 = vst [vmem:[#allocation157_spill] sm:$0xff] %v4165_v22  ;;  %6154 = vst [vmem:[#allocation158_spill] sm:$0xff] %v4169_v28  ;;  %v228_v22 = vld [vmem:[#allocation2 + $0x3b0] sm:$0xff]  ;;  %v4185_v28 = vsub.f32 %v159_v8, %v1641_v42  ;;  %v1645_v36 = vand.u32 4294901760, %v161_v49  ;;  %2951 = vmatprep.subr.bf16.mxu1 %v4189_v24  ;;  %v1649_v42 = vand.u32 4294901760, %v163_v38  ;;  %v4205_v55 = vsub.f32 %v226_v9, %v353_v37 }
  0x76   :  { %6155 = vst [vmem:[#allocation159_spill] sm:$0xff] %v4171_v20  ;;  %6156 = vst [vmem:[#allocation160_spill] sm:$0xff] %v4173_v59  ;;  %v357_v8 = vand.u32 4294901760, %v228_v22  ;;  %v4197_v29 = vsub.f32 %v162_v21, %v1643_v47  ;;  %v359_v20 = vand.u32 4294901760, %v231_v31  ;;  %v4199_v32 = vpack.c.bf16 %v1647_v0, %v1643_v47  ;;  %v235_v47 = vld [vmem:[#allocation2 + $0x3e8] sm:$0xff]  ;;  %v237_v59 = vld [vmem:[#allocation2 + $0x3f8] sm:$0xff] }
  0x77   :  { %6157 = vst [vmem:[#allocation161_spill] sm:$0xff] %v4175_v7  ;;  %6158 = vst [vmem:[#allocation162_spill] sm:$0xff] %v4177_v26  ;;  %v363_v7 = vand.u32 4294901760, %v233_v60  ;;  %v4201_v54 = vsub.f32 %v164_v14, %v1647_v0  ;;  %v4209_v21 = vpack.c.bf16 %v1649_v42, %v1645_v36  ;;  %v167_v26 = vld [vmem:[#allocation2 + $0x1d0] sm:$0xff] }
  0x78   :  { %6159 = vst [vmem:[#allocation163_spill] sm:$0xff] %v4179_v45  ;;  %6160 = vst [vmem:[#allocation164_spill] sm:$0xff] %v4181_v2  ;;  %v4203_v11 = vpack.c.bf16 %v357_v8, %v353_v37  ;;  %v230_v2 = vld [vmem:[#allocation2 + $0x3c0] sm:$0xff]  ;;  %v4207_v45 = vsub.f32 %v228_v22, %v357_v8  ;;  %3335 = vmatprep.subr.bf16.mxu0 %v4199_v32  ;;  %v4219_v9 = vsub.f32 %v231_v31, %v359_v20 }
  0x79   :  { %6161 = vst [vmem:[#allocation165_spill] sm:$0xff] %v4183_v53  ;;  %6162 = vst [vmem:[#allocation166_spill] sm:$0xff] %v4185_v28  ;;  %v166_v28 = vld [vmem:[#allocation2 + $0x1c8] sm:$0xff]  ;;  %v168_v53 = vld [vmem:[#allocation2 + $0x1d8] sm:$0xff]  ;;  %v4217_v14 = vpack.c.bf16 %v363_v7, %v359_v20  ;;  %v4221_v0 = vsub.f32 %v233_v60, %v363_v7  ;;  %3337 = vmatpush1.bf16.msra.mxu0 %v4209_v21 }
  0x7a   :  { %6163 = vst [vmem:[#allocation167_spill] sm:$0xff] %v4189_v24  ;;  %6164 = vst [vmem:[#allocation168_spill] sm:$0xff] %v4191_v15  ;;  %v165_v15 = vld [vmem:[#allocation2 + $0x1c0] sm:$0xff]  ;;  %v4211_v24 = vsub.f32 %v161_v49, %v1645_v36  ;;  %2953 = vmatpush1.bf16.msra.mxu1 %v4203_v11  ;;  %v1651_v22 = vand.u32 4294901760, %v166_v28  ;;  %v1655_v49 = vand.u32 4294901760, %v168_v53  ;;  %v172_v20 = vld [vmem:[#allocation2 + $0x1f8] sm:$0xff] }
  0x7b   :  { %6165 = vst [vmem:[#allocation169_spill] sm:$0xff] %v4193_v1  ;;  %6166 = vst [vmem:[#allocation170_spill] sm:$0xff] %v4197_v29  ;;  %v232_v1 = vld [vmem:[#allocation2 + $0x3d0] sm:$0xff]  ;;  %v4213_v29 = vsub.f32 %v163_v38, %v1649_v42  ;;  %v361_v38 = vand.u32 4294901760, %v230_v2  ;;  %v1653_v8 = vand.u32 4294901760, %v165_v15  ;;  %2955 = vmatprep.subr.bf16.mxu1 %v4217_v14  ;;  %v1657_v42 = vand.u32 4294901760, %v167_v26 }
  0x7c   :  { %6167 = vst [vmem:[#allocation171_spill] sm:$0xff] %v4199_v32  ;;  %6168 = vst [vmem:[#allocation172_spill] sm:$0xff] %v4201_v54  ;;  %v365_v37 = vand.u32 4294901760, %v232_v1  ;;  %v4225_v36 = vsub.f32 %v166_v28, %v1651_v22  ;;  %v371_v32 = vand.u32 4294901760, %v237_v59  ;;  %v4227_v31 = vpack.c.bf16 %v1655_v49, %v1651_v22  ;;  %v4243_v22 = vld [vmem:[#allocation5] sm:$0xff] }
  0x7d   :  { %6169 = vst [vmem:[#allocation173_spill] sm:$0xff] %v4203_v11  ;;  %6170 = vst [vmem:[#allocation174_spill] sm:$0xff] %v4205_v55  ;;  %v367_v11 = vand.u32 4294901760, %v235_v47  ;;  %v4229_v60 = vsub.f32 %v168_v53, %v1655_v49  ;;  %v4237_v28 = vpack.c.bf16 %v1657_v42, %v1653_v8  ;;  %v171_v55 = vld [vmem:[#allocation2 + $0x1f0] sm:$0xff]  ;;  %v4245_v53 = vld [vmem:[#allocation5 + $0x8] sm:$0xff] }
  0x7e   :  { %6171 = vst [vmem:[#allocation175_spill] sm:$0xff] %v4207_v45  ;;  %6172 = vst [vmem:[#allocation176_spill] sm:$0xff] %v4209_v21  ;;  %v4231_v7 = vpack.c.bf16 %v365_v37, %v361_v38  ;;  %v4233_v21 = vsub.f32 %v230_v2, %v361_v38  ;;  %v4235_v45 = vsub.f32 %v232_v1, %v365_v37  ;;  %3339 = vmatprep.subr.bf16.mxu0 %v4227_v31 }
  0x7f   :  { %6173 = vst [vmem:[#allocation177_spill] sm:$0xff] %v4211_v24  ;;  %6174 = vst [vmem:[#allocation178_spill] sm:$0xff] %v4213_v29  ;;  %v170_v29 = vld [vmem:[#allocation2 + $0x1e8] sm:$0xff]  ;;  %v169_v24 = vld [vmem:[#allocation2 + $0x1e0] sm:$0xff]  ;;  %v4249_v2 = vpack.c.bf16 %v371_v32, %v367_v11  ;;  %v4251_v49 = vsub.f32 %v235_v47, %v367_v11  ;;  %v4253_v1 = vsub.f32 %v237_v59, %v371_v32  ;;  %3341 = vmatpush1.bf16.msra.mxu0 %v4237_v28 }
  0x80   :  { %6175 = vst [vmem:[#allocation179_spill] sm:$0xff] %v4217_v14  ;;  %6176 = vst [vmem:[#allocation180_spill] sm:$0xff] %v4219_v9  ;;  %v236_v9 = vld [vmem:[#allocation2 + $0x3f0] sm:$0xff]  ;;  %v4239_v14 = vsub.f32 %v165_v15, %v1653_v8  ;;  %2957 = vmatpush1.bf16.msra.mxu1 %v4231_v7  ;;  %v1659_v38 = vand.u32 4294901760, %v170_v29  ;;  %v1661_v8 = vand.u32 4294901760, %v169_v24  ;;  %v45_v11 = vcombine.high %v4245_v53, %v4245_v53 }
  0x81   :  { %6177 = vst [vmem:[#allocation181_spill] sm:$0xff] %v4221_v0  ;;  %6178 = vst [vmem:[#allocation182_spill] sm:$0xff] %v4225_v36  ;;  %v234_v0 = vld [vmem:[#allocation2 + $0x3e0] sm:$0xff]  ;;  %v4241_v36 = vsub.f32 %v167_v26, %v1657_v42  ;;  %v1663_v26 = vand.u32 4294901760, %v172_v20  ;;  %v373_v37 = vand.u32 4294901760, %v236_v9  ;;  %2959 = vmatprep.subr.bf16.mxu1 %v4249_v2 }
  0x82   :  { %6179 = vst [vmem:[#allocation183_spill] sm:$0xff] %v4227_v31  ;;  %6180 = vst [vmem:[#allocation184_spill] sm:$0xff] %v4229_v60  ;;  %v369_v15 = vand.u32 4294901760, %v234_v0  ;;  %v4257_v42 = vsub.f32 %v170_v29, %v1659_v38  ;;  %v1665_v31 = vand.u32 4294901760, %v171_v55  ;;  %v4275_v29 = vsub.f32 %v169_v24, %v1661_v8 }
  0x83   :  { %6181 = vst [vmem:[#allocation185_spill] sm:$0xff] %v4231_v7  ;;  %6182 = vst [vmem:[#allocation186_spill] sm:$0xff] %v4233_v21  ;;  %v44_v7 = vcombine.high %v4243_v22, %v4243_v22  ;;  %v4263_v59 = vpack.c.bf16 %v1663_v26, %v1659_v38  ;;  %v4265_v32 = vsub.f32 %v172_v20, %v1663_v26  ;;  %v102_v20 = vsel %vm48_vm0, %v45_v11, -inf }
  0x84   :  { %6183 = vst [vmem:[#allocation187_spill] sm:$0xff] %v4235_v45  ;;  %6184 = vst [vmem:[#allocation188_spill] sm:$0xff] %v4237_v28  ;;  %v4267_v47 = vpack.c.bf16 %v373_v37, %v369_v15  ;;  %v4269_v28 = vsub.f32 %v234_v0, %v369_v15  ;;  %v5712_v26 = vand.u32 4294901760, %v3828_v16  ;;  %v5713_v0 = vand.u32 4294901760, %v3830_v17 }
  0x85   :  { %6185 = vst [vmem:[#allocation189_spill] sm:$0xff] %v4239_v14  ;;  %6186 = vst [vmem:[#allocation190_spill] sm:$0xff] %v4241_v36  ;;  %3343 = vmatprep.subr.bf16.mxu0 %v4263_v59  ;;  %v88_v38 = vsel %vm48_vm0, %v44_v7, -inf  ;;  %v103_v15 = vrot.slane %v102_v20, 4  ;;  %v56_v24 = vsel %vm48_vm0, %v44_v7, 0.0  ;;  %v5732_v14 = vand.u32 4294901760, %v3840_v25 }
  0x86   :  { %6187 = vst [vmem:[#allocation191_spill] sm:$0xff] %v4249_v2  ;;  %6188 = vst [vmem:[#allocation192_spill] sm:$0xff] %v4251_v49  ;;  %v4273_v2 = vpack.c.bf16 %v1665_v31, %v1661_v8  ;;  %2961 = vmatpush1.bf16.msra.mxu1 %v4267_v47  ;;  %v57_v8 = vrot.slane %v56_v24, 4 }
  0x87   :  { %6189 = vst [vmem:[#allocation193_spill] sm:$0xff] %v4253_v1  ;;  %6190 = vst [vmem:[#allocation194_spill] sm:$0xff] %v4257_v42  ;;  %v4271_v1 = vsub.f32 %v236_v9, %v373_v37  ;;  %v4277_v42 = vsub.f32 %v171_v55, %v1665_v31  ;;  %v89_v9 = vrot.slane %v88_v38, 4  ;;  %v70_v55 = vsel %vm48_vm0, %v45_v11, 0.0 }
  0x88   :  { %6191 = vst [vmem:[#allocation195_spill] sm:$0xff] %v4263_v59  ;;  %6192 = vst [vmem:[#allocation196_spill] sm:$0xff] %v4265_v32  ;;  %3345 = vmatpush1.bf16.msra.mxu0 %v4273_v2  ;;  %v395_v31 = vsub.f32 %v3828_v16, %v5712_v26  ;;  %v407_v37 = vsub.f32 %v3830_v17, %v5713_v0  ;;  %v58_v11 = vadd.f32 %v57_v8, %v56_v24 }
  0x89   :  { %6193 = vst [vmem:[#allocation197_spill] sm:$0xff] %v4267_v47  ;;  %6194 = vst [vmem:[#allocation198_spill] sm:$0xff] %v4269_v28  ;;  %v71_v47 = vrot.slane %v70_v55, 4  ;;  %v90_v59 = vmax.f32 %v88_v38, %v89_v9 }
  0x8a   :  { %6195 = vst [vmem:[#allocation199_spill] sm:$0xff] %v4271_v1  ;;  %6196 = vst [vmem:[#allocation200_spill] sm:$0xff] %v4273_v2  ;;  %v5716_v2 = vand.u32 4294901760, %v3832_v18  ;;  %v396_v7 = vand.u32 4294901760, %v395_v31  ;;  %v408_v1 = vand.u32 4294901760, %v407_v37 }
  0x8b   :  { %6197 = vst [vmem:[#allocation201_spill] sm:$0xff] %v4275_v29  ;;  %6198 = vst [vmem:[#allocation202_spill] sm:$0xff] %v4277_v42  ;;  %v104_v42 = vmax.f32 %v102_v20, %v103_v15  ;;  %v5721_v29 = vand.u32 4294901760, %v3836_v23  ;;  %v72_v28 = vadd.f32 %v71_v47, %v70_v55  ;;  %v91_v32 = vrot.slane %v90_v59, 2 }
  0x8c   :  { %v1687_v26 = vsub.f32 %v3832_v18, %v5716_v2  ;;  %v2962_v38 = vpack.c.bf16 %v408_v1, %v396_v7  ;;  %v59_v20 = vrot.slane %v58_v11, 2  ;;  %v81_v15 = vsel %vm48_vm0, %v4243_v22, -inf }
  0x8d   :  { %v105_v49 = vrot.slane %v104_v42, 2  ;;  %v1699_v0 = vsub.f32 %v3836_v23, %v5721_v29  ;;  %v73_v9 = vrot.slane %v72_v28, 2  ;;  %v92_v31 = vmax.f32 %v90_v59, %v91_v32 }
  0x8e   :  { %v1688_v24 = vand.u32 4294901760, %v1687_v26  ;;  %2963 = vmatprep.subr.bf16.mxu1 %v2962_v38  ;;  %v60_v55 = vadd.f32 %v59_v20, %v58_v11  ;;  %v82_v17 = vrot.slane %v81_v15, 4  ;;  %v95_v2 = vsel %vm48_vm0, %v4245_v53, -inf }
  0x8f   :  { %v106_v37 = vmax.f32 %v104_v42, %v105_v49  ;;  %v1700_v47 = vand.u32 4294901760, %v1699_v0  ;;  %v74_v8 = vadd.f32 %v73_v9, %v72_v28  ;;  %v93_v18 = vrot.slane %v92_v31, 1 }
  0x90   :  { %v96_v1 = vrot.slane %v95_v2, 4  ;;  %v61_v7 = vrot.slane %v60_v55, 1  ;;  %v83_v36 = vmax.f32 %v81_v15, %v82_v17  ;;  %v5728_v32 = vand.u32 4294901760, %v3843_v27 }
  0x91   :  { %v107_v16 = vrot.slane %v106_v37, 1  ;;  %v3346_v29 = vpack.c.bf16 %v1700_v47, %v1688_v24  ;;  %v75_v23 = vrot.slane %v74_v8, 1  ;;  %v94_v59 = vmax.f32 %v92_v31, %v93_v18 }
  0x92   :  { %v97_v42 = vmax.f32 %v95_v2, %v96_v1  ;;  %v62_v28 = vadd.f32 %v61_v7, %v60_v55  ;;  %v84_v0 = vrot.slane %v83_v36, 2  ;;  %v401_v11 = vsub.f32 %v3840_v25, %v5732_v14 }
  0x93   :  { %v108_v49 = vmax.f32 %v106_v37, %v107_v16  ;;  %3347 = vmatprep.subr.bf16.mxu0 %v3346_v29  ;;  %v76_v26 = vadd.f32 %v75_v23, %v74_v8  ;;  %v413_v17 = vsub.f32 %v3843_v27, %v5728_v32  ;;  %v49_v16 = vsel %vm48_vm0, %v4243_v22, 0.0 }
  0x94   :  { %v98_v20 = vrot.slane %v97_v42, 2  ;;  %v78_v2 = vmul.f32 0.25, %v62_v28  ;;  %v85_v23 = vmax.f32 %v83_v36, %v84_v0  ;;  %v402_v15 = vand.u32 4294901760, %v401_v11 }
  0x95   :  { %v244_v38 = vsel %vm242_vm1, %v108_v49, %v94_v59  ;;  %v80_v29 = vmul.f32 0.25, %v76_v26  ;;  %v414_v31 = vand.u32 4294901760, %v413_v17  ;;  %v50_v37 = vrot.slane %v49_v16, 4 }
  0x96   :  { %v4317_v18 = vand.u32 4294901760, %v244_v38  ;;  %v99_v9 = vmax.f32 %v97_v42, %v98_v20  ;;  %v86_v55 = vrot.slane %v85_v23, 1  ;;  %v63_v8 = vsel %vm48_vm0, %v4245_v53, 0.0 }
  0x97   :  { %v1536_v47 = vsel %vm242_vm1, %v80_v29, %v78_v2  ;;  %v4327_v7 = vpack.c.bf16 %v414_v31, %v402_v15  ;;  %v51_v59 = vadd.f32 %v50_v37, %v49_v16  ;;  %v64_v42 = vrot.slane %v63_v8, 4 }
  0x98   :  { %6199 = vst [vmem:[#allocation203_spill] sm:$0xff] %v4317_v18  ;;  %v4320_v24 = vsub.f32 %v244_v38, %v4317_v18  ;;  %v4325_v1 = vand.u32 4294901760, %v1536_v47  ;;  %v100_v22 = vrot.slane %v99_v9, 1  ;;  %v87_v49 = vmax.f32 %v85_v23, %v86_v55 }
  0x99   :  { %v5727_v28 = vand.u32 4294901760, %v3849_v39  ;;  %v52_v11 = vrot.slane %v51_v59, 2  ;;  %v5726_v38 = vand.u32 4294901760, %v3851_v40  ;;  %v65_v20 = vadd.f32 %v64_v42, %v63_v8 }
  0x9a   :  { %6200 = vst [vmem:[#allocation204_spill] sm:$0xff] %v4320_v24  ;;  %6201 = vst [vmem:[#allocation205_spill] sm:$0xff] %v4325_v1  ;;  %v5746_v36 = vand.u32 4294901760, %v4320_v24  ;;  %v4332_v26 = vsub.f32 %v1536_v47, %v4325_v1  ;;  %v101_v0 = vmax.f32 %v99_v9, %v100_v22  ;;  %v5731_v16 = vand.u32 4294901760, %v3853_v41 }
  0x9b   :  { %v1693_v17 = vsub.f32 %v3849_v39, %v5727_v28  ;;  %v53_v23 = vadd.f32 %v52_v11, %v51_v59  ;;  %v1705_v9 = vsub.f32 %v3851_v40, %v5726_v38  ;;  %v66_v37 = vrot.slane %v65_v20, 2 }
  0x9c   :  { %6202 = vst [vmem:[#allocation206_spill] sm:$0xff] %v4332_v26  ;;  %v378_v53 = vsub.f32 %v4320_v24, %v5746_v36  ;;  %v5745_v2 = vand.u32 4294901760, %v4332_v26  ;;  %v243_v29 = vsel %vm242_vm1, %v101_v0, %v87_v49  ;;  %v419_v49 = vsub.f32 %v3853_v41, %v5731_v16 }
  0x9d   :  { %v4347_v31 = vand.u32 4294901760, %v243_v29  ;;  %v1694_v47 = vand.u32 4294901760, %v1693_v17  ;;  %v54_v8 = vrot.slane %v53_v23, 1  ;;  %v1706_v22 = vand.u32 4294901760, %v1705_v9 }
  0x9e   :  { %v379_v15 = vand.u32 4294901760, %v378_v53  ;;  %v1670_v55 = vsub.f32 %v4332_v26, %v5745_v2  ;;  %v67_v42 = vadd.f32 %v66_v37, %v65_v20  ;;  %v5729_v0 = vand.u32 4294901760, %v3857_v46  ;;  %v6253_v26 = vld [vmem:[#allocation132_spill] sm:$0xff] }
  0x9f   :  { %6203 = vst [vmem:[#allocation207_spill] sm:$0xff] %v4347_v31  ;;  %v4356_v59 = vsub.f32 %v243_v29, %v4347_v31  ;;  %v5730_v11 = vand.u32 4294901760, %v3861_v48  ;;  %v55_v17 = vadd.f32 %v54_v8, %v53_v23  ;;  %v4360_v38 = vpack.c.bf16 %v1706_v22, %v1694_v47 }
  0xa0   :  { %380 = vmatprep.mubr.f32.mxu1 %v379_v15  ;;  %v1671_v53 = vand.u32 4294901760, %v1670_v55  ;;  %v420_v28 = vand.u32 4294901760, %v419_v49  ;;  %v68_v32 = vrot.slane %v67_v42, 1  ;;  %v431_v15 = vsub.f32 %v3857_v46, %v5729_v0 }
  0xa1   :  { %6204 = vst [vmem:[#allocation208_spill] sm:$0xff] %v4356_v59  ;;  %v5733_v9 = vand.u32 4294901760, %v4356_v59  ;;  %v1711_v20 = vsub.f32 %v3861_v48, %v5730_v11  ;;  %v77_v29 = vmul.f32 0.25, %v55_v17  ;;  %v5734_v37 = vand.u32 4294901760, %v3864_v50 }
  0xa2   :  { %1672 = vmatprep.mubr.f32.mxu0 %v1671_v53  ;;  %v5735_v23 = vand.u32 4294901760, %v3866_v52  ;;  %v5736_v47 = vand.u32 4294901760, %v3872_v61  ;;  %v69_v8 = vadd.f32 %v68_v32, %v67_v42  ;;  %v432_v22 = vand.u32 4294901760, %v431_v15 }
  0xa3   :  { %v384_v55 = vsub.f32 %v4356_v59, %v5733_v9  ;;  %v1712_v49 = vand.u32 4294901760, %v1711_v20  ;;  %v1723_v0 = vsub.f32 %v3864_v50, %v5734_v37  ;;  %v5738_v11 = vand.u32 4294901760, %v3874_v62 }
  0xa4   :  { %v425_v53 = vsub.f32 %v3866_v52, %v5735_v23  ;;  %v437_v17 = vsub.f32 %v3872_v61, %v5736_v47  ;;  %v79_v14 = vmul.f32 0.25, %v69_v8  ;;  %v2966_v9 = vpack.c.bf16 %v432_v22, %v420_v28 }
  0xa5   :  { %v385_v16 = vand.u32 4294901760, %v384_v55  ;;  %v5737_v32 = vand.u32 4294901760, %v3878_v4  ;;  %v1724_v42 = vand.u32 4294901760, %v1723_v0  ;;  %v1717_v37 = vsub.f32 %v3874_v62, %v5738_v11 }
  0xa6   :  { %v426_v15 = vand.u32 4294901760, %v425_v53  ;;  %v438_v20 = vand.u32 4294901760, %v437_v17  ;;  %v1535_v23 = vsel %vm242_vm1, %v79_v14, %v77_v29  ;;  %v5742_v55 = vand.u32 4294901760, %v3882_v6 }
  0xa7   :  { %386 = vmatmul.mubr.f32.vlgmr.msra.gmra.mrb[0].mxu1 %v385_v16  ;;  %v1729_v47 = vsub.f32 %v3878_v4, %v5737_v32  ;;  %v5740_v28 = vand.u32 4294901760, %v3885_v10  ;;  %v4396_v0 = vand.u32 4294901760, %v1535_v23  ;;  %v3350_v8 = vpack.c.bf16 %v1724_v42, %v1712_v49 }
  0xa8   :  { %2965 = vmatpush1.bf16.msra.mxu1 %v4327_v7  ;;  %v2968_v22 = vpack.c.bf16 %v438_v20, %v426_v15  ;;  %v1718_v53 = vand.u32 4294901760, %v1717_v37  ;;  %777 = vmatprep.mubr.f32.mxu1 %v4317_v18  ;;  %v443_v14 = vsub.f32 %v3882_v6, %v5742_v55  ;;  %v5739_v17 = vand.u32 4294901760, %v3889_v12 }
  0xa9   :  { %6205 = vst [vmem:[#allocation209_spill] sm:$0xff] %v4396_v0  ;;  %2967 = vmatprep.subr.bf16.mxu1 %v2966_v9  ;;  %v1730_v16 = vand.u32 4294901760, %v1729_v47  ;;  %v455_v29 = vsub.f32 %v3885_v10, %v5740_v28  ;;  %v4407_v7 = vsub.f32 %v1535_v23, %v4396_v0  ;;  %v5741_v49 = vand.u32 4294901760, %v3891_v13 }
  0xaa   :  { %v5743_v37 = vand.u32 4294901760, %v3898_v33  ;;  %v5744_v9 = vand.u32 4294901760, %v3900_v34  ;;  %v444_v42 = vand.u32 4294901760, %v443_v14  ;;  %v1735_v20 = vsub.f32 %v3889_v12, %v5739_v17 }
  0xab   :  { %6206 = vst [vmem:[#allocation210_spill] sm:$0xff] %v4407_v7  ;;  %v3352_v47 = vpack.c.bf16 %v1730_v16, %v1718_v53  ;;  %v456_v15 = vand.u32 4294901760, %v455_v29  ;;  %v5757_v32 = vand.u32 4294901760, %v4407_v7  ;;  %v1747_v23 = vsub.f32 %v3891_v13, %v5741_v49 }
  0xac   :  { %2969 = vmatpush1.bf16.msra.mxu1 %v2968_v22  ;;  %v449_v11 = vsub.f32 %v3898_v33, %v5743_v37  ;;  %v461_v53 = vsub.f32 %v3900_v34, %v5744_v9  ;;  %v1736_v14 = vand.u32 4294901760, %v1735_v20  ;;  %v5747_v29 = vand.u32 4294901760, %v3904_v43 }
  0xad   :  { %v2970_v16 = vpack.c.bf16 %v456_v15, %v444_v42  ;;  %v5748_v17 = vand.u32 4294901760, %v3906_v44  ;;  %v1676_v22 = vsub.f32 %v4407_v7, %v5757_v32  ;;  %v1748_v28 = vand.u32 4294901760, %v1747_v23  ;;  %v6209_v32 = vld [vmem:[#allocation66_spill] sm:$0xff] }
  0xae   :  { %v450_v49 = vand.u32 4294901760, %v449_v11  ;;  %v462_v55 = vand.u32 4294901760, %v461_v53  ;;  %v1741_v37 = vsub.f32 %v3904_v43, %v5747_v29  ;;  %v5755_v15 = vand.u32 4294901760, %v3910_v51 }
  0xaf   :  { %2971 = vmatprep.subr.bf16.mxu1 %v2970_v16  ;;  %v1753_v42 = vsub.f32 %v3906_v44, %v5748_v17  ;;  %v5751_v20 = vand.u32 4294901760, %v3914_v56  ;;  %v1677_v9 = vand.u32 4294901760, %v1676_v22  ;;  %v3354_v2 = vpack.c.bf16 %v1748_v28, %v1736_v14 }
  0xb0   :  { %v2972_v36 = vpack.c.bf16 %v462_v55, %v450_v49  ;;  %v5749_v23 = vand.u32 4294901760, %v3918_v58  ;;  %v1742_v11 = vand.u32 4294901760, %v1741_v37  ;;  %v467_v16 = vsub.f32 %v3910_v51, %v5755_v15 }
  0xb1   :  { %v1754_v53 = vand.u32 4294901760, %v1753_v42  ;;  %v479_v29 = vsub.f32 %v3914_v56, %v5751_v20  ;;  %1678 = vmatmul.mubr.f32.vlgmr.msra.gmra.mrb[0].mxu0 %v1677_v9  ;;  %v5750_v55 = vand.u32 4294901760, %v3921_v63  ;;  %v5752_v28 = vand.u32 4294901760, %v3924_v19 }
  0xb2   :  { %2973 = vmatpush1.bf16.msra.mxu1 %v2972_v36  ;;  %v1759_v22 = vsub.f32 %v3918_v58, %v5749_v23  ;;  %v5754_v49 = vand.u32 4294901760, %v3928_v35  ;;  %3349 = vmatpush1.bf16.msra.mxu0 %v4360_v38  ;;  %v468_v14 = vand.u32 4294901760, %v467_v16  ;;  %v5753_v17 = vand.u32 4294901760, %v3932_v30 }
  0xb3   :  { %v3356_v37 = vpack.c.bf16 %v1754_v53, %v1742_v11  ;;  %v480_v42 = vand.u32 4294901760, %v479_v29  ;;  %2069 = vmatprep.mubr.f32.mxu0 %v4325_v1  ;;  %3351 = vmatprep.subr.bf16.mxu0 %v3350_v8  ;;  %v1771_v9 = vsub.f32 %v3921_v63, %v5750_v55  ;;  %v473_v23 = vsub.f32 %v3924_v19, %v5752_v28 }
  0xb4   :  { %v1760_v36 = vand.u32 4294901760, %v1759_v22  ;;  %v485_v38 = vsub.f32 %v3928_v35, %v5754_v49  ;;  %v1765_v29 = vsub.f32 %v3932_v30, %v5753_v17  ;;  %v5756_v8 = vand.u32 4294901760, %v3934_v57  ;;  %v6207_v17 = vld [vmem:[#allocation62_spill] sm:$0xff] }
  0xb5   :  { %v2974_v11 = vpack.c.bf16 %v480_v42, %v468_v14  ;;  %v5760_v53 = vand.u32 4294901760, %v3938_v3  ;;  %v1772_v16 = vand.u32 4294901760, %v1771_v9  ;;  %v474_v22 = vand.u32 4294901760, %v473_v23 }
  0xb6   :  { %v486_v55 = vand.u32 4294901760, %v485_v38  ;;  %v5761_v20 = vand.u32 4294901760, %v3940_v5  ;;  %3353 = vmatpush1.bf16.msra.mxu0 %v3352_v47  ;;  %v1766_v28 = vand.u32 4294901760, %v1765_v29  ;;  %v1777_v14 = vsub.f32 %v3934_v57, %v5756_v8  ;;  %v6208_v47 = vld [vmem:[#allocation64_spill] sm:$0xff] }
  0xb7   :  { %2975 = vmatprep.subr.bf16.mxu1 %v2974_v11  ;;  %v491_v42 = vsub.f32 %v3938_v3, %v5760_v53  ;;  %v5762_v49 = vand.u32 4294901760, %v6207_v17  ;;  %3355 = vmatprep.subr.bf16.mxu0 %v3354_v2  ;;  %v3358_v15 = vpack.c.bf16 %v1772_v16, %v1760_v36  ;;  %v5765_v38 = vand.u32 4294901760, %v6208_v47  ;;  %v6211_v16 = vld [vmem:[#allocation69_spill] sm:$0xff] }
  0xb8   :  { %v2976_v9 = vpack.c.bf16 %v486_v55, %v474_v22  ;;  %v503_v23 = vsub.f32 %v3940_v5, %v5761_v20  ;;  %v1778_v11 = vand.u32 4294901760, %v1777_v14  ;;  %v5768_v1 = vand.u32 4294901760, %v6209_v32  ;;  %v6210_v55 = vld [vmem:[#allocation67_spill] sm:$0xff] }
  0xb9   :  { %v492_v29 = vand.u32 4294901760, %v491_v42  ;;  %v1783_v8 = vsub.f32 %v6207_v17, %v5762_v49  ;;  %v1795_v2 = vsub.f32 %v6208_v47, %v5765_v38  ;;  %v5772_v36 = vand.u32 4294901760, %v6210_v55  ;;  %v6212_v49 = vld [vmem:[#allocation70_spill] sm:$0xff] }
  0xba   :  { %2977 = vmatpush1.bf16.msra.mxu1 %v2976_v9  ;;  %v504_v53 = vand.u32 4294901760, %v503_v23  ;;  %v5774_v22 = vand.u32 4294901760, %v6211_v16  ;;  %3357 = vmatpush1.bf16.msra.mxu0 %v3356_v37  ;;  %v3360_v20 = vpack.c.bf16 %v1778_v11, %v1766_v28  ;;  %v497_v42 = vsub.f32 %v6209_v32, %v5768_v1  ;;  %v6214_v1 = vld [vmem:[#allocation73_spill] sm:$0xff] }
  0xbb   :  { %v1784_v14 = vand.u32 4294901760, %v1783_v8  ;;  %v5773_v18 = vand.u32 4294901760, %v6212_v49  ;;  %3359 = vmatprep.subr.bf16.mxu0 %v3358_v15  ;;  %v1796_v23 = vand.u32 4294901760, %v1795_v2  ;;  %v509_v38 = vsub.f32 %v6210_v55, %v5772_v36  ;;  %v6213_v8 = vld [vmem:[#allocation72_spill] sm:$0xff]  ;;  %v6215_v2 = vld [vmem:[#allocation74_spill] sm:$0xff] }
  0xbc   :  { %v2978_v9 = vpack.c.bf16 %v504_v53, %v492_v29  ;;  %v1789_v7 = vsub.f32 %v6211_v16, %v5774_v22  ;;  %v498_v37 = vand.u32 4294901760, %v497_v42  ;;  %v5778_v11 = vand.u32 4294901760, %v6213_v8  ;;  %v6216_v22 = vld [vmem:[#allocation76_spill] sm:$0xff] }
  0xbd   :  { %v1801_v28 = vsub.f32 %v6212_v49, %v5773_v18  ;;  %v5779_v59 = vand.u32 4294901760, %v6214_v1  ;;  %v3362_v15 = vpack.c.bf16 %v1796_v23, %v1784_v14  ;;  %v510_v53 = vand.u32 4294901760, %v509_v38  ;;  %v6217_v38 = vld [vmem:[#allocation78_spill] sm:$0xff] }
  0xbe   :  { %2979 = vmatprep.subr.bf16.mxu1 %v2978_v9  ;;  %v1790_v29 = vand.u32 4294901760, %v1789_v7  ;;  %v5780_v32 = vand.u32 4294901760, %v6215_v2  ;;  %3361 = vmatpush1.bf16.msra.mxu0 %v3360_v20  ;;  %v515_v42 = vsub.f32 %v6213_v8, %v5778_v11  ;;  %v5783_v49 = vand.u32 4294901760, %v6216_v22  ;;  %v6218_v20 = vld [vmem:[#allocation79_spill] sm:$0xff] }
  0xbf   :  { %v1802_v36 = vand.u32 4294901760, %v1801_v28  ;;  %v527_v18 = vsub.f32 %v6214_v1, %v5779_v59  ;;  %3363 = vmatprep.subr.bf16.mxu0 %v3362_v15  ;;  %v2980_v16 = vpack.c.bf16 %v510_v53, %v498_v37  ;;  %v5784_v14 = vand.u32 4294901760, %v6217_v38  ;;  %v6219_v53 = vld [vmem:[#allocation81_spill] sm:$0xff] }
  0xc0   :  { %v1807_v7 = vsub.f32 %v6215_v2, %v5780_v32  ;;  %v5788_v9 = vand.u32 4294901760, %v6218_v20  ;;  %v516_v28 = vand.u32 4294901760, %v515_v42  ;;  %v1819_v11 = vsub.f32 %v6216_v22, %v5783_v49  ;;  %v6221_v2 = vld [vmem:[#allocation84_spill] sm:$0xff] }
  0xc1   :  { %v3364_v23 = vpack.c.bf16 %v1802_v36, %v1790_v29  ;;  %v528_v55 = vand.u32 4294901760, %v527_v18  ;;  %2981 = vmatpush1.bf16.msra.mxu1 %v2980_v16  ;;  %v521_v37 = vsub.f32 %v6217_v38, %v5784_v14  ;;  %v5787_v32 = vand.u32 4294901760, %v6219_v53  ;;  %v6220_v18 = vld [vmem:[#allocation82_spill] sm:$0xff]  ;;  %v6222_v14 = vld [vmem:[#allocation85_spill] sm:$0xff] }
  0xc2   :  { %v1808_v59 = vand.u32 4294901760, %v1807_v7  ;;  %v533_v15 = vsub.f32 %v6218_v20, %v5788_v9  ;;  %v1820_v29 = vand.u32 4294901760, %v1819_v11  ;;  %v5790_v42 = vand.u32 4294901760, %v6220_v18  ;;  %v6223_v11 = vld [vmem:[#allocation86_spill] sm:$0xff]  ;;  %v6224_v9 = vld [vmem:[#allocation88_spill] sm:$0xff] }
  0xc3   :  { %3365 = vmatpush1.bf16.msra.mxu0 %v3364_v23  ;;  %v2982_v36 = vpack.c.bf16 %v528_v55, %v516_v28  ;;  %v5792_v1 = vand.u32 4294901760, %v6221_v2  ;;  %v522_v49 = vand.u32 4294901760, %v521_v37  ;;  %v1813_v7 = vsub.f32 %v6219_v53, %v5787_v32 }
  0xc4   :  { %v534_v16 = vand.u32 4294901760, %v533_v15  ;;  %v5793_v38 = vand.u32 4294901760, %v6222_v14  ;;  %v3366_v22 = vpack.c.bf16 %v1820_v29, %v1808_v59  ;;  %v1825_v23 = vsub.f32 %v6220_v18, %v5790_v42  ;;  %v6225_v42 = vld [vmem:[#allocation90_spill] sm:$0xff] }
  0xc5   :  { %2983 = vmatprep.subr.bf16.mxu1 %v2982_v36  ;;  %v539_v55 = vsub.f32 %v6221_v2, %v5792_v1  ;;  %v5796_v28 = vand.u32 4294901760, %v6223_v11  ;;  %v1814_v15 = vand.u32 4294901760, %v1813_v7  ;;  %v5799_v53 = vand.u32 4294901760, %v6224_v9 }
  0xc6   :  { %v2984_v37 = vpack.c.bf16 %v534_v16, %v522_v49  ;;  %v551_v32 = vsub.f32 %v6222_v14, %v5793_v38  ;;  %3367 = vmatprep.subr.bf16.mxu0 %v3366_v22  ;;  %v1826_v59 = vand.u32 4294901760, %v1825_v23  ;;  %v5800_v18 = vand.u32 4294901760, %v6225_v42  ;;  %v6226_v16 = vld [vmem:[#allocation91_spill] sm:$0xff]  ;;  %v6227_v38 = vld [vmem:[#allocation93_spill] sm:$0xff] }
  0xc7   :  { %v540_v36 = vand.u32 4294901760, %v539_v55  ;;  %v1831_v29 = vsub.f32 %v6223_v11, %v5796_v28  ;;  %v1843_v49 = vsub.f32 %v6224_v9, %v5799_v53  ;;  %v5803_v7 = vand.u32 4294901760, %v6226_v16  ;;  %v6228_v55 = vld [vmem:[#allocation94_spill] sm:$0xff] }
  0xc8   :  { %2985 = vmatpush1.bf16.msra.mxu1 %v2984_v37  ;;  %v552_v1 = vand.u32 4294901760, %v551_v32  ;;  %v5806_v14 = vand.u32 4294901760, %v6227_v38  ;;  %v3368_v2 = vpack.c.bf16 %v1826_v59, %v1814_v15  ;;  %v545_v23 = vsub.f32 %v6225_v42, %v5800_v18  ;;  %v6229_v59 = vld [vmem:[#allocation96_spill] sm:$0xff]  ;;  %v6230_v18 = vld [vmem:[#allocation97_spill] sm:$0xff]  ;;  %v6231_v9 = vld [vmem:[#allocation98_spill] sm:$0xff] }
  0xc9   :  { %v1832_v22 = vand.u32 4294901760, %v1831_v29  ;;  %v5805_v28 = vand.u32 4294901760, %v6228_v55  ;;  %v1844_v20 = vand.u32 4294901760, %v1843_v49  ;;  %v557_v32 = vsub.f32 %v6226_v16, %v5803_v7 }
  0xca   :  { %v2986_v11 = vpack.c.bf16 %v552_v1, %v540_v36  ;;  %v1837_v37 = vsub.f32 %v6227_v38, %v5806_v14  ;;  %3369 = vmatpush1.bf16.msra.mxu0 %v3368_v2  ;;  %v546_v53 = vand.u32 4294901760, %v545_v23  ;;  %v5810_v29 = vand.u32 4294901760, %v6229_v59 }
  0xcb   :  { %v1849_v15 = vsub.f32 %v6228_v55, %v5805_v28  ;;  %v5811_v42 = vand.u32 4294901760, %v6230_v18  ;;  %v3370_v1 = vpack.c.bf16 %v1844_v20, %v1832_v22  ;;  %v558_v36 = vand.u32 4294901760, %v557_v32  ;;  %v6232_v28 = vld [vmem:[#allocation100_spill] sm:$0xff]  ;;  %v6234_v32 = vld [vmem:[#allocation103_spill] sm:$0xff] }
  0xcc   :  { %2987 = vmatprep.subr.bf16.mxu1 %v2986_v11  ;;  %v1838_v49 = vand.u32 4294901760, %v1837_v37  ;;  %v5812_v7 = vand.u32 4294901760, %v6231_v9  ;;  %v563_v2 = vsub.f32 %v6229_v59, %v5810_v29  ;;  %v5815_v14 = vand.u32 4294901760, %v6232_v28  ;;  %v6233_v11 = vld [vmem:[#allocation102_spill] sm:$0xff] }
  0xcd   :  { %v1850_v16 = vand.u32 4294901760, %v1849_v15  ;;  %v575_v23 = vsub.f32 %v6230_v18, %v5811_v42  ;;  %3371 = vmatprep.subr.bf16.mxu0 %v3370_v1  ;;  %v2988_v55 = vpack.c.bf16 %v558_v36, %v546_v53  ;;  %v5816_v22 = vand.u32 4294901760, %v6233_v11  ;;  %v6235_v36 = vld [vmem:[#allocation105_spill] sm:$0xff]  ;;  %v6247_v59 = vld [vmem:[#allocation122_spill] sm:$0xff] }
  0xce   :  { %v1855_v20 = vsub.f32 %v6231_v9, %v5812_v7  ;;  %v5820_v37 = vand.u32 4294901760, %v6234_v32  ;;  %v564_v38 = vand.u32 4294901760, %v563_v2  ;;  %v1867_v29 = vsub.f32 %v6232_v28, %v5815_v14  ;;  %v6236_v2 = vld [vmem:[#allocation106_spill] sm:$0xff]  ;;  %v6237_v9 = vld [vmem:[#allocation108_spill] sm:$0xff] }
  0xcf   :  { %v3372_v15 = vpack.c.bf16 %v1850_v16, %v1838_v49  ;;  %v576_v8 = vand.u32 4294901760, %v575_v23  ;;  %2989 = vmatpush1.bf16.msra.mxu1 %v2988_v55  ;;  %v569_v53 = vsub.f32 %v6233_v11, %v5816_v22  ;;  %v5819_v7 = vand.u32 4294901760, %v6235_v36  ;;  %v6238_v22 = vld [vmem:[#allocation109_spill] sm:$0xff] }
  0xd0   :  { %v1856_v42 = vand.u32 4294901760, %v1855_v20  ;;  %v581_v1 = vsub.f32 %v6234_v32, %v5820_v37  ;;  %v1868_v49 = vand.u32 4294901760, %v1867_v29  ;;  %v5822_v23 = vand.u32 4294901760, %v6236_v2  ;;  %v6240_v37 = vld [vmem:[#allocation112_spill] sm:$0xff] }
  0xd1   :  { %3373 = vmatpush1.bf16.msra.mxu0 %v3372_v15  ;;  %v2990_v16 = vpack.c.bf16 %v576_v8, %v564_v38  ;;  %v5824_v18 = vand.u32 4294901760, %v6237_v9  ;;  %v570_v14 = vand.u32 4294901760, %v569_v53  ;;  %v1861_v20 = vsub.f32 %v6235_v36, %v5819_v7  ;;  %v6239_v38 = vld [vmem:[#allocation110_spill] sm:$0xff] }
  0xd2   :  { %v582_v55 = vand.u32 4294901760, %v581_v1  ;;  %v5825_v11 = vand.u32 4294901760, %v6238_v22  ;;  %v3374_v28 = vpack.c.bf16 %v1868_v49, %v1856_v42  ;;  %v1873_v15 = vsub.f32 %v6236_v2, %v5822_v23  ;;  %v6241_v23 = vld [vmem:[#allocation114_spill] sm:$0xff] }
  0xd3   :  { %2991 = vmatprep.subr.bf16.mxu1 %v2990_v16  ;;  %v587_v8 = vsub.f32 %v6237_v9, %v5824_v18  ;;  %v5828_v29 = vand.u32 4294901760, %v6239_v38  ;;  %v1862_v1 = vand.u32 4294901760, %v1861_v20  ;;  %v5831_v36 = vand.u32 4294901760, %v6240_v37 }
  0xd4   :  { %v2992_v53 = vpack.c.bf16 %v582_v55, %v570_v14  ;;  %v599_v7 = vsub.f32 %v6238_v22, %v5825_v11  ;;  %3375 = vmatprep.subr.bf16.mxu0 %v3374_v28  ;;  %v1874_v42 = vand.u32 4294901760, %v1873_v15  ;;  %v5832_v2 = vand.u32 4294901760, %v6241_v23  ;;  %v6242_v55 = vld [vmem:[#allocation115_spill] sm:$0xff]  ;;  %v6243_v11 = vld [vmem:[#allocation117_spill] sm:$0xff] }
  0xd5   :  { %v588_v16 = vand.u32 4294901760, %v587_v8  ;;  %v1879_v49 = vsub.f32 %v6239_v38, %v5828_v29  ;;  %v1891_v14 = vsub.f32 %v6240_v37, %v5831_v36  ;;  %v5835_v20 = vand.u32 4294901760, %v6242_v55  ;;  %v6244_v8 = vld [vmem:[#allocation118_spill] sm:$0xff] }
  0xd6   :  { %2993 = vmatpush1.bf16.msra.mxu1 %v2992_v53  ;;  %v600_v18 = vand.u32 4294901760, %v599_v7  ;;  %v5838_v22 = vand.u32 4294901760, %v6243_v11  ;;  %v3376_v9 = vpack.c.bf16 %v1874_v42, %v1862_v1  ;;  %v593_v15 = vsub.f32 %v6241_v23, %v5832_v2  ;;  %v6245_v42 = vld [vmem:[#allocation120_spill] sm:$0xff]  ;;  %v6246_v2 = vld [vmem:[#allocation121_spill] sm:$0xff] }
  0xd7   :  { %v1880_v28 = vand.u32 4294901760, %v1879_v49  ;;  %v5837_v29 = vand.u32 4294901760, %v6244_v8  ;;  %v1892_v32 = vand.u32 4294901760, %v1891_v14  ;;  %v605_v7 = vsub.f32 %v6242_v55, %v5835_v20 }
  0xd8   :  { %v2994_v38 = vpack.c.bf16 %v600_v18, %v588_v16  ;;  %v1885_v53 = vsub.f32 %v6243_v11, %v5838_v22  ;;  %3377 = vmatpush1.bf16.msra.mxu0 %v3376_v9  ;;  %v594_v36 = vand.u32 4294901760, %v593_v15  ;;  %v5844_v49 = vand.u32 4294901760, %v6245_v42 }
  0xd9   :  { %v1897_v1 = vsub.f32 %v6244_v8, %v5837_v29  ;;  %v5845_v37 = vand.u32 4294901760, %v6246_v2  ;;  %v3378_v18 = vpack.c.bf16 %v1892_v32, %v1880_v28  ;;  %v606_v16 = vand.u32 4294901760, %v605_v7  ;;  %v6248_v29 = vld [vmem:[#allocation124_spill] sm:$0xff]  ;;  %v6250_v7 = vld [vmem:[#allocation127_spill] sm:$0xff] }
  0xda   :  { %2995 = vmatprep.subr.bf16.mxu1 %v2994_v38  ;;  %v1886_v14 = vand.u32 4294901760, %v1885_v53  ;;  %v5846_v20 = vand.u32 4294901760, %v6247_v59  ;;  %v611_v9 = vsub.f32 %v6245_v42, %v5844_v49  ;;  %v5851_v22 = vand.u32 4294901760, %v6248_v29  ;;  %v6249_v38 = vld [vmem:[#allocation126_spill] sm:$0xff] }
  0xdb   :  { %v1898_v47 = vand.u32 4294901760, %v1897_v1  ;;  %v623_v15 = vsub.f32 %v6246_v2, %v5845_v37  ;;  %3379 = vmatprep.subr.bf16.mxu0 %v3378_v18  ;;  %v2996_v17 = vpack.c.bf16 %v606_v16, %v594_v36  ;;  %v5852_v28 = vand.u32 4294901760, %v6249_v38  ;;  %v6251_v16 = vld [vmem:[#allocation129_spill] sm:$0xff] }
  0xdc   :  { %v1903_v32 = vsub.f32 %v6247_v59, %v5846_v20  ;;  %v5856_v53 = vand.u32 4294901760, %v6250_v7  ;;  %v612_v57 = vand.u32 4294901760, %v611_v9  ;;  %v1915_v49 = vsub.f32 %v6248_v29, %v5851_v22  ;;  %v6252_v9 = vld [vmem:[#allocation130_spill] sm:$0xff] }
  0xdd   :  { %v3380_v1 = vpack.c.bf16 %v1898_v47, %v1886_v14  ;;  %v624_v30 = vand.u32 4294901760, %v623_v15  ;;  %2997 = vmatpush1.bf16.msra.mxu1 %v2996_v17  ;;  %v617_v36 = vsub.f32 %v6249_v38, %v5852_v28  ;;  %v5855_v20 = vand.u32 4294901760, %v6251_v16  ;;  %v6254_v28 = vld [vmem:[#allocation133_spill] sm:$0xff] }
  0xde   :  { %v1904_v37 = vand.u32 4294901760, %v1903_v32  ;;  %v629_v18 = vsub.f32 %v6250_v7, %v5856_v53  ;;  %v1916_v14 = vand.u32 4294901760, %v1915_v49  ;;  %v5858_v15 = vand.u32 4294901760, %v6252_v9  ;;  %v6256_v53 = vld [vmem:[#allocation136_spill] sm:$0xff] }
  0xdf   :  { %3381 = vmatpush1.bf16.msra.mxu0 %v3380_v1  ;;  %v2998_v47 = vpack.c.bf16 %v624_v30, %v612_v57  ;;  %v5860_v24 = vand.u32 4294901760, %v6253_v26  ;;  %v618_v22 = vand.u32 4294901760, %v617_v36  ;;  %v1909_v32 = vsub.f32 %v6251_v16, %v5855_v20  ;;  %v6255_v30 = vld [vmem:[#allocation134_spill] sm:$0xff] }
  0xe0   :  { %v630_v17 = vand.u32 4294901760, %v629_v18  ;;  %v5861_v38 = vand.u32 4294901760, %v6254_v28  ;;  %v3382_v29 = vpack.c.bf16 %v1916_v14, %v1904_v37  ;;  %v1921_v1 = vsub.f32 %v6252_v9, %v5858_v15  ;;  %v6257_v15 = vld [vmem:[#allocation138_spill] sm:$0xff] }
  0xe1   :  { %2999 = vmatprep.subr.bf16.mxu1 %v2998_v47  ;;  %v635_v57 = vsub.f32 %v6253_v26, %v5860_v24  ;;  %v5864_v49 = vand.u32 4294901760, %v6255_v30  ;;  %v1910_v18 = vand.u32 4294901760, %v1909_v32  ;;  %v5867_v16 = vand.u32 4294901760, %v6256_v53 }
  0xe2   :  { %v3000_v36 = vpack.c.bf16 %v630_v17, %v618_v22  ;;  %v647_v20 = vsub.f32 %v6254_v28, %v5861_v38  ;;  %3383 = vmatprep.subr.bf16.mxu0 %v3382_v29  ;;  %v1922_v37 = vand.u32 4294901760, %v1921_v1  ;;  %v5868_v9 = vand.u32 4294901760, %v6257_v15  ;;  %v6258_v17 = vld [vmem:[#allocation139_spill] sm:$0xff]  ;;  %v6259_v38 = vld [vmem:[#allocation141_spill] sm:$0xff] }
  0xe3   :  { %v636_v47 = vand.u32 4294901760, %v635_v57  ;;  %v1927_v14 = vsub.f32 %v6255_v30, %v5864_v49  ;;  %v1939_v22 = vsub.f32 %v6256_v53, %v5867_v16  ;;  %v5871_v32 = vand.u32 4294901760, %v6258_v17  ;;  %v6260_v57 = vld [vmem:[#allocation142_spill] sm:$0xff] }
  0xe4   :  { %3001 = vmatpush1.bf16.msra.mxu1 %v3000_v36  ;;  %v648_v24 = vand.u32 4294901760, %v647_v20  ;;  %v5874_v28 = vand.u32 4294901760, %v6259_v38  ;;  %v3384_v26 = vpack.c.bf16 %v1922_v37, %v1910_v18  ;;  %v641_v1 = vsub.f32 %v6257_v15, %v5868_v9  ;;  %v6261_v37 = vld [vmem:[#allocation144_spill] sm:$0xff]  ;;  %v6262_v9 = vld [vmem:[#allocation145_spill] sm:$0xff]  ;;  %v6263_v53 = vld [vmem:[#allocation146_spill] sm:$0xff] }
  0xe5   :  { %v1928_v29 = vand.u32 4294901760, %v1927_v14  ;;  %v5873_v49 = vand.u32 4294901760, %v6260_v57  ;;  %v1940_v7 = vand.u32 4294901760, %v1939_v22  ;;  %v653_v20 = vsub.f32 %v6258_v17, %v5871_v32 }
  0xe6   :  { %v3002_v30 = vpack.c.bf16 %v648_v24, %v636_v47  ;;  %v1933_v36 = vsub.f32 %v6259_v38, %v5874_v28  ;;  %3385 = vmatpush1.bf16.msra.mxu0 %v3384_v26  ;;  %v642_v16 = vand.u32 4294901760, %v641_v1  ;;  %v5878_v14 = vand.u32 4294901760, %v6261_v37 }
  0xe7   :  { %v1945_v18 = vsub.f32 %v6260_v57, %v5873_v49  ;;  %v5879_v15 = vand.u32 4294901760, %v6262_v9  ;;  %v3386_v24 = vpack.c.bf16 %v1940_v7, %v1928_v29  ;;  %v654_v47 = vand.u32 4294901760, %v653_v20  ;;  %v6264_v49 = vld [vmem:[#allocation148_spill] sm:$0xff]  ;;  %v6266_v20 = vld [vmem:[#allocation151_spill] sm:$0xff] }
  0xe8   :  { %3003 = vmatprep.subr.bf16.mxu1 %v3002_v30  ;;  %v1934_v22 = vand.u32 4294901760, %v1933_v36  ;;  %v5880_v32 = vand.u32 4294901760, %v6263_v53  ;;  %v659_v26 = vsub.f32 %v6261_v37, %v5878_v14  ;;  %v5883_v28 = vand.u32 4294901760, %v6264_v49  ;;  %v6265_v30 = vld [vmem:[#allocation150_spill] sm:$0xff] }
  0xe9   :  { %v1946_v17 = vand.u32 4294901760, %v1945_v18  ;;  %v671_v1 = vsub.f32 %v6262_v9, %v5879_v15  ;;  %3387 = vmatprep.subr.bf16.mxu0 %v3386_v24  ;;  %v3004_v57 = vpack.c.bf16 %v654_v47, %v642_v16  ;;  %v5884_v29 = vand.u32 4294901760, %v6265_v30  ;;  %v6267_v47 = vld [vmem:[#allocation153_spill] sm:$0xff] }
  0xea   :  { %v1951_v7 = vsub.f32 %v6263_v53, %v5880_v32  ;;  %v5888_v36 = vand.u32 4294901760, %v6266_v20  ;;  %v660_v38 = vand.u32 4294901760, %v659_v26  ;;  %v1963_v14 = vsub.f32 %v6264_v49, %v5883_v28  ;;  %v6268_v26 = vld [vmem:[#allocation154_spill] sm:$0xff]  ;;  %v6269_v53 = vld [vmem:[#allocation156_spill] sm:$0xff] }
  0xeb   :  { %v3388_v18 = vpack.c.bf16 %v1946_v17, %v1934_v22  ;;  %v672_v59 = vand.u32 4294901760, %v671_v1  ;;  %3005 = vmatpush1.bf16.msra.mxu1 %v3004_v57  ;;  %v665_v16 = vsub.f32 %v6265_v30, %v5884_v29  ;;  %v5887_v32 = vand.u32 4294901760, %v6267_v47  ;;  %v6270_v29 = vld [vmem:[#allocation157_spill] sm:$0xff] }
  0xec   :  { %v1952_v15 = vand.u32 4294901760, %v1951_v7  ;;  %v677_v24 = vsub.f32 %v6266_v20, %v5888_v36  ;;  %v1964_v22 = vand.u32 4294901760, %v1963_v14  ;;  %v5890_v1 = vand.u32 4294901760, %v6268_v26  ;;  %v6272_v36 = vld [vmem:[#allocation160_spill] sm:$0xff] }
  0xed   :  { %3389 = vmatpush1.bf16.msra.mxu0 %v3388_v18  ;;  %v3006_v17 = vpack.c.bf16 %v672_v59, %v660_v38  ;;  %v5892_v9 = vand.u32 4294901760, %v6269_v53  ;;  %v666_v28 = vand.u32 4294901760, %v665_v16  ;;  %v1957_v7 = vsub.f32 %v6267_v47, %v5887_v32  ;;  %v6271_v38 = vld [vmem:[#allocation158_spill] sm:$0xff] }
  0xee   :  { %v678_v57 = vand.u32 4294901760, %v677_v24  ;;  %v5893_v30 = vand.u32 4294901760, %v6270_v29  ;;  %v3390_v49 = vpack.c.bf16 %v1964_v22, %v1952_v15  ;;  %v1969_v18 = vsub.f32 %v6268_v26, %v5890_v1  ;;  %v6273_v1 = vld [vmem:[#allocation162_spill] sm:$0xff] }
  0xef   :  { %3007 = vmatprep.subr.bf16.mxu1 %v3006_v17  ;;  %v683_v59 = vsub.f32 %v6269_v53, %v5892_v9  ;;  %v5896_v14 = vand.u32 4294901760, %v6271_v38  ;;  %v1958_v24 = vand.u32 4294901760, %v1957_v7  ;;  %v5899_v47 = vand.u32 4294901760, %v6272_v36 }
  0xf0   :  { %v3008_v16 = vpack.c.bf16 %v678_v57, %v666_v28  ;;  %v695_v32 = vsub.f32 %v6270_v29, %v5893_v30  ;;  %3391 = vmatprep.subr.bf16.mxu0 %v3390_v49  ;;  %v1970_v15 = vand.u32 4294901760, %v1969_v18  ;;  %v5900_v26 = vand.u32 4294901760, %v6273_v1  ;;  %v6274_v57 = vld [vmem:[#allocation163_spill] sm:$0xff]  ;;  %v6275_v30 = vld [vmem:[#allocation165_spill] sm:$0xff] }
  0xf1   :  { %v684_v17 = vand.u32 4294901760, %v683_v59  ;;  %v1975_v22 = vsub.f32 %v6271_v38, %v5896_v14  ;;  %v1987_v28 = vsub.f32 %v6272_v36, %v5899_v47  ;;  %v5903_v7 = vand.u32 4294901760, %v6274_v57  ;;  %v6276_v59 = vld [vmem:[#allocation166_spill] sm:$0xff] }
  0xf2   :  { %3009 = vmatpush1.bf16.msra.mxu1 %v3008_v16  ;;  %v696_v9 = vand.u32 4294901760, %v695_v32  ;;  %v5906_v29 = vand.u32 4294901760, %v6275_v30  ;;  %v3392_v53 = vpack.c.bf16 %v1970_v15, %v1958_v24  ;;  %v689_v18 = vsub.f32 %v6273_v1, %v5900_v26  ;;  %v6277_v15 = vld [vmem:[#allocation168_spill] sm:$0xff]  ;;  %v6278_v26 = vld [vmem:[#allocation169_spill] sm:$0xff]  ;;  %v6279_v36 = vld [vmem:[#allocation170_spill] sm:$0xff] }
  0xf3   :  { %v1976_v49 = vand.u32 4294901760, %v1975_v22  ;;  %v5905_v14 = vand.u32 4294901760, %v6276_v59  ;;  %v1988_v20 = vand.u32 4294901760, %v1987_v28  ;;  %v701_v32 = vsub.f32 %v6274_v57, %v5903_v7 }
  0xf4   :  { %v3010_v38 = vpack.c.bf16 %v696_v9, %v684_v17  ;;  %v1981_v16 = vsub.f32 %v6275_v30, %v5906_v29  ;;  %3393 = vmatpush1.bf16.msra.mxu0 %v3392_v53  ;;  %v690_v47 = vand.u32 4294901760, %v689_v18  ;;  %v5909_v22 = vand.u32 4294901760, %v6277_v15 }
  0xf5   :  { %v1993_v24 = vsub.f32 %v6276_v59, %v5905_v14  ;;  %v5910_v1 = vand.u32 4294901760, %v6278_v26  ;;  %v3394_v9 = vpack.c.bf16 %v1988_v20, %v1976_v49  ;;  %v702_v17 = vand.u32 4294901760, %v701_v32  ;;  %v6281_v32 = vld [vmem:[#allocation175_spill] sm:$0xff] }
  0xf6   :  { %3011 = vmatprep.subr.bf16.mxu1 %v3010_v38  ;;  %v1982_v28 = vand.u32 4294901760, %v1981_v16  ;;  %v5911_v7 = vand.u32 4294901760, %v6279_v36  ;;  %v707_v53 = vsub.f32 %v6277_v15, %v5909_v22  ;;  %v5914_v14 = vand.u32 4294901760, %v4201_v54  ;;  %v6280_v38 = vld [vmem:[#allocation174_spill] sm:$0xff] }
  0xf7   :  { %v1994_v57 = vand.u32 4294901760, %v1993_v24  ;;  %v719_v18 = vsub.f32 %v6278_v26, %v5910_v1  ;;  %3395 = vmatprep.subr.bf16.mxu0 %v3394_v9  ;;  %v3012_v29 = vpack.c.bf16 %v702_v17, %v690_v47  ;;  %v5915_v49 = vand.u32 4294901760, %v6280_v38  ;;  %v6282_v17 = vld [vmem:[#allocation177_spill] sm:$0xff]  ;;  %v6352_v15 = vld [vmem:[#allocation66_spill] sm:$0xff] }
  0xf8   :  { %v1999_v20 = vsub.f32 %v6279_v36, %v5911_v7  ;;  %v5920_v16 = vand.u32 4294901760, %v6281_v32  ;;  %v708_v59 = vand.u32 4294901760, %v707_v53  ;;  %v2011_v22 = vsub.f32 %v4201_v54, %v5914_v14  ;;  %v6283_v53 = vld [vmem:[#allocation178_spill] sm:$0xff]  ;;  %v6284_v36 = vld [vmem:[#allocation180_spill] sm:$0xff] }
  0xf9   :  { %v3396_v24 = vpack.c.bf16 %v1994_v57, %v1982_v28  ;;  %v720_v30 = vand.u32 4294901760, %v719_v18  ;;  %3013 = vmatpush1.bf16.msra.mxu1 %v3012_v29  ;;  %v713_v47 = vsub.f32 %v6280_v38, %v5915_v49  ;;  %v5919_v7 = vand.u32 4294901760, %v6282_v17  ;;  %v6285_v49 = vld [vmem:[#allocation181_spill] sm:$0xff] }
  0xfa   :  { %v2000_v1 = vand.u32 4294901760, %v1999_v20  ;;  %v725_v9 = vsub.f32 %v6281_v32, %v5920_v16  ;;  %v2012_v28 = vand.u32 4294901760, %v2011_v22  ;;  %v5921_v18 = vand.u32 4294901760, %v6283_v53 }
  0xfb   :  { %3397 = vmatpush1.bf16.msra.mxu0 %v3396_v24  ;;  %v3014_v57 = vpack.c.bf16 %v720_v30, %v708_v59  ;;  %v5922_v26 = vand.u32 4294901760, %v6284_v36  ;;  %v714_v14 = vand.u32 4294901760, %v713_v47  ;;  %v2005_v20 = vsub.f32 %v6282_v17, %v5919_v7  ;;  %v6286_v59 = vld [vmem:[#allocation182_spill] sm:$0xff] }
  0xfc   :  { %v726_v29 = vand.u32 4294901760, %v725_v9  ;;  %v5923_v38 = vand.u32 4294901760, %v6285_v49  ;;  %v3398_v54 = vpack.c.bf16 %v2012_v28, %v2000_v1  ;;  %v2017_v24 = vsub.f32 %v6283_v53, %v5921_v18  ;;  %v6347_v17 = vld [vmem:[#allocation206_spill] sm:$0xff] }
  0xfd   :  { %3015 = vmatprep.subr.bf16.mxu1 %v3014_v57  ;;  %v731_v30 = vsub.f32 %v6284_v36, %v5922_v26  ;;  %v5925_v22 = vand.u32 4294901760, %v6286_v59  ;;  %v2006_v9 = vand.u32 4294901760, %v2005_v20  ;;  %v5928_v16 = vand.u32 4294901760, %v4229_v60  ;;  %v6287_v20 = vld [vmem:[#allocation189_spill] sm:$0xff] }
  0xfe   :  { %v3016_v47 = vpack.c.bf16 %v726_v29, %v714_v14  ;;  %v743_v7 = vsub.f32 %v6285_v49, %v5923_v38  ;;  %3399 = vmatprep.subr.bf16.mxu0 %v3398_v54  ;;  %v2018_v1 = vand.u32 4294901760, %v2017_v24  ;;  %v5929_v18 = vand.u32 4294901760, %v4233_v21 }
  0xff   :  { %v732_v57 = vand.u32 4294901760, %v731_v30  ;;  %v2023_v28 = vsub.f32 %v6286_v59, %v5925_v22  ;;  %v2035_v14 = vsub.f32 %v4229_v60, %v5928_v16  ;;  %v5934_v29 = vand.u32 4294901760, %v4235_v45  ;;  %v6288_v30 = vld [vmem:[#allocation190_spill] sm:$0xff] }
 0x100   :  { %3017 = vmatpush1.bf16.msra.mxu1 %v3016_v47  ;;  %v744_v26 = vand.u32 4294901760, %v743_v7  ;;  %v5938_v38 = vand.u32 4294901760, %v6287_v20  ;;  %v3400_v49 = vpack.c.bf16 %v2018_v1, %v2006_v9  ;;  %v737_v24 = vsub.f32 %v4233_v21, %v5929_v18  ;;  %v6289_v1 = vld [vmem:[#allocation192_spill] sm:$0xff]  ;;  %v6290_v18 = vld [vmem:[#allocation193_spill] sm:$0xff]  ;;  %v6291_v60 = vld [vmem:[#allocation194_spill] sm:$0xff] }
 0x101   :  { %v2024_v54 = vand.u32 4294901760, %v2023_v28  ;;  %v5937_v22 = vand.u32 4294901760, %v6288_v30  ;;  %v2036_v36 = vand.u32 4294901760, %v2035_v14  ;;  %v749_v7 = vsub.f32 %v4235_v45, %v5934_v29 }
 0x102   :  { %v3018_v59 = vpack.c.bf16 %v744_v26, %v732_v57  ;;  %v2029_v47 = vsub.f32 %v6287_v20, %v5938_v38  ;;  %3401 = vmatpush1.bf16.msra.mxu0 %v3400_v49  ;;  %v738_v16 = vand.u32 4294901760, %v737_v24  ;;  %v5942_v28 = vand.u32 4294901760, %v6289_v1 }
 0x103   :  { %v2041_v9 = vsub.f32 %v6288_v30, %v5937_v22  ;;  %v5943_v21 = vand.u32 4294901760, %v6290_v18  ;;  %v3402_v26 = vpack.c.bf16 %v2036_v36, %v2024_v54  ;;  %v750_v57 = vand.u32 4294901760, %v749_v7  ;;  %v6292_v22 = vld [vmem:[#allocation196_spill] sm:$0xff]  ;;  %v6294_v7 = vld [vmem:[#allocation199_spill] sm:$0xff] }
 0x104   :  { %3019 = vmatprep.subr.bf16.mxu1 %v3018_v59  ;;  %v2030_v14 = vand.u32 4294901760, %v2029_v47  ;;  %v5944_v29 = vand.u32 4294901760, %v6291_v60  ;;  %v755_v49 = vsub.f32 %v6289_v1, %v5942_v28  ;;  %v5949_v38 = vand.u32 4294901760, %v6292_v22  ;;  %v6293_v59 = vld [vmem:[#allocation198_spill] sm:$0xff]  ;;  %v6353_v1 = vld [vmem:[#allocation67_spill] sm:$0xff] }
 0x105   :  { %v2042_v45 = vand.u32 4294901760, %v2041_v9  ;;  %v767_v24 = vsub.f32 %v6290_v18, %v5943_v21  ;;  %3403 = vmatprep.subr.bf16.mxu0 %v3402_v26  ;;  %v3020_v30 = vpack.c.bf16 %v750_v57, %v738_v16  ;;  %v5947_v54 = vand.u32 4294901760, %v6293_v59  ;;  %v6295_v57 = vld [vmem:[#allocation201_spill] sm:$0xff] }
 0x106   :  { %v2047_v36 = vsub.f32 %v6291_v60, %v5944_v29  ;;  %v5948_v47 = vand.u32 4294901760, %v6294_v7  ;;  %v756_v20 = vand.u32 4294901760, %v755_v49  ;;  %v2059_v28 = vsub.f32 %v6292_v22, %v5949_v38  ;;  %v6296_v49 = vld [vmem:[#allocation202_spill] sm:$0xff]  ;;  %v6298_v38 = vld [vmem:[#allocation13_spill] sm:$0xff] }
 0x107   :  { %v3404_v9 = vpack.c.bf16 %v2042_v45, %v2030_v14  ;;  %v768_v53 = vand.u32 4294901760, %v767_v24  ;;  %3021 = vmatpush1.bf16.msra.mxu1 %v3020_v30  ;;  %v761_v16 = vsub.f32 %v6293_v59, %v5947_v54  ;;  %v5951_v29 = vand.u32 4294901760, %v6295_v57 }
 0x108   :  { %v2048_v21 = vand.u32 4294901760, %v2047_v36  ;;  %v773_v26 = vsub.f32 %v6294_v7, %v5948_v47  ;;  %v2060_v14 = vand.u32 4294901760, %v2059_v28  ;;  %v5952_v24 = vand.u32 4294901760, %v6296_v49  ;;  %v6297_v47 = vld [vmem:[#allocation12_spill] sm:$0xff]  ;;  %v6299_v28 = vld [vmem:[#allocation14_spill] sm:$0xff] }
 0x109   :  { %3405 = vmatpush1.bf16.msra.mxu0 %v3404_v9  ;;  %v3022_v45 = vpack.c.bf16 %v768_v53, %v756_v20  ;;  %v762_v60 = vand.u32 4294901760, %v761_v16  ;;  %v2053_v30 = vsub.f32 %v6295_v57, %v5951_v29  ;;  %v3026_v7 = vpack.c.bf16 %v6298_v38, %v6297_v47  ;;  %v6300_v16 = vld [vmem:[#allocation16_spill] sm:$0xff]  ;;  %v6335_v38 = vld [vmem:[#allocation178_spill] sm:$0xff] }
 0x10a   :  { %v774_v18 = vand.u32 4294901760, %v773_v26  ;;  %v3406_v36 = vpack.c.bf16 %v2060_v14, %v2048_v21  ;;  %v2065_v54 = vsub.f32 %v6296_v49, %v5952_v24  ;;  %v3410_v26 = vpack.c.bf16 %v6300_v16, %v6299_v28  ;;  %v6312_v24 = vld [vmem:[#allocation139_spill] sm:$0xff]  ;;  %v6333_v16 = vld [vmem:[#allocation172_spill] sm:$0xff]  ;;  %v6357_v57 = vld [vmem:[#allocation70_spill] sm:$0xff] }
 0x10b   :  { %3023 = vmatprep.subr.bf16.mxu1 %v3022_v45  ;;  %v2054_v53 = vand.u32 4294901760, %v2053_v30  ;;  %v3028_v29 = vpack.c.bf16 %v3843_v27, %v3840_v25  ;;  %v3030_v21 = vpack.c.bf16 %v3857_v46, %v3853_v41  ;;  %v3034_v14 = vpack.c.bf16 %v3885_v10, %v3882_v6  ;;  %v6319_v10 = vld [vmem:[#allocation151_spill] sm:$0xff]  ;;  %v6336_v47 = vld [vmem:[#allocation180_spill] sm:$0xff]  ;;  %v6337_v46 = vld [vmem:[#allocation181_spill] sm:$0xff] }
 0x10c   :  { %v3024_v9 = vpack.c.bf16 %v774_v18, %v762_v60  ;;  %3407 = vmatprep.subr.bf16.mxu0 %v3406_v36  ;;  %v2066_v20 = vand.u32 4294901760, %v2065_v54  ;;  %v3412_v60 = vpack.c.bf16 %v3851_v40, %v3849_v39  ;;  %v3414_v18 = vpack.c.bf16 %v3864_v50, %v3861_v48  ;;  %v6324_v48 = vld [vmem:[#allocation204_spill] sm:$0xff]  ;;  %v6338_v39 = vld [vmem:[#allocation182_spill] sm:$0xff]  ;;  %v6341_v25 = vld [vmem:[#allocation187_spill] sm:$0xff] }
 0x10d   :  { %v3032_v54 = vpack.c.bf16 %v3872_v61, %v3866_v52  ;;  %v3418_v30 = vpack.c.bf16 %v3891_v13, %v3889_v12  ;;  %v3036_v36 = vpack.c.bf16 %v3900_v34, %v3898_v33  ;;  %v6311_v34 = vld [vmem:[#allocation138_spill] sm:$0xff]  ;;  %v6313_v13 = vld [vmem:[#allocation141_spill] sm:$0xff]  ;;  %v6322_v52 = vld [vmem:[#allocation156_spill] sm:$0xff]  ;;  %v3044_v28 = vpack.c.bf16 %v6353_v1, %v6352_v15 }
 0x10e   :  { %3025 = vmatpush1.bf16.msra.mxu1 %v3024_v9  ;;  %v3408_v45 = vpack.c.bf16 %v2066_v20, %v2054_v53  ;;  %v3038_v9 = vpack.c.bf16 %v3914_v56, %v3910_v51  ;;  %v3422_v53 = vpack.c.bf16 %v3921_v63, %v3918_v58  ;;  %v3040_v20 = vpack.c.bf16 %v3928_v35, %v3924_v19  ;;  %v6303_v63 = vld [vmem:[#allocation126_spill] sm:$0xff]  ;;  %v6304_v35 = vld [vmem:[#allocation127_spill] sm:$0xff]  ;;  %v6305_v58 = vld [vmem:[#allocation129_spill] sm:$0xff] }
 0x10f   :  { %3027 = vmatprep.subr.bf16.mxu1 %v3026_v7  ;;  %v3416_v7 = vpack.c.bf16 %v3878_v4, %v3874_v62  ;;  %v6309_v56 = vld [vmem:[#allocation134_spill] sm:$0xff]  ;;  %v6317_v4 = vld [vmem:[#allocation148_spill] sm:$0xff]  ;;  %v6323_v51 = vld [vmem:[#allocation157_spill] sm:$0xff] }
 0x110   :  { %3409 = vmatpush1.bf16.msra.mxu0 %v3408_v45  ;;  %v6316_v19 = vld [vmem:[#allocation146_spill] sm:$0xff]  ;;  %v6320_v45 = vld [vmem:[#allocation153_spill] sm:$0xff]  ;;  %v6328_v12 = vld [vmem:[#allocation163_spill] sm:$0xff] }
 0x111   :  { %779 = vmatmul.mubr.f32.vlgmr.msra.gmra.mrb[0].mxu1 %v4347_v31  ;;  %3411 = vmatprep.subr.bf16.mxu0 %v3410_v26  ;;  %v3042_v26 = vpack.c.bf16 %v3940_v5, %v3938_v3  ;;  %v6302_v31 = vld [vmem:[#allocation124_spill] sm:$0xff]  ;;  %v6306_v5 = vld [vmem:[#allocation130_spill] sm:$0xff]  ;;  %v6344_v50 = vld [vmem:[#allocation193_spill] sm:$0xff] }
 0x112   :  { %3029 = vmatpush1.bf16.msra.mxu1 %v3028_v29  ;;  %v3420_v29 = vpack.c.bf16 %v3906_v44, %v3904_v43  ;;  %v6307_v3 = vld [vmem:[#allocation132_spill] sm:$0xff]  ;;  %v6308_v43 = vld [vmem:[#allocation133_spill] sm:$0xff]  ;;  %v6314_v44 = vld [vmem:[#allocation142_spill] sm:$0xff]  ;;  %979 = vmatprep.mubr.f32.mxu1 %v6324_v48 }
 0x113   :  { %3031 = vmatprep.subr.bf16.mxu1 %v3030_v21  ;;  %2071 = vmatmul.mubr.f32.vlgmr.msra.gmra.mrb[0].mxu0 %v4396_v0  ;;  %v6301_v0 = vld [vmem:[#allocation122_spill] sm:$0xff]  ;;  %v6310_v21 = vld [vmem:[#allocation136_spill] sm:$0xff]  ;;  %v6348_v41 = vld [vmem:[#allocation57_spill] sm:$0xff] }
 0x114   :  { %3413 = vmatpush1.bf16.msra.mxu0 %v3412_v60  ;;  %v6318_v60 = vld [vmem:[#allocation150_spill] sm:$0xff]  ;;  %v6339_v27 = vld [vmem:[#allocation184_spill] sm:$0xff]  ;;  %2271 = vmatprep.mubr.f32.mxu0 %v6347_v17  ;;  %v6355_v40 = vld [vmem:[#allocation73_spill] sm:$0xff] }
 0x115   :  { %3415 = vmatprep.subr.bf16.mxu0 %v3414_v18  ;;  %v6325_v33 = vld [vmem:[#allocation158_spill] sm:$0xff]  ;;  %v6326_v18 = vld [vmem:[#allocation160_spill] sm:$0xff]  ;;  %v6356_v48 = vld [vmem:[#allocation69_spill] sm:$0xff] }
 0x116   :  { %3033 = vmatpush1.bf16.msra.mxu1 %v3032_v54  ;;  %v6315_v54 = vld [vmem:[#allocation145_spill] sm:$0xff]  ;;  %v6350_v6 = vld [vmem:[#allocation62_spill] sm:$0xff]  ;;  %v3428_v17 = vpack.c.bf16 %v6357_v57, %v6356_v48  ;;  %v6367_v57 = vld [vmem:[#allocation88_spill] sm:$0xff] }
 0x117   :  { %3035 = vmatprep.subr.bf16.mxu1 %v3034_v14  ;;  %v6321_v14 = vld [vmem:[#allocation154_spill] sm:$0xff]  ;;  %v6369_v48 = vld [vmem:[#allocation91_spill] sm:$0xff] }
 0x118   :  { %3417 = vmatpush1.bf16.msra.mxu0 %v3416_v7  ;;  %v6354_v7 = vld [vmem:[#allocation72_spill] sm:$0xff]  ;;  %v6365_v15 = vld [vmem:[#allocation82_spill] sm:$0xff] }
 0x119   :  { %3419 = vmatprep.subr.bf16.mxu0 %v3418_v30  ;;  %v6349_v30 = vld [vmem:[#allocation58_spill] sm:$0xff]  ;;  %v3046_v59 = vpack.c.bf16 %v6355_v40, %v6354_v7 }
 0x11a   :  { %3037 = vmatpush1.bf16.msra.mxu1 %v3036_v36  ;;  %v3424_v62 = vpack.c.bf16 %v6349_v30, %v6348_v41  ;;  %v6351_v36 = vld [vmem:[#allocation64_spill] sm:$0xff]  ;;  %v6361_v41 = vld [vmem:[#allocation79_spill] sm:$0xff] }
 0x11b   :  { %3039 = vmatprep.subr.bf16.mxu1 %v3038_v9  ;;  %v6346_v9 = vld [vmem:[#allocation199_spill] sm:$0xff]  ;;  %v3426_v61 = vpack.c.bf16 %v6351_v36, %v6350_v6  ;;  %v6359_v30 = vld [vmem:[#allocation76_spill] sm:$0xff]  ;;  %v6363_v6 = vld [vmem:[#allocation85_spill] sm:$0xff] }
 0x11c   :  { %3421 = vmatpush1.bf16.msra.mxu0 %v3420_v29  ;;  %v6358_v29 = vld [vmem:[#allocation74_spill] sm:$0xff]  ;;  %v6362_v36 = vld [vmem:[#allocation84_spill] sm:$0xff] }
 0x11d   :  { %3423 = vmatprep.subr.bf16.mxu0 %v3422_v53  ;;  %v3430_v53 = vpack.c.bf16 %v6359_v30, %v6358_v29  ;;  %v3050_v1 = vpack.c.bf16 %v6363_v6, %v6362_v36  ;;  %v6370_v30 = vld [vmem:[#allocation96_spill] sm:$0xff]  ;;  %v6371_v29 = vld [vmem:[#allocation97_spill] sm:$0xff] }
 0x11e   :  { %3041 = vmatpush1.bf16.msra.mxu1 %v3040_v20  ;;  %v6360_v20 = vld [vmem:[#allocation78_spill] sm:$0xff] }
 0x11f   :  { %3043 = vmatprep.subr.bf16.mxu1 %v3042_v26  ;;  %v3048_v49 = vpack.c.bf16 %v6361_v41, %v6360_v20  ;;  %v6364_v26 = vld [vmem:[#allocation81_spill] sm:$0xff]  ;;  %v3054_v41 = vpack.c.bf16 %v6371_v29, %v6370_v30  ;;  %v6373_v20 = vld [vmem:[#allocation94_spill] sm:$0xff] }
 0x120   :  { %3425 = vmatpush1.bf16.msra.mxu0 %v3424_v62  ;;  %v3432_v40 = vpack.c.bf16 %v6365_v15, %v6364_v26  ;;  %v6366_v62 = vld [vmem:[#allocation86_spill] sm:$0xff]  ;;  %v6375_v15 = vld [vmem:[#allocation100_spill] sm:$0xff]  ;;  %v6377_v26 = vld [vmem:[#allocation103_spill] sm:$0xff] }
 0x121   :  { %3427 = vmatprep.subr.bf16.mxu0 %v3426_v61  ;;  %v3434_v61 = vpack.c.bf16 %v6367_v57, %v6366_v62  ;;  %v6378_v57 = vld [vmem:[#allocation108_spill] sm:$0xff]  ;;  %v6379_v62 = vld [vmem:[#allocation109_spill] sm:$0xff] }
 0x122   :  { %3045 = vmatpush1.bf16.msra.mxu1 %v3044_v28  ;;  %v6368_v28 = vld [vmem:[#allocation90_spill] sm:$0xff] }
 0x123   :  { %3047 = vmatprep.subr.bf16.mxu1 %v3046_v59  ;;  %v3052_v7 = vpack.c.bf16 %v6369_v48, %v6368_v28  ;;  %v6372_v59 = vld [vmem:[#allocation93_spill] sm:$0xff]  ;;  %v3058_v48 = vpack.c.bf16 %v6379_v62, %v6378_v57  ;;  %v6381_v28 = vld [vmem:[#allocation106_spill] sm:$0xff] }
 0x124   :  { %3429 = vmatpush1.bf16.msra.mxu0 %v3428_v17  ;;  %v3436_v6 = vpack.c.bf16 %v6373_v20, %v6372_v59  ;;  %v6374_v17 = vld [vmem:[#allocation98_spill] sm:$0xff]  ;;  %v6383_v20 = vld [vmem:[#allocation112_spill] sm:$0xff] }
 0x125   :  { %3431 = vmatprep.subr.bf16.mxu0 %v3430_v53  ;;  %v3438_v53 = vpack.c.bf16 %v6375_v15, %v6374_v17 }
 0x126   :  { %3049 = vmatpush1.bf16.msra.mxu1 %v3048_v49  ;;  %v6376_v49 = vld [vmem:[#allocation102_spill] sm:$0xff] }
 0x127   :  { %3051 = vmatprep.subr.bf16.mxu1 %v3050_v1  ;;  %v3056_v36 = vpack.c.bf16 %v6377_v26, %v6376_v49  ;;  %v6380_v1 = vld [vmem:[#allocation105_spill] sm:$0xff] }
 0x128   :  { %3433 = vmatpush1.bf16.msra.mxu0 %v3432_v40  ;;  %v3440_v29 = vpack.c.bf16 %v6381_v28, %v6380_v1  ;;  %v6382_v40 = vld [vmem:[#allocation110_spill] sm:$0xff] }
 0x129   :  { %3435 = vmatprep.subr.bf16.mxu0 %v3434_v61  ;;  %v3442_v61 = vpack.c.bf16 %v6383_v20, %v6382_v40 }
 0x12a   :  { %3053 = vmatpush1.bf16.msra.mxu1 %v3052_v7  ;;  %v6384_v7 = vpack.c.bf16 %v6242_v55, %v6241_v23 }
 0x12b   :  { %3055 = vmatprep.subr.bf16.mxu1 %v3054_v41  ;;  %v6385_v41 = vpack.c.bf16 %v6246_v2, %v6245_v42 }
 0x12c   :  { %3437 = vmatpush1.bf16.msra.mxu0 %v3436_v6  ;;  %v6386_v6 = vpack.c.bf16 %v6244_v8, %v6243_v11 }
 0x12d   :  { %3439 = vmatprep.subr.bf16.mxu0 %v3438_v53  ;;  %v6390_v53 = vpack.c.bf16 %v6306_v5, %v6305_v58 }
 0x12e   :  { %3057 = vmatpush1.bf16.msra.mxu1 %v3056_v36  ;;  %v6387_v36 = vpack.c.bf16 %v6302_v31, %v6301_v0 }
 0x12f   :  { %3059 = vmatprep.subr.bf16.mxu1 %v3058_v48  ;;  %v6388_v48 = vpack.c.bf16 %v6304_v35, %v6303_v63 }
 0x130   :  { %3441 = vmatpush1.bf16.msra.mxu0 %v3440_v29  ;;  %v6389_v29 = vpack.c.bf16 %v6308_v43, %v6307_v3 }
 0x131   :  { %3443 = vmatprep.subr.bf16.mxu0 %v3442_v61  ;;  %v6391_v61 = vpack.c.bf16 %v6310_v21, %v6309_v56 }
 0x132   :  { %3061 = vmatpush1.bf16.msra.mxu1 %v6384_v7  ;;  %v6392_v7 = vpack.c.bf16 %v6312_v24, %v6311_v34 }
 0x133   :  { %3063 = vmatprep.subr.bf16.mxu1 %v6385_v41  ;;  %v6393_v41 = vpack.c.bf16 %v6315_v54, %v6261_v37 }
 0x134   :  { %3445 = vmatpush1.bf16.msra.mxu0 %v6386_v6  ;;  %v6394_v6 = vpack.c.bf16 %v6314_v44, %v6313_v13 }
 0x135   :  { %3447 = vmatprep.subr.bf16.mxu0 %v6387_v36  ;;  %v6395_v36 = vpack.c.bf16 %v6317_v4, %v6316_v19 }
 0x136   :  { %3065 = vmatpush1.bf16.msra.mxu1 %v6388_v48  ;;  %v6396_v48 = vpack.c.bf16 %v6319_v10, %v6318_v60  ;;  %v6406_v60 = vld [vmem:[#allocation165_spill] sm:$0xff] }
 0x137   :  { %3067 = vmatprep.subr.bf16.mxu1 %v6389_v29  ;;  %v6397_v29 = vpack.c.bf16 %v6323_v51, %v6322_v52 }
 0x138   :  { %3449 = vmatpush1.bf16.msra.mxu0 %v6390_v53  ;;  %v6398_v53 = vpack.c.bf16 %v6321_v14, %v6320_v45 }
 0x139   :  { %3451 = vmatprep.subr.bf16.mxu0 %v6391_v61  ;;  %v6399_v61 = vpack.c.bf16 %v6326_v18, %v6325_v33 }
 0x13a   :  { %3069 = vmatpush1.bf16.msra.mxu1 %v6392_v7  ;;  %v6400_v7 = vld [vmem:[#allocation162_spill] sm:$0xff] }
 0x13b   :  { %3071 = vmatprep.subr.bf16.mxu1 %v6393_v41  ;;  %v6401_v41 = vpack.c.bf16 %v6328_v12, %v6400_v7 }
 0x13c   :  { %3453 = vmatpush1.bf16.msra.mxu0 %v6394_v6  ;;  %v6402_v6 = vld [vmem:[#allocation169_spill] sm:$0xff] }
 0x13d   :  { %3455 = vmatprep.subr.bf16.mxu0 %v6395_v36  ;;  %v6403_v36 = vld [vmem:[#allocation168_spill] sm:$0xff] }
 0x13e   :  { %3073 = vmatpush1.bf16.msra.mxu1 %v6396_v48  ;;  %v6404_v10 = vpack.c.bf16 %v6402_v6, %v6403_v36  ;;  %v6405_v48 = vld [vmem:[#allocation166_spill] sm:$0xff] }
 0x13f   :  { %3075 = vmatprep.subr.bf16.mxu1 %v6397_v29  ;;  %v6407_v51 = vpack.c.bf16 %v6405_v48, %v6406_v60  ;;  %v6408_v29 = vld [vmem:[#allocation170_spill] sm:$0xff]  ;;  %v6515_v48 = vld [vmem:[#allocation200_spill] sm:$0xff]  ;;  %v6531_v60 = vld [vmem:[#allocation37_spill] sm:$0xff] }
 0x140   :  { %3457 = vmatpush1.bf16.msra.mxu0 %v6398_v53  ;;  %v6409_v14 = vpack.c.bf16 %v6333_v16, %v6408_v29  ;;  %v6410_v53 = vld [vmem:[#allocation174_spill] sm:$0xff] }
 0x141   :  { %3459 = vmatprep.subr.bf16.mxu0 %v6399_v61  ;;  %v6411_v18 = vpack.c.bf16 %v6281_v32, %v6410_v53  ;;  %v6412_v61 = vpack.c.bf16 %v6337_v46, %v6336_v47  ;;  %v6421_v53 = vld [vmem:[#allocation189_spill] sm:$0xff]  ;;  %v6509_v47 = vld [vmem:[#allocation19_spill] sm:$0xff] }
 0x142   :  { %3077 = vmatpush1.bf16.msra.mxu1 %v6401_v41  ;;  %v6413_v41 = vld [vmem:[#allocation177_spill] sm:$0xff] }
 0x143   :  { %3079 = vmatprep.subr.bf16.mxu1 %v6404_v10  ;;  %v6414_v6 = vpack.c.bf16 %v6335_v38, %v6413_v41  ;;  %v6415_v10 = vpack.c.bf16 %v6339_v27, %v6338_v39  ;;  %v6507_v41 = vld [vmem:[#allocation18_spill] sm:$0xff] }
 0x144   :  { %3461 = vmatpush1.bf16.msra.mxu0 %v6407_v51  ;;  %v6416_v51 = vld [vmem:[#allocation186_spill] sm:$0xff] }
 0x145   :  { %3463 = vmatprep.subr.bf16.mxu0 %v6409_v14  ;;  %v6417_v16 = vpack.c.bf16 %v6341_v25, %v6416_v51  ;;  %v6418_v14 = vld [vmem:[#allocation192_spill] sm:$0xff]  ;;  %v6428_v25 = vld [vmem:[#allocation202_spill] sm:$0xff] }
 0x146   :  { %3081 = vmatpush1.bf16.msra.mxu1 %v6411_v18  ;;  %v6419_v32 = vpack.c.bf16 %v6344_v50, %v6418_v14  ;;  %v6420_v18 = vld [vmem:[#allocation190_spill] sm:$0xff]  ;;  %v6431_v50 = vld [vmem:[#allocation208_spill] sm:$0xff] }
 0x147   :  { %3083 = vmatprep.subr.bf16.mxu1 %v6412_v61  ;;  %v6422_v46 = vpack.c.bf16 %v6420_v18, %v6421_v53  ;;  %v6423_v61 = vld [vmem:[#allocation194_spill] sm:$0xff]  ;;  %v6433_v18 = vld [vmem:[#allocation17_spill] sm:$0xff] }
 0x148   :  { %3465 = vmatpush1.bf16.msra.mxu0 %v6414_v6  ;;  %v6424_v38 = vpack.c.bf16 %v6292_v22, %v6423_v61  ;;  %v6425_v6 = vld [vmem:[#allocation198_spill] sm:$0xff]  ;;  %v6435_v22 = vld [vmem:[#allocation204_spill] sm:$0xff] }
 0x149   :  { %3467 = vmatprep.subr.bf16.mxu0 %v6415_v10  ;;  %v6426_v27 = vpack.c.bf16 %v6346_v9, %v6425_v6  ;;  %v6427_v10 = vld [vmem:[#allocation11_spill] sm:$0xff]  ;;  %v6437_v61 = vld [vmem:[#allocation210_spill] sm:$0xff]  ;;  %v6498_v6 = vld [vmem:[#allocation13_spill] sm:$0xff] }
 0x14a   :  { %3085 = vmatpush1.bf16.msra.mxu1 %v6417_v16  ;;  %v6429_v16 = vld [vmem:[#allocation201_spill] sm:$0xff] }
 0x14b   :  { %3087 = vmatprep.subr.bf16.mxu1 %v6419_v32  ;;  %v6430_v51 = vpack.c.bf16 %v6428_v25, %v6429_v16  ;;  %v6432_v32 = vld [vmem:[#allocation15_spill] sm:$0xff]  ;;  %v6441_v25 = vld [vmem:[#allocation26_spill] sm:$0xff] }
 0x14c   :  { %3469 = vmatpush1.bf16.msra.mxu0 %v6422_v46  ;;  %v6434_v46 = vld [vmem:[#allocation24_spill] sm:$0xff]  ;;  %v6443_v16 = vld [vmem:[#allocation35_spill] sm:$0xff] }
 0x14d   :  { %3471 = vmatprep.subr.bf16.mxu0 %v6424_v38  ;;  %v6436_v38 = vand.u32 4294901760, %v6435_v22  ;;  %v6447_v22 = vld [vmem:[#allocation47_spill] sm:$0xff] }
 0x14e   :  { %3089 = vmatpush1.bf16.msra.mxu1 %v6426_v27  ;;  %v6438_v27 = vld [vmem:[#allocation20_spill] sm:$0xff] }
 0x14f   :  { %3091 = vmatprep.subr.bf16.mxu1 %v6427_v10  ;;  %v6439_v10 = vld [vmem:[#allocation206_spill] sm:$0xff] }
 0x150   :  { %3473 = vmatpush1.bf16.msra.mxu0 %v6430_v51  ;;  %v6440_v9 = vand.u32 4294901760, %v6439_v10  ;;  %v6442_v51 = vld [vmem:[#allocation30_spill] sm:$0xff] }
 0x151   :  { %982 = vmatmul.mubr.f32.vlgmr.msra.gmra.mrb[0].mxu1 %v6431_v50  ;;  %3475 = vmatprep.subr.bf16.mxu0 %v6432_v32  ;;  %v6444_v32 = vld [vmem:[#allocation33_spill] sm:$0xff]  ;;  %v6450_v10 = vld [vmem:[#allocation54_spill] sm:$0xff] }
 0x152   :  { %3093 = vmatpush1.bf16.msra.mxu1 %v6433_v18  ;;  %1119 = vmatprep.mubr.f32.mxu1 %v6436_v38  ;;  %v6445_v18 = vld [vmem:[#allocation38_spill] sm:$0xff]  ;;  %v6448_v38 = vld [vmem:[#allocation44_spill] sm:$0xff] }
 0x153   :  { %3095 = vmatprep.subr.bf16.mxu1 %v6434_v46  ;;  %2274 = vmatmul.mubr.f32.vlgmr.msra.gmra.mrb[0].mxu0 %v6437_v61  ;;  %v6446_v46 = vld [vmem:[#allocation41_spill] sm:$0xff] }
 0x154   :  { %3477 = vmatpush1.bf16.msra.mxu0 %v6438_v27  ;;  %2411 = vmatprep.mubr.f32.mxu0 %v6440_v9  ;;  %v6449_v27 = vld [vmem:[#allocation50_spill] sm:$0xff]  ;;  %v6451_v9 = vld [vmem:[#allocation59_spill] sm:$0xff] }
 0x155   :  { %3479 = vmatprep.subr.bf16.mxu0 %v6441_v25  ;;  %v6452_v25 = vld [vmem:[#allocation56_spill] sm:$0xff] }
 0x156   :  { %3097 = vmatpush1.bf16.msra.mxu1 %v6442_v51  ;;  %v6453_v51 = vld [vmem:[#allocation63_spill] sm:$0xff] }
 0x157   :  { %3099 = vmatprep.subr.bf16.mxu1 %v6443_v16  ;;  %v6454_v16 = vld [vmem:[#allocation65_spill] sm:$0xff] }
 0x158   :  { %3481 = vmatpush1.bf16.msra.mxu0 %v6444_v32  ;;  %v6455_v32 = vld [vmem:[#allocation71_spill] sm:$0xff] }
 0x159   :  { %3483 = vmatprep.subr.bf16.mxu0 %v6445_v18  ;;  %v6456_v18 = vld [vmem:[#allocation68_spill] sm:$0xff] }
 0x15a   :  { %3101 = vmatpush1.bf16.msra.mxu1 %v6446_v46  ;;  %v6457_v46 = vld [vmem:[#allocation75_spill] sm:$0xff] }
 0x15b   :  { %3103 = vmatprep.subr.bf16.mxu1 %v6447_v22  ;;  %v6458_v22 = vld [vmem:[#allocation77_spill] sm:$0xff] }
 0x15c   :  { %3485 = vmatpush1.bf16.msra.mxu0 %v6448_v38  ;;  %v6459_v38 = vld [vmem:[#allocation83_spill] sm:$0xff] }
 0x15d   :  { %3487 = vmatprep.subr.bf16.mxu0 %v6449_v27  ;;  %v6460_v27 = vld [vmem:[#allocation80_spill] sm:$0xff] }
 0x15e   :  { %3105 = vmatpush1.bf16.msra.mxu1 %v6450_v10  ;;  %v6461_v10 = vld [vmem:[#allocation87_spill] sm:$0xff] }
 0x15f   :  { %3107 = vmatprep.subr.bf16.mxu1 %v6451_v9  ;;  %v6462_v9 = vld [vmem:[#allocation89_spill] sm:$0xff] }
 0x160   :  { %3489 = vmatpush1.bf16.msra.mxu0 %v6452_v25  ;;  %v6463_v25 = vld [vmem:[#allocation95_spill] sm:$0xff] }
 0x161   :  { %3491 = vmatprep.subr.bf16.mxu0 %v6453_v51  ;;  %v6464_v51 = vld [vmem:[#allocation92_spill] sm:$0xff] }
 0x162   :  { %3109 = vmatpush1.bf16.msra.mxu1 %v6454_v16  ;;  %v6465_v16 = vld [vmem:[#allocation99_spill] sm:$0xff] }
 0x163   :  { %3111 = vmatprep.subr.bf16.mxu1 %v6455_v32  ;;  %v6466_v32 = vld [vmem:[#allocation101_spill] sm:$0xff] }
 0x164   :  { %3493 = vmatpush1.bf16.msra.mxu0 %v6456_v18  ;;  %v6467_v18 = vld [vmem:[#allocation107_spill] sm:$0xff] }
 0x165   :  { %3495 = vmatprep.subr.bf16.mxu0 %v6457_v46  ;;  %v6468_v46 = vld [vmem:[#allocation104_spill] sm:$0xff] }
 0x166   :  { %3113 = vmatpush1.bf16.msra.mxu1 %v6458_v22  ;;  %v6469_v22 = vld [vmem:[#allocation111_spill] sm:$0xff] }
 0x167   :  { %3115 = vmatprep.subr.bf16.mxu1 %v6459_v38  ;;  %v6470_v38 = vld [vmem:[#allocation113_spill] sm:$0xff] }
 0x168   :  { %3497 = vmatpush1.bf16.msra.mxu0 %v6460_v27  ;;  %v6471_v27 = vld [vmem:[#allocation119_spill] sm:$0xff] }
 0x169   :  { %3499 = vmatprep.subr.bf16.mxu0 %v6461_v10  ;;  %v6472_v10 = vld [vmem:[#allocation116_spill] sm:$0xff] }
 0x16a   :  { %3117 = vmatpush1.bf16.msra.mxu1 %v6462_v9  ;;  %v6473_v9 = vld [vmem:[#allocation123_spill] sm:$0xff] }
 0x16b   :  { %3119 = vmatprep.subr.bf16.mxu1 %v6463_v25  ;;  %v6474_v25 = vld [vmem:[#allocation125_spill] sm:$0xff] }
 0x16c   :  { %3501 = vmatpush1.bf16.msra.mxu0 %v6464_v51  ;;  %v6475_v51 = vld [vmem:[#allocation131_spill] sm:$0xff] }
 0x16d   :  { %3503 = vmatprep.subr.bf16.mxu0 %v6465_v16  ;;  %v6476_v16 = vld [vmem:[#allocation128_spill] sm:$0xff] }
 0x16e   :  { %3121 = vmatpush1.bf16.msra.mxu1 %v6466_v32  ;;  %v6477_v32 = vld [vmem:[#allocation135_spill] sm:$0xff] }
 0x16f   :  { %3123 = vmatprep.subr.bf16.mxu1 %v6467_v18  ;;  %v6478_v18 = vld [vmem:[#allocation137_spill] sm:$0xff] }
 0x170   :  { %3505 = vmatpush1.bf16.msra.mxu0 %v6468_v46  ;;  %v6479_v46 = vld [vmem:[#allocation143_spill] sm:$0xff] }
 0x171   :  { %3507 = vmatprep.subr.bf16.mxu0 %v6469_v22  ;;  %v6480_v22 = vld [vmem:[#allocation140_spill] sm:$0xff] }
 0x172   :  { %3125 = vmatpush1.bf16.msra.mxu1 %v6470_v38  ;;  %v6481_v38 = vld [vmem:[#allocation147_spill] sm:$0xff] }
 0x173   :  { %3127 = vmatprep.subr.bf16.mxu1 %v6471_v27  ;;  %v6482_v27 = vld [vmem:[#allocation149_spill] sm:$0xff] }
 0x174   :  { %3509 = vmatpush1.bf16.msra.mxu0 %v6472_v10  ;;  %v6483_v10 = vld [vmem:[#allocation155_spill] sm:$0xff] }
 0x175   :  { %3511 = vmatprep.subr.bf16.mxu0 %v6473_v9  ;;  %v6484_v9 = vld [vmem:[#allocation152_spill] sm:$0xff] }
 0x176   :  { %3129 = vmatpush1.bf16.msra.mxu1 %v6474_v25  ;;  %v6485_v25 = vld [vmem:[#allocation159_spill] sm:$0xff] }
 0x177   :  { %3131 = vmatprep.subr.bf16.mxu1 %v6475_v51  ;;  %v6486_v51 = vld [vmem:[#allocation161_spill] sm:$0xff] }
 0x178   :  { %3513 = vmatpush1.bf16.msra.mxu0 %v6476_v16  ;;  %v6487_v16 = vld [vmem:[#allocation167_spill] sm:$0xff] }
 0x179   :  { %3515 = vmatprep.subr.bf16.mxu0 %v6477_v32  ;;  %v6488_v32 = vld [vmem:[#allocation164_spill] sm:$0xff] }
 0x17a   :  { %3133 = vmatpush1.bf16.msra.mxu1 %v6478_v18  ;;  %v6489_v18 = vld [vmem:[#allocation171_spill] sm:$0xff] }
 0x17b   :  { %3135 = vmatprep.subr.bf16.mxu1 %v6479_v46  ;;  %v6490_v46 = vld [vmem:[#allocation173_spill] sm:$0xff] }
 0x17c   :  { %3517 = vmatpush1.bf16.msra.mxu0 %v6480_v22  ;;  %v6491_v22 = vld [vmem:[#allocation179_spill] sm:$0xff] }
 0x17d   :  { %3519 = vmatprep.subr.bf16.mxu0 %v6481_v38  ;;  %v6492_v38 = vld [vmem:[#allocation176_spill] sm:$0xff] }
 0x17e   :  { %3137 = vmatpush1.bf16.msra.mxu1 %v6482_v27  ;;  %v6493_v27 = vld [vmem:[#allocation183_spill] sm:$0xff] }
 0x17f   :  { %3139 = vmatprep.subr.bf16.mxu1 %v6483_v10  ;;  %v6494_v10 = vld [vmem:[#allocation185_spill] sm:$0xff] }
 0x180   :  { %3521 = vmatpush1.bf16.msra.mxu0 %v6484_v9  ;;  %v6495_v9 = vld [vmem:[#allocation191_spill] sm:$0xff] }
 0x181   :  { %3523 = vmatprep.subr.bf16.mxu0 %v6485_v25  ;;  %v6496_v25 = vld [vmem:[#allocation12_spill] sm:$0xff] }
 0x182   :  { %3141 = vmatpush1.bf16.msra.mxu1 %v6486_v51  ;;  %v6497_v51 = vand.u32 4294901760, %v6496_v25  ;;  %v6511_v25 = vld [vmem:[#allocation23_spill] sm:$0xff] }
 0x183   :  { %3143 = vmatprep.subr.bf16.mxu1 %v6487_v16  ;;  %v6499_v16 = vand.u32 4294901760, %v6498_v6  ;;  %v6512_v6 = vand.u32 4294901760, %v6511_v25  ;;  %v6525_v25 = vld [vmem:[#allocation29_spill] sm:$0xff] }
 0x184   :  { %3525 = vmatpush1.bf16.msra.mxu0 %v6488_v32  ;;  %v6500_v32 = vld [vmem:[#allocation188_spill] sm:$0xff] }
 0x185   :  { %3527 = vmatprep.subr.bf16.mxu0 %v6489_v18  ;;  %v3154_v53 = vpack.c.bf16 %v6499_v16, %v6497_v51  ;;  %v6501_v18 = vld [vmem:[#allocation195_spill] sm:$0xff]  ;;  %v6513_v16 = vld [vmem:[#allocation25_spill] sm:$0xff] }
 0x186   :  { %3145 = vmatpush1.bf16.msra.mxu1 %v6490_v46  ;;  %v6502_v46 = vld [vmem:[#allocation197_spill] sm:$0xff]  ;;  %v6514_v51 = vand.u32 4294901760, %v6513_v16  ;;  %v6526_v16 = vand.u32 4294901760, %v6525_v25  ;;  %v6542_v25 = vld [vmem:[#allocation40_spill] sm:$0xff] }
 0x187   :  { %3147 = vmatprep.subr.bf16.mxu1 %v6491_v22  ;;  %v6503_v22 = vld [vmem:[#allocation14_spill] sm:$0xff] }
 0x188   :  { %3529 = vmatpush1.bf16.msra.mxu0 %v6492_v38  ;;  %v6504_v14 = vand.u32 4294901760, %v6503_v22  ;;  %v6505_v38 = vld [vmem:[#allocation16_spill] sm:$0xff]  ;;  %v6517_v22 = vld [vmem:[#allocation21_spill] sm:$0xff] }
 0x189   :  { %3531 = vmatprep.subr.bf16.mxu0 %v6493_v27  ;;  %v6506_v39 = vand.u32 4294901760, %v6505_v38  ;;  %v6519_v38 = vld [vmem:[#allocation22_spill] sm:$0xff] }
 0x18a   :  { %3149 = vmatpush1.bf16.msra.mxu1 %v6494_v10  ;;  %v6508_v10 = vand.u32 4294901760, %v6507_v41 }
 0x18b   :  { %3151 = vmatprep.subr.bf16.mxu1 %v6495_v9  ;;  %v3538_v27 = vpack.c.bf16 %v6506_v39, %v6504_v14  ;;  %v6510_v9 = vand.u32 4294901760, %v6509_v47  ;;  %v6520_v39 = vand.u32 4294901760, %v6519_v38  ;;  %v6521_v47 = vld [vmem:[#allocation27_spill] sm:$0xff] }
 0x18c   :  { %3533 = vmatpush1.bf16.msra.mxu0 %v6500_v32  ;;  %v3158_v32 = vpack.c.bf16 %v6514_v51, %v6512_v6  ;;  %v6522_v41 = vand.u32 4294901760, %v6521_v47  ;;  %v6527_v6 = vld [vmem:[#allocation31_spill] sm:$0xff] }
 0x18d   :  { %3535 = vmatprep.subr.bf16.mxu0 %v6501_v18  ;;  %v3156_v29 = vpack.c.bf16 %v6510_v9, %v6508_v10  ;;  %v6518_v18 = vand.u32 4294901760, %v6517_v22  ;;  %v6528_v51 = vand.u32 4294901760, %v6527_v6  ;;  %v6532_v22 = vand.u32 4294901760, %v6531_v60  ;;  %v6533_v38 = vld [vmem:[#allocation203_spill] sm:$0xff]  ;;  %v6544_v6 = vld [vmem:[#allocation42_spill] sm:$0xff] }
 0x18e   :  { %3153 = vmatpush1.bf16.msra.mxu1 %v6502_v46  ;;  %v6516_v46 = vand.u32 4294901760, %v6431_v50  ;;  %v6529_v50 = vld [vmem:[#allocation36_spill] sm:$0xff]  ;;  %v6543_v60 = vand.u32 4294901760, %v6542_v25 }
 0x18f   :  { %3155 = vmatprep.subr.bf16.mxu1 %v3154_v53  ;;  %v3540_v14 = vpack.c.bf16 %v6520_v39, %v6518_v18  ;;  %v6523_v53 = vld [vmem:[#allocation28_spill] sm:$0xff]  ;;  %v6537_v39 = vld [vmem:[#allocation34_spill] sm:$0xff] }
 0x190   :  { %3537 = vmatpush1.bf16.msra.mxu0 %v6515_v48  ;;  %v6524_v10 = vand.u32 4294901760, %v6523_v53  ;;  %v3160_v48 = vpack.c.bf16 %v6528_v51, %v6526_v16  ;;  %v6535_v18 = vld [vmem:[#allocation32_spill] sm:$0xff]  ;;  %v6538_v47 = vand.u32 4294901760, %v6537_v39  ;;  %v6539_v53 = vld [vmem:[#allocation205_spill] sm:$0xff]  ;;  %v6545_v51 = vand.u32 4294901760, %v6544_v6 }
 0x191   :  { %1123 = vmatmul.mubr.f32.vlgmr.msra.gmra.mrb[0].mxu1 %v6516_v46  ;;  %3539 = vmatprep.subr.bf16.mxu0 %v3538_v27  ;;  %v6530_v46 = vand.u32 4294901760, %v6529_v50  ;;  %v6536_v27 = vand.u32 4294901760, %v6535_v18  ;;  %v6546_v50 = vld [vmem:[#allocation43_spill] sm:$0xff]  ;;  %v6552_v39 = vld [vmem:[#allocation45_spill] sm:$0xff] }
 0x192   :  { %3157 = vmatpush1.bf16.msra.mxu1 %v3156_v29  ;;  %v3542_v9 = vpack.c.bf16 %v6524_v10, %v6522_v41  ;;  %1386 = vmatprep.mubr.f32.mxu1 %v6533_v38  ;;  %v6534_v29 = vand.u32 4294901760, %v6437_v61  ;;  %v6547_v61 = vand.u32 4294901760, %v6546_v50 }
 0x193   :  { %3159 = vmatprep.subr.bf16.mxu1 %v3158_v32  ;;  %v3162_v36 = vpack.c.bf16 %v6532_v22, %v6530_v46  ;;  %v3544_v41 = vpack.c.bf16 %v6538_v47, %v6536_v27  ;;  %v6540_v32 = vld [vmem:[#allocation39_spill] sm:$0xff] }
 0x194   :  { %2415 = vmatmul.mubr.f32.vlgmr.msra.gmra.mrb[0].mxu0 %v6534_v29  ;;  %v6541_v10 = vand.u32 4294901760, %v6540_v32  ;;  %v3164_v46 = vpack.c.bf16 %v6547_v61, %v6545_v51  ;;  %v6550_v29 = vld [vmem:[#allocation49_spill] sm:$0xff]  ;;  %v6562_v61 = vld [vmem:[#allocation55_spill] sm:$0xff] }
 0x195   :  { %3541 = vmatpush1.bf16.msra.mxu0 %v3540_v14  ;;  %2678 = vmatprep.mubr.f32.mxu0 %v6539_v53  ;;  %v6548_v14 = vld [vmem:[#allocation48_spill] sm:$0xff]  ;;  %v6551_v18 = vand.u32 4294901760, %v6550_v29  ;;  %v6560_v51 = vld [vmem:[#allocation53_spill] sm:$0xff] }
 0x196   :  { %3543 = vmatprep.subr.bf16.mxu0 %v3542_v9  ;;  %3161 = vmatpush1.bf16.msra.mxu1 %v3160_v48  ;;  %v3546_v16 = vpack.c.bf16 %v6543_v60, %v6541_v10  ;;  %v6549_v22 = vand.u32 4294901760, %v6548_v14  ;;  %v6553_v9 = vand.u32 4294901760, %v6552_v39  ;;  %v6554_v48 = vld [vmem:[#allocation46_spill] sm:$0xff]  ;;  %v6556_v10 = vld [vmem:[#allocation51_spill] sm:$0xff]  ;;  %v6558_v60 = vld [vmem:[#allocation52_spill] sm:$0xff]  ;;  %v6563_v14 = vand.u32 4294901760, %v6562_v61 }
 0x197   :  { %3163 = vmatprep.subr.bf16.mxu1 %v3162_v36  ;;  %v6555_v47 = vand.u32 4294901760, %v6554_v48  ;;  %v6557_v25 = vand.u32 4294901760, %v6556_v10  ;;  %v6559_v6 = vand.u32 4294901760, %v6558_v60  ;;  %v6561_v36 = vand.u32 4294901760, %v6560_v51  ;;  %v6566_v29 = vld [vmem:[#allocation61_spill] sm:$0xff]  ;;  %v6572_v10 = vld [vmem:[#allocation62_spill] sm:$0xff] }
 0x198   :  { %v3166_v27 = vpack.c.bf16 %v6551_v18, %v6549_v22  ;;  %v6564_v22 = vld [vmem:[#allocation60_spill] sm:$0xff]  ;;  %v6567_v18 = vand.u32 4294901760, %v6566_v29  ;;  %v6578_v61 = vld [vmem:[#allocation67_spill] sm:$0xff]  ;;  %v6582_v29 = vld [vmem:[#allocation73_spill] sm:$0xff] }
 0x199   :  { %3545 = vmatpush1.bf16.msra.mxu0 %v3544_v41  ;;  %v3548_v32 = vpack.c.bf16 %v6555_v47, %v6553_v9  ;;  %v3550_v50 = vpack.c.bf16 %v6559_v6, %v6557_v25  ;;  %v3168_v53 = vpack.c.bf16 %v6563_v14, %v6561_v36  ;;  %v6565_v41 = vand.u32 4294901760, %v6564_v22  ;;  %v6568_v9 = vld [vmem:[#allocation57_spill] sm:$0xff]  ;;  %v6574_v60 = vld [vmem:[#allocation64_spill] sm:$0xff]  ;;  %v6576_v36 = vld [vmem:[#allocation66_spill] sm:$0xff] }
 0x19a   :  { %3547 = vmatprep.subr.bf16.mxu0 %v3546_v16  ;;  %3165 = vmatpush1.bf16.msra.mxu1 %v3164_v46  ;;  %v6569_v16 = vand.u32 4294901760, %v6568_v9  ;;  %v6570_v46 = vld [vmem:[#allocation58_spill] sm:$0xff]  ;;  %v6573_v25 = vand.u32 4294901760, %v6572_v10  ;;  %v6575_v6 = vand.u32 4294901760, %v6574_v60  ;;  %v6579_v14 = vand.u32 4294901760, %v6578_v61  ;;  %v6590_v60 = vld [vmem:[#allocation76_spill] sm:$0xff] }
 0x19b   :  { %3167 = vmatprep.subr.bf16.mxu1 %v3166_v27  ;;  %v3170_v39 = vpack.c.bf16 %v6567_v18, %v6565_v41  ;;  %v6571_v48 = vand.u32 4294901760, %v6570_v46  ;;  %v6577_v27 = vand.u32 4294901760, %v6576_v36  ;;  %v6580_v41 = vld [vmem:[#allocation72_spill] sm:$0xff]  ;;  %v6583_v18 = vand.u32 4294901760, %v6582_v29  ;;  %v6588_v10 = vld [vmem:[#allocation74_spill] sm:$0xff]  ;;  %v6594_v61 = vld [vmem:[#allocation79_spill] sm:$0xff] }
 0x19c   :  { %v3554_v51 = vpack.c.bf16 %v6575_v6, %v6573_v25  ;;  %v6589_v25 = vand.u32 4294901760, %v6588_v10  ;;  %v6591_v6 = vand.u32 4294901760, %v6590_v60  ;;  %v6598_v29 = vld [vmem:[#allocation85_spill] sm:$0xff]  ;;  %v6604_v10 = vld [vmem:[#allocation86_spill] sm:$0xff]  ;;  %v6606_v60 = vld [vmem:[#allocation88_spill] sm:$0xff] }
 0x19d   :  { %3549 = vmatpush1.bf16.msra.mxu0 %v3548_v32  ;;  %v3552_v47 = vpack.c.bf16 %v6571_v48, %v6569_v16  ;;  %v3172_v22 = vpack.c.bf16 %v6579_v14, %v6577_v27  ;;  %v6581_v32 = vand.u32 4294901760, %v6580_v41  ;;  %v6584_v16 = vld [vmem:[#allocation69_spill] sm:$0xff]  ;;  %v6592_v27 = vld [vmem:[#allocation78_spill] sm:$0xff]  ;;  %v6595_v14 = vand.u32 4294901760, %v6594_v61  ;;  %v6610_v61 = vld [vmem:[#allocation91_spill] sm:$0xff] }
 0x19e   :  { %3551 = vmatprep.subr.bf16.mxu0 %v3550_v50  ;;  %3169 = vmatpush1.bf16.msra.mxu1 %v3168_v53  ;;  %v6585_v50 = vand.u32 4294901760, %v6584_v16  ;;  %v6586_v53 = vld [vmem:[#allocation70_spill] sm:$0xff]  ;;  %v3558_v36 = vpack.c.bf16 %v6591_v6, %v6589_v25  ;;  %v6605_v25 = vand.u32 4294901760, %v6604_v10  ;;  %v6607_v6 = vand.u32 4294901760, %v6606_v60 }
 0x19f   :  { %3171 = vmatprep.subr.bf16.mxu1 %v3170_v39  ;;  %v3174_v9 = vpack.c.bf16 %v6583_v18, %v6581_v32  ;;  %v6587_v46 = vand.u32 4294901760, %v6586_v53  ;;  %v6593_v39 = vand.u32 4294901760, %v6592_v27  ;;  %v6596_v32 = vld [vmem:[#allocation84_spill] sm:$0xff]  ;;  %v6599_v18 = vand.u32 4294901760, %v6598_v29 }
 0x1a0   :  { %v3562_v27 = vpack.c.bf16 %v6607_v6, %v6605_v25  ;;  %v6624_v6 = vand.u32 4294901760, %v6380_v1  ;;  %v6631_v1 = vand.u32 4294901760, %v6246_v2  ;;  %v6638_v2 = vand.u32 4294901760, %v6307_v3 }
 0x1a1   :  { %3553 = vmatpush1.bf16.msra.mxu0 %v3552_v47  ;;  %v3556_v48 = vpack.c.bf16 %v6587_v46, %v6585_v50  ;;  %v3176_v41 = vpack.c.bf16 %v6595_v14, %v6593_v39  ;;  %v6597_v47 = vand.u32 4294901760, %v6596_v32  ;;  %v6600_v50 = vld [vmem:[#allocation81_spill] sm:$0xff]  ;;  %v6608_v39 = vld [vmem:[#allocation90_spill] sm:$0xff]  ;;  %v6611_v14 = vand.u32 4294901760, %v6610_v61 }
 0x1a2   :  { %3555 = vmatprep.subr.bf16.mxu0 %v3554_v51  ;;  %3173 = vmatpush1.bf16.msra.mxu1 %v3172_v22  ;;  %v6601_v51 = vand.u32 4294901760, %v6600_v50  ;;  %v6602_v22 = vld [vmem:[#allocation82_spill] sm:$0xff]  ;;  %v6645_v3 = vand.u32 4294901760, %v6312_v24 }
 0x1a3   :  { %3175 = vmatprep.subr.bf16.mxu1 %v3174_v9  ;;  %v3178_v16 = vpack.c.bf16 %v6599_v18, %v6597_v47  ;;  %v6603_v53 = vand.u32 4294901760, %v6602_v22  ;;  %v6609_v9 = vand.u32 4294901760, %v6608_v39  ;;  %v6613_v47 = vld [vmem:[#allocation97_spill] sm:$0xff]  ;;  %v6618_v22 = vand.u32 4294901760, %v6374_v17 }
 0x1a4   :  { %v6614_v29 = vand.u32 4294901760, %v6613_v47  ;;  %v6628_v39 = vand.u32 4294901760, %v6241_v23  ;;  %v6635_v23 = vand.u32 4294901760, %v6302_v31  ;;  %v6642_v31 = vand.u32 4294901760, %v6309_v56 }
 0x1a5   :  { %3557 = vmatpush1.bf16.msra.mxu0 %v3556_v48  ;;  %v3560_v46 = vpack.c.bf16 %v6603_v53, %v6601_v51  ;;  %v3180_v32 = vpack.c.bf16 %v6611_v14, %v6609_v9  ;;  %v6612_v48 = vand.u32 4294901760, %v6370_v30  ;;  %v6619_v53 = vand.u32 4294901760, %v6375_v15 }
 0x1a6   :  { %3559 = vmatprep.subr.bf16.mxu0 %v3558_v36  ;;  %3177 = vmatpush1.bf16.msra.mxu1 %v3176_v41  ;;  %v6615_v36 = vand.u32 4294901760, %v6372_v59  ;;  %v6616_v41 = vld [vmem:[#allocation94_spill] sm:$0xff]  ;;  %v6621_v30 = vand.u32 4294901760, %v6377_v26  ;;  %v6623_v59 = vand.u32 4294901760, %v6379_v62  ;;  %v6626_v15 = vand.u32 4294901760, %v6382_v40 }
 0x1a7   :  { %3179 = vmatprep.subr.bf16.mxu1 %v3178_v16  ;;  %v3182_v18 = vpack.c.bf16 %v6614_v29, %v6612_v48  ;;  %v6617_v50 = vand.u32 4294901760, %v6616_v41  ;;  %v3566_v10 = vpack.c.bf16 %v6619_v53, %v6618_v22  ;;  %v6620_v16 = vand.u32 4294901760, %v6376_v49  ;;  %v6654_v53 = vld [vmem:[#allocation151_spill] sm:$0xff] }
 0x1a8   :  { %v6627_v49 = vand.u32 4294901760, %v6383_v20  ;;  %v6630_v62 = vand.u32 4294901760, %v6245_v42  ;;  %v6633_v14 = vand.u32 4294901760, %v6244_v8  ;;  %v6634_v20 = vand.u32 4294901760, %v6301_v0 }
 0x1a9   :  { %3561 = vmatpush1.bf16.msra.mxu0 %v3560_v46  ;;  %v3564_v51 = vpack.c.bf16 %v6617_v50, %v6615_v36  ;;  %v3184_v25 = vpack.c.bf16 %v6621_v30, %v6620_v16  ;;  %v6622_v46 = vand.u32 4294901760, %v6378_v57  ;;  %v6629_v57 = vand.u32 4294901760, %v6242_v55  ;;  %v6657_v16 = vld [vmem:[#allocation157_spill] sm:$0xff] }
 0x1aa   :  { %3563 = vmatprep.subr.bf16.mxu0 %v3562_v27  ;;  %3181 = vmatpush1.bf16.msra.mxu1 %v3180_v32  ;;  %v6625_v27 = vand.u32 4294901760, %v6381_v28  ;;  %v3570_v26 = vpack.c.bf16 %v6627_v49, %v6626_v15  ;;  %v3190_v61 = vpack.c.bf16 %v6631_v1, %v6630_v62  ;;  %v6632_v28 = vand.u32 4294901760, %v6243_v11  ;;  %v6667_v15 = vld [vmem:[#allocation168_spill] sm:$0xff]  ;;  %v6673_v62 = vld [vmem:[#allocation166_spill] sm:$0xff] }
 0x1ab   :  { %3183 = vmatprep.subr.bf16.mxu1 %v3182_v18  ;;  %v3186_v60 = vpack.c.bf16 %v6623_v59, %v6622_v46  ;;  %v3188_v9 = vpack.c.bf16 %v6629_v57, %v6628_v39  ;;  %v3574_v55 = vpack.c.bf16 %v6635_v23, %v6634_v20  ;;  %v6636_v32 = vand.u32 4294901760, %v6303_v63  ;;  %v6663_v59 = vld [vmem:[#allocation160_spill] sm:$0xff]  ;;  %v6671_v57 = vld [vmem:[#allocation165_spill] sm:$0xff]  ;;  %v6681_v23 = vld [vmem:[#allocation175_spill] sm:$0xff] }
 0x1ac   :  { %v3568_v17 = vpack.c.bf16 %v6625_v27, %v6624_v6  ;;  %v3572_v40 = vpack.c.bf16 %v6633_v14, %v6632_v28  ;;  %v6637_v42 = vand.u32 4294901760, %v6304_v35  ;;  %v6639_v11 = vand.u32 4294901760, %v6308_v43 }
 0x1ad   :  { %3565 = vmatpush1.bf16.msra.mxu0 %v3564_v51  ;;  %v6640_v8 = vand.u32 4294901760, %v6305_v58  ;;  %v6641_v29 = vand.u32 4294901760, %v6306_v5  ;;  %v6643_v63 = vand.u32 4294901760, %v6310_v21  ;;  %v6644_v18 = vand.u32 4294901760, %v6311_v34  ;;  %v6652_v51 = vld [vmem:[#allocation150_spill] sm:$0xff] }
 0x1ae   :  { %3567 = vmatprep.subr.bf16.mxu0 %v3566_v10  ;;  %3185 = vmatpush1.bf16.msra.mxu1 %v3184_v25  ;;  %v3192_v48 = vpack.c.bf16 %v6637_v42, %v6636_v32  ;;  %v3194_v47 = vpack.c.bf16 %v6639_v11, %v6638_v2  ;;  %v6646_v43 = vand.u32 4294901760, %v6261_v37  ;;  %v6647_v58 = vand.u32 4294901760, %v6315_v54  ;;  %v6660_v25 = vld [vmem:[#allocation154_spill] sm:$0xff]  ;;  %v6683_v42 = vld [vmem:[#allocation180_spill] sm:$0xff]  ;;  %v6685_v2 = vld [vmem:[#allocation181_spill] sm:$0xff] }
 0x1af   :  { %3187 = vmatprep.subr.bf16.mxu1 %v3186_v60  ;;  %v3576_v0 = vpack.c.bf16 %v6641_v29, %v6640_v8  ;;  %v3578_v35 = vpack.c.bf16 %v6643_v63, %v6642_v31  ;;  %v3196_v36 = vpack.c.bf16 %v6645_v3, %v6644_v18  ;;  %v6648_v5 = vand.u32 4294901760, %v6313_v13  ;;  %v6687_v8 = vld [vmem:[#allocation177_spill] sm:$0xff]  ;;  %v6693_v3 = vld [vmem:[#allocation184_spill] sm:$0xff] }
 0x1b0   :  { %v3198_v41 = vpack.c.bf16 %v6647_v58, %v6646_v43  ;;  %v6649_v50 = vand.u32 4294901760, %v6314_v44  ;;  %v6650_v21 = vand.u32 4294901760, %v6316_v19  ;;  %v6651_v34 = vand.u32 4294901760, %v6317_v4  ;;  %v6695_v58 = vld [vmem:[#allocation186_spill] sm:$0xff] }
 0x1b1   :  { %3569 = vmatpush1.bf16.msra.mxu0 %v3568_v17  ;;  %v6653_v22 = vand.u32 4294901760, %v6652_v51  ;;  %v6655_v37 = vand.u32 4294901760, %v6654_v53  ;;  %v6656_v54 = vand.u32 4294901760, %v6322_v52  ;;  %v6658_v13 = vand.u32 4294901760, %v6657_v16  ;;  %v6703_v53 = vld [vmem:[#allocation189_spill] sm:$0xff] }
 0x1b2   :  { %3571 = vmatprep.subr.bf16.mxu0 %v3570_v26  ;;  %3189 = vmatpush1.bf16.msra.mxu1 %v3188_v9  ;;  %v3580_v56 = vpack.c.bf16 %v6649_v50, %v6648_v5  ;;  %v3582_v24 = vpack.c.bf16 %v6651_v34, %v6650_v21  ;;  %v6659_v44 = vand.u32 4294901760, %v6320_v45  ;;  %v6661_v46 = vand.u32 4294901760, %v6660_v25  ;;  %v6669_v26 = vld [vmem:[#allocation169_spill] sm:$0xff]  ;;  %v6697_v5 = vld [vmem:[#allocation187_spill] sm:$0xff]  ;;  %v6699_v21 = vld [vmem:[#allocation192_spill] sm:$0xff] }
 0x1b3   :  { %3191 = vmatprep.subr.bf16.mxu1 %v3190_v61  ;;  %v3200_v10 = vpack.c.bf16 %v6655_v37, %v6653_v22  ;;  %v3202_v30 = vpack.c.bf16 %v6658_v13, %v6656_v54  ;;  %v6662_v4 = vand.u32 4294901760, %v6325_v33  ;;  %v6664_v60 = vand.u32 4294901760, %v6663_v59  ;;  %v6675_v61 = vld [vmem:[#allocation170_spill] sm:$0xff]  ;;  %v6713_v59 = vld [vmem:[#allocation199_spill] sm:$0xff] }
 0x1b4   :  { %v3584_v19 = vpack.c.bf16 %v6661_v46, %v6659_v44  ;;  %v6665_v27 = vand.u32 4294901760, %v6400_v7  ;;  %v6666_v52 = vand.u32 4294901760, %v6328_v12  ;;  %v6668_v49 = vand.u32 4294901760, %v6667_v15  ;;  %v6677_v7 = vld [vmem:[#allocation172_spill] sm:$0xff]  ;;  %v6707_v13 = vld [vmem:[#allocation194_spill] sm:$0xff] }
 0x1b5   :  { %3573 = vmatpush1.bf16.msra.mxu0 %v3572_v40  ;;  %v3586_v6 = vpack.c.bf16 %v6664_v60, %v6662_v4  ;;  %v6670_v45 = vand.u32 4294901760, %v6669_v26  ;;  %v6672_v9 = vand.u32 4294901760, %v6671_v57  ;;  %v6674_v1 = vand.u32 4294901760, %v6673_v62  ;;  %v6679_v40 = vld [vmem:[#allocation174_spill] sm:$0xff]  ;;  %v6709_v44 = vld [vmem:[#allocation196_spill] sm:$0xff]  ;;  %v6719_v26 = vld [vmem:[#allocation11_spill] sm:$0xff] }
 0x1b6   :  { %3575 = vmatprep.subr.bf16.mxu0 %v3574_v55  ;;  %3193 = vmatpush1.bf16.msra.mxu1 %v3192_v48  ;;  %v3204_v17 = vpack.c.bf16 %v6666_v52, %v6665_v27  ;;  %v6676_v28 = vand.u32 4294901760, %v6675_v61  ;;  %v6678_v14 = vand.u32 4294901760, %v6677_v7  ;;  %v6680_v20 = vand.u32 4294901760, %v6679_v40  ;;  %v6715_v27 = vld [vmem:[#allocation201_spill] sm:$0xff]  ;;  %v6727_v61 = vld [vmem:[#allocation26_spill] sm:$0xff]  ;;  %v6729_v7 = vld [vmem:[#allocation35_spill] sm:$0xff] }
 0x1b7   :  { %3195 = vmatprep.subr.bf16.mxu1 %v3194_v47  ;;  %v3206_v39 = vpack.c.bf16 %v6670_v45, %v6668_v49  ;;  %v3588_v33 = vpack.c.bf16 %v6674_v1, %v6672_v9  ;;  %v6682_v55 = vand.u32 4294901760, %v6681_v23  ;;  %v6684_v48 = vand.u32 4294901760, %v6683_v42  ;;  %v6720_v45 = vld [vmem:[#allocation207_spill] sm:$0xff]  ;;  %v6722_v57 = vld [vmem:[#allocation17_spill] sm:$0xff]  ;;  %v6723_v9 = vld [vmem:[#allocation24_spill] sm:$0xff] }
 0x1b8   :  { %v3590_v12 = vpack.c.bf16 %v6678_v14, %v6676_v28  ;;  %v6686_v11 = vand.u32 4294901760, %v6685_v2  ;;  %v6688_v29 = vand.u32 4294901760, %v6687_v8  ;;  %v6698_v50 = vand.u32 4294901760, %v6697_v5  ;;  %v6724_v62 = vld [vmem:[#allocation209_spill] sm:$0xff]  ;;  %v6725_v1 = vld [vmem:[#allocation20_spill] sm:$0xff]  ;;  %v6728_v28 = vld [vmem:[#allocation30_spill] sm:$0xff] }
 0x1b9   :  { %3577 = vmatpush1.bf16.msra.mxu0 %v3576_v0  ;;  %v3208_v32 = vpack.c.bf16 %v6682_v55, %v6680_v20  ;;  %v6689_v0 = vld [vmem:[#allocation178_spill] sm:$0xff]  ;;  %v6700_v34 = vand.u32 4294901760, %v6699_v21  ;;  %v6704_v37 = vand.u32 4294901760, %v6703_v53  ;;  %v6710_v25 = vand.u32 4294901760, %v6709_v44  ;;  %v6730_v14 = vld [vmem:[#allocation33_spill] sm:$0xff]  ;;  %v6733_v20 = vld [vmem:[#allocation47_spill] sm:$0xff] }
 0x1ba   :  { %3579 = vmatprep.subr.bf16.mxu0 %v3578_v35  ;;  %3197 = vmatpush1.bf16.msra.mxu1 %v3196_v36  ;;  %v3210_v47 = vpack.c.bf16 %v6686_v11, %v6684_v48  ;;  %v6690_v31 = vand.u32 4294901760, %v6689_v0  ;;  %v6691_v35 = vld [vmem:[#allocation182_spill] sm:$0xff]  ;;  %v6694_v36 = vand.u32 4294901760, %v6693_v3  ;;  %v6714_v60 = vand.u32 4294901760, %v6713_v59  ;;  %v6732_v40 = vld [vmem:[#allocation41_spill] sm:$0xff]  ;;  %v6738_v42 = vld [vmem:[#allocation56_spill] sm:$0xff] }
 0x1bb   :  { %3199 = vmatprep.subr.bf16.mxu1 %v3198_v41  ;;  %v6692_v18 = vand.u32 4294901760, %v6691_v35  ;;  %v6696_v41 = vand.u32 4294901760, %v6695_v58  ;;  %v6716_v52 = vand.u32 4294901760, %v6715_v27  ;;  %v6735_v23 = vld [vmem:[#allocation50_spill] sm:$0xff]  ;;  %v6739_v48 = vld [vmem:[#allocation63_spill] sm:$0xff]  ;;  %v6740_v2 = vld [vmem:[#allocation65_spill] sm:$0xff] }
 0x1bc   :  { %v3592_v63 = vpack.c.bf16 %v6690_v31, %v6688_v29  ;;  %v6736_v55 = vld [vmem:[#allocation54_spill] sm:$0xff]  ;;  %v6741_v11 = vld [vmem:[#allocation71_spill] sm:$0xff]  ;;  %v6744_v29 = vld [vmem:[#allocation77_spill] sm:$0xff] }
 0x1bd   :  { %3581 = vmatpush1.bf16.msra.mxu0 %v3580_v56  ;;  %v3594_v43 = vpack.c.bf16 %v6694_v36, %v6692_v18  ;;  %v3212_v56 = vpack.c.bf16 %v6698_v50, %v6696_v41  ;;  %v6743_v8 = vld [vmem:[#allocation75_spill] sm:$0xff]  ;;  %v6746_v31 = vld [vmem:[#allocation80_spill] sm:$0xff]  ;;  %v6748_v35 = vld [vmem:[#allocation89_spill] sm:$0xff] }
 0x1be   :  { %3583 = vmatprep.subr.bf16.mxu0 %v3582_v24  ;;  %3201 = vmatpush1.bf16.msra.mxu1 %v3200_v10  ;;  %v6701_v24 = vld [vmem:[#allocation193_spill] sm:$0xff]  ;;  %v6705_v10 = vld [vmem:[#allocation190_spill] sm:$0xff]  ;;  %v6745_v0 = vld [vmem:[#allocation83_spill] sm:$0xff] }
 0x1bf   :  { %3203 = vmatprep.subr.bf16.mxu1 %v3202_v30  ;;  %v6702_v51 = vand.u32 4294901760, %v6701_v24  ;;  %v6706_v54 = vand.u32 4294901760, %v6705_v10  ;;  %v6708_v30 = vand.u32 4294901760, %v6707_v13  ;;  %v6749_v18 = vld [vmem:[#allocation95_spill] sm:$0xff]  ;;  %v6750_v3 = vld [vmem:[#allocation92_spill] sm:$0xff]  ;;  %v6756_v50 = vld [vmem:[#allocation113_spill] sm:$0xff] }
 0x1c0   :  { %v6751_v36 = vld [vmem:[#allocation99_spill] sm:$0xff]  ;;  %v6754_v41 = vld [vmem:[#allocation104_spill] sm:$0xff]  ;;  %v6760_v24 = vld [vmem:[#allocation125_spill] sm:$0xff] }
 0x1c1   :  { %3585 = vmatpush1.bf16.msra.mxu0 %v3584_v19  ;;  %v3214_v22 = vpack.c.bf16 %v6702_v51, %v6700_v34  ;;  %v3596_v16 = vpack.c.bf16 %v6706_v54, %v6704_v37  ;;  %v3598_v46 = vpack.c.bf16 %v6710_v25, %v6708_v30  ;;  %v6711_v19 = vld [vmem:[#allocation198_spill] sm:$0xff]  ;;  %v6753_v58 = vld [vmem:[#allocation107_spill] sm:$0xff]  ;;  %v6758_v21 = vld [vmem:[#allocation116_spill] sm:$0xff] }
 0x1c2   :  { %3587 = vmatprep.subr.bf16.mxu0 %v3586_v6  ;;  %3205 = vmatpush1.bf16.msra.mxu1 %v3204_v17  ;;  %v6712_v4 = vand.u32 4294901760, %v6711_v19  ;;  %v6717_v17 = vld [vmem:[#allocation202_spill] sm:$0xff]  ;;  %v6755_v5 = vld [vmem:[#allocation111_spill] sm:$0xff]  ;;  %v6764_v37 = vld [vmem:[#allocation137_spill] sm:$0xff] }
 0x1c3   :  { %3207 = vmatprep.subr.bf16.mxu1 %v3206_v39  ;;  %v6718_v15 = vand.u32 4294901760, %v6717_v17  ;;  %v6721_v39 = vld [vmem:[#allocation15_spill] sm:$0xff]  ;;  %v6766_v54 = vld [vmem:[#allocation140_spill] sm:$0xff]  ;;  %v6768_v13 = vld [vmem:[#allocation149_spill] sm:$0xff] }
 0x1c4   :  { %v3216_v6 = vpack.c.bf16 %v6714_v60, %v6712_v4  ;;  %v6759_v34 = vld [vmem:[#allocation123_spill] sm:$0xff]  ;;  %v6770_v44 = vld [vmem:[#allocation152_spill] sm:$0xff]  ;;  %v6776_v60 = vld [vmem:[#allocation173_spill] sm:$0xff] }
 0x1c5   :  { %3589 = vmatpush1.bf16.msra.mxu0 %v3588_v33  ;;  %v3600_v49 = vpack.c.bf16 %v6718_v15, %v6716_v52  ;;  %v6726_v33 = vld [vmem:[#allocation205_spill] sm:$0xff]  ;;  %v6761_v51 = vld [vmem:[#allocation131_spill] sm:$0xff]  ;;  %v6774_v4 = vld [vmem:[#allocation164_spill] sm:$0xff] }
 0x1c6   :  { %3591 = vmatprep.subr.bf16.mxu0 %v3590_v12  ;;  %3209 = vmatpush1.bf16.msra.mxu1 %v3208_v32  ;;  %v6731_v12 = vld [vmem:[#allocation38_spill] sm:$0xff]  ;;  %v6737_v32 = vld [vmem:[#allocation59_spill] sm:$0xff]  ;;  %v6778_v27 = vld [vmem:[#allocation176_spill] sm:$0xff] }
 0x1c7   :  { %3211 = vmatprep.subr.bf16.mxu1 %v3210_v47  ;;  %v6742_v47 = vld [vmem:[#allocation68_spill] sm:$0xff]  ;;  %v6763_v53 = vld [vmem:[#allocation135_spill] sm:$0xff]  ;;  %v6780_v17 = vld [vmem:[#allocation185_spill] sm:$0xff] }
 0x1c8   :  { %v6765_v10 = vld [vmem:[#allocation143_spill] sm:$0xff] }
 0x1c9   :  { %3593 = vmatpush1.bf16.msra.mxu0 %v3592_v63  ;;  %v6747_v63 = vld [vmem:[#allocation87_spill] sm:$0xff] }
 0x1ca   :  { %3595 = vmatprep.subr.bf16.mxu0 %v3594_v43  ;;  %3213 = vmatpush1.bf16.msra.mxu1 %v3212_v56  ;;  %v6752_v43 = vld [vmem:[#allocation101_spill] sm:$0xff]  ;;  %v6757_v56 = vld [vmem:[#allocation119_spill] sm:$0xff] }
 0x1cb   :  { %3215 = vmatprep.subr.bf16.mxu1 %v3214_v22  ;;  %v6762_v22 = vld [vmem:[#allocation128_spill] sm:$0xff]  ;;  %v6769_v30 = vld [vmem:[#allocation155_spill] sm:$0xff] }
 0x1cc   :  { %v6771_v25 = vld [vmem:[#allocation159_spill] sm:$0xff] }
 0x1cd   :  { %3597 = vmatpush1.bf16.msra.mxu0 %v3596_v16  ;;  %v6767_v16 = vld [vmem:[#allocation147_spill] sm:$0xff] }
 0x1ce   :  { %3599 = vmatprep.subr.bf16.mxu0 %v3598_v46  ;;  %3217 = vmatpush1.bf16.msra.mxu1 %v3216_v6  ;;  %v6772_v46 = vld [vmem:[#allocation161_spill] sm:$0xff]  ;;  %v6773_v19 = vld [vmem:[#allocation167_spill] sm:$0xff] }
 0x1cf   :  { %3219 = vmatprep.subr.bf16.mxu1 %v6719_v26  ;;  %v6775_v59 = vld [vmem:[#allocation171_spill] sm:$0xff] }
 0x1d0   :  { %v6777_v6 = vld [vmem:[#allocation179_spill] sm:$0xff] }
 0x1d1   :  { %3601 = vmatpush1.bf16.msra.mxu0 %v3600_v49  ;;  %1388 = vmatmul.mubr.f32.vlgmr.msra.gmra.mrb[0].mxu1 %v6720_v45  ;;  %v6779_v52 = vld [vmem:[#allocation183_spill] sm:$0xff]  ;;  %v6782_v49 = vld [vmem:[#allocation188_spill] sm:$0xff] }
 0x1d2   :  { %3603 = vmatprep.subr.bf16.mxu0 %v6721_v39  ;;  %3221 = vmatpush1.bf16.msra.mxu1 %v6722_v57  ;;  %v6781_v15 = vld [vmem:[#allocation191_spill] sm:$0xff]  ;;  %v6784_v39 = vld [vmem:[#allocation197_spill] sm:$0xff]  ;;  %v6785_v57 = vld [vmem:[#allocation200_spill] sm:$0xff] }
 0x1d3   :  { %3223 = vmatprep.subr.bf16.mxu1 %v6723_v9  ;;  %1523 = vmatprep.mubr.f32.mxu1 %v6533_v38  ;;  %v6734_v38 = vld [vmem:[#allocation44_spill] sm:$0xff]  ;;  %v6783_v26 = vld [vmem:[#allocation195_spill] sm:$0xff] }
 0x1d4   :  { %2680 = vmatmul.mubr.f32.vlgmr.msra.gmra.mrb[0].mxu0 %v6724_v62 }
 0x1d5   :  { %3605 = vmatpush1.bf16.msra.mxu0 %v6725_v1  ;;  %2815 = vmatprep.mubr.f32.mxu0 %v6726_v33 }
 0x1d6   :  { %3607 = vmatprep.subr.bf16.mxu0 %v6727_v61  ;;  %3225 = vmatpush1.bf16.msra.mxu1 %v6728_v28 }
 0x1d7   :  { %3227 = vmatprep.subr.bf16.mxu1 %v6729_v7 }
 0x1d9   :  { %3609 = vmatpush1.bf16.msra.mxu0 %v6730_v14 }
 0x1da   :  { %3611 = vmatprep.subr.bf16.mxu0 %v6731_v12  ;;  %3229 = vmatpush1.bf16.msra.mxu1 %v6732_v40  ;;  %v3782_v40 = vmov 1966171168  }
 0x1db   :  { %3231 = vmatprep.subr.bf16.mxu1 %v6733_v20  ;;  %v2835_v20 = vunpack.c.l.s4 %v3782_v40 }
 0x1dd   :  { %3613 = vmatpush1.bf16.msra.mxu0 %v6734_v38  ;;  %v2837_v38 = vlaneseq }
 0x1de   :  { %3615 = vmatprep.subr.bf16.mxu0 %v6735_v23  ;;  %3233 = vmatpush1.bf16.msra.mxu1 %v6736_v55  ;;  %v2836_v55 = vunpack.c.0.s8 %v2835_v20 }
 0x1df   :  { %3235 = vmatprep.subr.bf16.mxu1 %v6737_v32  ;;  %v2838_v32 = vshrl.u32 %v2837_v38, 7 }
 0x1e1   :  { %3617 = vmatpush1.bf16.msra.mxu0 %v6738_v42 }
 0x1e2   :  { %3619 = vmatprep.subr.bf16.mxu0 %v6739_v48  ;;  %3237 = vmatpush1.bf16.msra.mxu1 %v6740_v2 }
 0x1e3   :  { %3239 = vmatprep.subr.bf16.mxu1 %v6741_v11  ;;  %v2839_v11 = vsub.s32 %v2836_v55, %v2838_v32 }
 0x1e5   :  { %3621 = vmatpush1.bf16.msra.mxu0 %v6742_v47 }
 0x1e6   :  { %3623 = vmatprep.subr.bf16.mxu0 %v6743_v8  ;;  %3241 = vmatpush1.bf16.msra.mxu1 %v6744_v29  ;;  %v2858_v29 = vsub.s32 0, %v2838_v32 }
 0x1e7   :  { %3243 = vmatprep.subr.bf16.mxu1 %v6745_v0  ;;  %v2862_v0 = vsub.s32 1, %v2838_v32 }
 0x1e9   :  { %3625 = vmatpush1.bf16.msra.mxu0 %v6746_v31 }
 0x1ea   :  { %3627 = vmatprep.subr.bf16.mxu0 %v6747_v63  ;;  %3245 = vmatpush1.bf16.msra.mxu1 %v6748_v35 }
 0x1eb   :  { %3247 = vmatprep.subr.bf16.mxu1 %v6749_v18 }
 0x1ed   :  { %3629 = vmatpush1.bf16.msra.mxu0 %v6750_v3 }
 0x1ee   :  { %3631 = vmatprep.subr.bf16.mxu0 %v6751_v36  ;;  %3249 = vmatpush1.bf16.msra.mxu1 %v6752_v43 }
 0x1ef   :  { %3251 = vmatprep.subr.bf16.mxu1 %v6753_v58 }
 0x1f1   :  { %3633 = vmatpush1.bf16.msra.mxu0 %v6754_v41 }
 0x1f2   :  { %3635 = vmatprep.subr.bf16.mxu0 %v6755_v5  ;;  %3253 = vmatpush1.bf16.msra.mxu1 %v6756_v50  ;;  %v3702_v5 = vld [vmem:[#allocation5] sm:$0xff] }
 0x1f3   :  { %3255 = vmatprep.subr.bf16.mxu1 %v6757_v56  ;;  %v3703_v56 = vld [vmem:[#allocation5 + $0x8] sm:$0xff] }
 0x1f5   :  { %3637 = vmatpush1.bf16.msra.mxu0 %v6758_v21 }
 0x1f6   :  { %3639 = vmatprep.subr.bf16.mxu0 %v6759_v34  ;;  %3257 = vmatpush1.bf16.msra.mxu1 %v6760_v24 }
 0x1f7   :  { %3259 = vmatprep.subr.bf16.mxu1 %v6761_v51 }
 0x1f9   :  { %3641 = vmatpush1.bf16.msra.mxu0 %v6762_v22 }
 0x1fa   :  { %3643 = vmatprep.subr.bf16.mxu0 %v6763_v53  ;;  %3261 = vmatpush1.bf16.msra.mxu1 %v6764_v37 }
 0x1fb   :  { %3263 = vmatprep.subr.bf16.mxu1 %v6765_v10 }
 0x1fd   :  { %3645 = vmatpush1.bf16.msra.mxu0 %v6766_v54 }
 0x1fe   :  { %3647 = vmatprep.subr.bf16.mxu0 %v6767_v16  ;;  %3265 = vmatpush1.bf16.msra.mxu1 %v6768_v13 }
 0x1ff   :  { %3267 = vmatprep.subr.bf16.mxu1 %v6769_v30 }
 0x201   :  { %3649 = vmatpush1.bf16.msra.mxu0 %v6770_v44 }
 0x202   :  { %3651 = vmatprep.subr.bf16.mxu0 %v6771_v25  ;;  %3269 = vmatpush1.bf16.msra.mxu1 %v6772_v46 }
 0x203   :  { %3271 = vmatprep.subr.bf16.mxu1 %v6773_v19 }
 0x205   :  { %3653 = vmatpush1.bf16.msra.mxu0 %v6774_v4 }
 0x206   :  { %3655 = vmatprep.subr.bf16.mxu0 %v6775_v59  ;;  %3273 = vmatpush1.bf16.msra.mxu1 %v6776_v60 }
 0x207   :  { %3275 = vmatprep.subr.bf16.mxu1 %v6777_v6 }
 0x209   :  { %3657 = vmatpush1.bf16.msra.mxu0 %v6778_v27 }
 0x20a   :  { %3659 = vmatprep.subr.bf16.mxu0 %v6779_v52  ;;  %3277 = vmatpush1.bf16.msra.mxu1 %v6780_v17 }
 0x20b   :  { %3279 = vmatprep.subr.bf16.mxu1 %v6781_v15 }
 0x20d   :  { %3661 = vmatpush1.bf16.msra.mxu0 %v6782_v49 }
 0x20e   :  { %3663 = vmatprep.subr.bf16.mxu0 %v6783_v26  ;;  %3281 = vmatpush1.bf16.msra.mxu1 %v6784_v39 }
 0x211   :  { %3665 = vmatpush1.bf16.msra.mxu0 %v6785_v57  ;;  %1525 = vmatmul.mubr.f32.vlgmr.msra.gmra.mrb[0].mxu1 %v6720_v45 }
 0x214   :  { %2817 = vmatmul.mubr.f32.vlgmr.msra.gmra.mrb[0].mxu0 %v6724_v62 }
 0x2e4   :  { %v1526_v9 = vpop.f32.mrb[0].mxu1 }
 0x2e5   :  { %v1528_v1 = vpop.f32.mrb[1].mxu1 }
 0x2e7   :  { %v2818_v33 = vpop.f32.mrb[0].mxu0 }
 0x2e8   :  { %v3666_v61 = vadd.f32 %v2818_v33, %v1526_v9  ;;  %v2820_v28 = vpop.f32.mrb[1].mxu0 }
 0x2e9   :  { %v3667_v7 = vadd.f32 %v2820_v28, %v1528_v1 }
 0x2ea   :  { %v2823_v14 = vmul.f32 0.5, %v3666_v61 }
 0x2eb   :  { %v2824_v12 = vmul.f32 0.5, %v3667_v7 }
 0x2ec   :  { %3698 = vtanh.f32 %v2823_v14 }
 0x2ed   :  { %3700 = vtanh.f32 %v2824_v12 }
 0x2f6   :  { %v3699_v23 = vpop.eup %3698 }
 0x2f7   :  { %v3701_v42 = vpop.eup %3700  ;;  %v2827_v45 = vadd.f32 1.0, %v3699_v23 }
 0x2f8   :  { %v2828_v48 = vadd.f32 1.0, %v3701_v42 }
 0x2f9   :  { %v2829_v62 = vmul.f32 0.5, %v2827_v45 }
 0x2fa   :  { %v2830_v2 = vmul.f32 0.5, %v2828_v48 }
 0x2fc   :  { %v2833_v47 = vcombine.low %v2829_v62, %v2830_v2 }
 0x2fe   :  { %v2840_v8 = vrot.slane %v2833_v47, %v2839_v11 }
 0x300   :  { %v2841_v31 = vcombine.high %v2840_v8, %v2840_v8  ;;  %v2848_v63 = vrot.slane %v2840_v8, %v2839_v11 }
 0x302   :  { %v2855_v35 = vrot.slane %v2841_v31, %v2839_v11  ;;  %v2859_v18 = vrot.slane %v2848_v63, %v2858_v29  ;;  %v2863_v3 = vrot.slane %v2848_v63, %v2862_v0 }
 0x304   :  { %v2867_v36 = vrot.slane %v2855_v35, %v2858_v29  ;;  %v2871_v43 = vrot.slane %v2855_v35, %v2862_v0  ;;  %v2872_v58 = vcombine.low %v2859_v18, %v2863_v3 }
 0x306   :  { %v2873_v41 = vcombine.low %v2867_v36, %v2871_v43  ;;  %v2876_v50 = vmul.f32 %v3702_v5, %v2872_v58 }
 0x308   :  { %v2877_v21 = vmul.f32 %v3703_v56, %v2873_v41  ;;  %2878 = vst [vmem:[#allocation7] sm:$0xff] %v2876_v50 }
 0x30a   :  { %2879 = vst [vmem:[#allocation7 + $0x8] sm:$0xff] %v2877_v21 }
 0x30b   :  { %3759 = shalt.err (!%p3756_p6)
}
 0x30c   :  { %s3760_s12 = scalar_lea.hbm %s5495_s2, 256 }
 0x30d   :  { %p3761_p7 = scmp.ne.s32.totalorder %s5495_s2, %s3760_s12  ;;  %p3764_p8 = scmp.lt.u32.totalorder %s3760_s12, %s5495_s2 }
 0x30f   :  { %p3766_p9 = pnand %p3764_p8, %p3761_p7 }
 0x311   :  { %3769 = shalt.err (!%p3766_p9)
}
 0x312   :  { %2891 = dma.vmem_to_hbm [thread:$0]  %s2886_s8, 256, %s5495_s2, [#allocation4], %s3780_s0, %s3780_s0, %s3781_s5  }
 0x313   :  { %3774 = dma.done.wait [#allocation4], 256  }
 0x314   :  { %3775 = vsyncadd [#allocation4], 4294967040 }
 0x315   :  { %2895 = vsyncpa [#allocation3], 1 }
 0x316   :  { %2896 = vsyncpa [#allocation6], 1 }
 0x317   :  { %2897 = vsyncpa [#allocation4], 1 }

</bundles_post_ra>
